<compile_context>
chip_gen: v6e
topology: v6e:2x2x1
jax: 0.10.0
libtpu: 0.0.40
codegen_flags: <defaults>
</compile_context>

<pallas_src>
import functools

import jax
import jax.numpy as jnp
from jax.experimental import pallas as pl
from jax.experimental.pallas import tpu as pltpu


# ----------------------------------------------------------------------------
# Pallas kernel: full DCGRU time recurrence for one layer (h-path only).
# Everything is VMEM-resident; no grid.
# ----------------------------------------------------------------------------
def dcgru_recurrent_kernel(s_ref, gxru_ref, gxc_ref, h0_ref, whru_ref, whc_ref,
                           out_ref, *, batch, num_nodes, num_matrices):
    B, N, M = batch, num_nodes, num_matrices
    T = out_ref.shape[0]
    H = whc_ref.shape[-1]

    # Loop-invariant loads, hoisted out of the time loop.
    S = s_ref[...]                       # (N, N)
    W_ru = whru_ref[...]                 # (M, H, 2H)   fused r|u columns
    W_c = whc_ref[...]                   # (M, H, H)

    def cheb_apply(v):
        # v: (B*N, F), batch-major rows.  Apply the support on the node dim of
        # every batch element: B small dense (N, N) @ (N, F) matmuls with the
        # shared S (no block-diagonal inflation of FLOPs / bytes).
        parts = [
            jnp.dot(S, v[b * N:(b + 1) * N, :],
                    preferred_element_type=jnp.float32)
            for b in range(B)
        ]
        return parts[0] if B == 1 else jnp.concatenate(parts, axis=0)

    def h_path(v, W):
        # sum_m T_m(v) @ W[m], Chebyshev recursion T_k = 2 S T_{k-1} - T_{k-2}.
        # Per-term accumulation (no lane concat); the projection of term m can
        # overlap with computing term m+1 on the MXU.
        acc = jnp.dot(v, W[0], preferred_element_type=jnp.float32)
        if M > 1:
            tm2, tm1 = v, cheb_apply(v)
            acc = acc + jnp.dot(tm1, W[1], preferred_element_type=jnp.float32)
            for m in range(2, M):
                tk = 2.0 * cheb_apply(tm1) - tm2
                acc = acc + jnp.dot(tk, W[m], preferred_element_type=jnp.float32)
                tm2, tm1 = tm1, tk
        return acc

    def step(t, h):
        # gxru_ref[t] / gxc_ref[t] already contain the x-projections + biases.
        g = jax.nn.sigmoid(gxru_ref[t] + h_path(h, W_ru))        # (B*N, 2H)
        r, u = g[:, :H], g[:, H:]
        c = jnp.tanh(gxc_ref[t] + h_path(r * h, W_c))            # (B*N, H)
        h_new = u * h + (1.0 - u) * c
        out_ref[t] = h_new
        return h_new

    if T <= 32:
        # Short static sequence: fully unroll so every gx load / out store has
        # a static index and the LLO scheduler sees the whole recurrence.
        h = h0_ref[...]
        for t in range(T):
            h = step(t, h)
    else:
        jax.lax.fori_loop(0, T, step, h0_ref[...])


def dcgru_recurrence(support, gx_ru, gx_c, h0, wh_ru, wh_c, *,
                     batch, num_nodes, num_matrices):
    # support (N, N); gx_ru (T, B*N, 2H); gx_c (T, B*N, H); h0 (B*N, H)
    # wh_ru (M, H, 2H); wh_c (M, H, H)   ->   (T, B*N, H) hidden sequence
    T, R, H = gx_c.shape
    vmem = pl.BlockSpec(memory_space=pltpu.MemorySpace.VMEM)
    return pl.pallas_call(
        functools.partial(dcgru_recurrent_kernel, batch=batch,
                          num_nodes=num_nodes, num_matrices=num_matrices),
        out_shape=jax.ShapeDtypeStruct((T, R, H), jnp.float32),
        in_specs=[vmem] * 6,
        out_specs=vmem,
    )(support, gx_ru, gx_c, h0, wh_ru, wh_c)


# ----------------------------------------------------------------------------
# Hoisted, h-independent x-path: one big parallel matmul per layer (plain XLA),
# computed for all timesteps before the recurrence (per the perf review).
# ----------------------------------------------------------------------------
def dcgru_x_path(x, support, p, *, num_matrices):
    # x: (T, B, N, Fin) -> gx_ru (T, B*N, 2H), gx_c (T, B*N, H)  (batch-major rows)
    T, B, N, _ = x.shape
    M = num_matrices
    hp = jax.lax.Precision.HIGHEST
    terms = [x]
    if M > 1:
        t1 = jnp.einsum('nm,tbmf->tbnf', support, x, precision=hp)
        terms.append(t1)
        tm2, tm1 = x, t1
        for _ in range(2, M):
            tk = 2.0 * jnp.einsum('nm,tbmf->tbnf', support, tm1,
                                  precision=hp) - tm2
            terms.append(tk)
            tm2, tm1 = tm1, tk
    Xs = jnp.stack(terms, axis=0)                              # (M, T, B, N, Fin)
    gx_ru = jnp.einsum('mtbnf,mfo->tbno', Xs, p['wx_ru'], precision=hp) + p['b_ru']
    gx_c = jnp.einsum('mtbnf,mfo->tbno', Xs, p['wx_c'], precision=hp) + p['b_c']
    H = gx_c.shape[-1]
    return gx_ru.reshape(T, B * N, 2 * H), gx_c.reshape(T, B * N, H)


# ----------------------------------------------------------------------------
# Parameter setup.  Mimics DiffusionGraphConv: full weight (F_tot*M, out) with
# row index f*M + m, gate bias_start=1.0, candidate bias 0.0 — then split into
# x / h rows and reordered per Chebyshev term.  No batch dependence.
# ----------------------------------------------------------------------------
def init_layer_params(key, din, hid_dim, num_matrices):
    F, M, H = din + hid_dim, num_matrices, hid_dim
    kg, kc = jax.random.split(key)
    wg = jax.random.normal(kg, (F * M, 2 * H), jnp.float32) * \
        (2.0 / (F * M + 2 * H)) ** 0.5                 # xavier_normal-like
    wc = jax.random.normal(kc, (F * M, H), jnp.float32) * \
        (2.0 / (F * M + H)) ** 0.5
    bg = jnp.full((2 * H,), 1.0, jnp.float32)          # gate bias_start = 1.0
    bc = jnp.zeros((H,), jnp.float32)                  # candidate bias = 0.0

    def split_parts(w, out_dim):
        wt = w.reshape(F, M, out_dim)                  # torch row order f*M + m
        wx = jnp.transpose(wt[:din], (1, 0, 2))        # (M, din, out)
        wh = jnp.transpose(wt[din:], (1, 0, 2))        # (M, H,   out)
        return wx, wh

    wx_ru, wh_ru = split_parts(wg, 2 * H)
    wx_c, wh_c = split_parts(wc, H)
    p = dict(wx_ru=wx_ru, wh_ru=wh_ru, wx_c=wx_c, wh_c=wh_c, b_ru=bg, b_c=bc)
    raw = (wg, bg, wc, bc)                             # torch layout, for reference
    return p, raw


# ----------------------------------------------------------------------------
# DCRNNEncoder.forward equivalent (layer loop + boundary layout glue in JAX)
# ----------------------------------------------------------------------------
def dcrnn_encoder_forward(inputs, initial_hidden_state, support, params, *,
                          num_nodes, hid_dim, num_matrices):
    # inputs               : (seq, batch, num_nodes, input_dim)
    # initial_hidden_state : (num_layers, batch, num_nodes * hid_dim)
    # support              : (num_nodes, num_nodes)
    T, B = inputs.shape[0], inputs.shape[1]
    N, H = num_nodes, hid_dim

    x = inputs                                                  # (T, B, N, Fin)
    hidden_out = []
    for l, p in enumerate(params):
        # 1) Parallel, h-independent x-path for all timesteps (plain XLA).
        gx_ru, gx_c = dcgru_x_path(x, support, p, num_matrices=num_matrices)
        # 2) Serial h-path recurrence in a single grid-less Pallas kernel.
        h0 = initial_hidden_state[l].reshape(B * N, H)
        out = dcgru_recurrence(support, gx_ru, gx_c, h0, p['wh_ru'], p['wh_c'],
                               batch=B, num_nodes=N, num_matrices=num_matrices)
        hidden_out.append(out[T - 1].reshape(B, N * H))
        x = out.reshape(T, B, N, H)                             # next layer input

    output_hidden = jnp.stack(hidden_out, axis=0)               # (L, B, N*H)
    output = x.reshape(T, B, N * H)                             # (T, B, N*H)
    return output_hidden, output


def init_hidden(num_layers, batch, num_nodes, hid_dim):
    return jnp.zeros((num_layers, batch, num_nodes * hid_dim), jnp.float32)


# ----------------------------------------------------------------------------
# Pure-JAX reference (mirrors the PyTorch math directly) for correctness check
# ----------------------------------------------------------------------------
def reference_forward(inputs, initial_hidden_state, support, raw_params, *,
                      num_nodes, hid_dim, num_matrices):
    T, B = inputs.shape[0], inputs.shape[1]
    N, H, M = num_nodes, hid_dim, num_matrices
    hp = jax.lax.Precision.HIGHEST

    def diff_conv(x, h, W, b):
        x0 = jnp.concatenate([x, h], axis=-1)                   # (B, N, F)
        terms = [x0]
        if M > 1:
            t1 = jnp.einsum('nm,bmf->bnf', support, x0, precision=hp)
            terms.append(t1)
            tm2, tm1 = x0, t1
            for _ in range(2, M):
                tk = 2.0 * jnp.einsum('nm,bmf->bnf', support, tm1,
                                      precision=hp) - tm2
                terms.append(tk)
                tm2, tm1 = tm1, tk
        X = jnp.stack(terms, axis=0)                            # (M, B, N, F)
        F = X.shape[-1]
        X = jnp.transpose(X, (1, 2, 3, 0)).reshape(B * N, F * M)  # col = f*M+m
        return (jnp.dot(X, W, precision=hp) + b).reshape(B, N, -1)

    cur = inputs
    out_hidden = []
    for l, (wg, bg, wc, bc) in enumerate(raw_params):
        h = initial_hidden_state[l].reshape(B, N, H)
        outs = []
        for t in range(T):
            gates = jax.nn.sigmoid(diff_conv(cur[t], h, wg, bg))
            r, u = gates[..., :H], gates[..., H:]
            c = jnp.tanh(diff_conv(cur[t], r * h, wc, bc))
            h = u * h + (1.0 - u) * c
            outs.append(h)
        out_hidden.append(h.reshape(B, N * H))
        cur = jnp.stack(outs, axis=0)
    return jnp.stack(out_hidden, axis=0), cur.reshape(T, B, N * H)


if __name__ == "__main__":
    # model config
    input_dim = 4
    hid_dim = 32
    num_nodes = 16
    max_diffusion_step = 2
    num_rnn_layers = 2
    num_supports = 1                       # filter_type='laplacian'
    num_matrices = num_supports * max_diffusion_step + 1
    # data config
    seq_len = 8
    batch = 2

    key = jax.random.PRNGKey(0)
    k_in, k_sup, k_p, k_h = jax.random.split(key, 4)

    inputs = jax.random.normal(
        k_in, (seq_len, batch, num_nodes, input_dim), jnp.float32)

    # deterministic symmetric, row-normalized support (stand-in for the scaled
    # Laplacian; torch.sparse.mm becomes a dense (N, N) matmul)
    a = jnp.abs(jax.random.normal(k_sup, (num_nodes, num_nodes), jnp.float32))
    a = 0.5 * (a + a.T)
    support = a / jnp.sum(a, axis=1, keepdims=True)

    layer_keys = jax.random.split(k_p, num_rnn_layers)
    params, raw_params = [], []
    p0, r0 = init_layer_params(layer_keys[0], input_dim, hid_dim, num_matrices)
    params.append(p0)
    raw_params.append(r0)
    for l in range(1, num_rnn_layers):
        p_l, r_l = init_layer_params(layer_keys[l], hid_dim, hid_dim,
                                     num_matrices)
        params.append(p_l)
        raw_params.append(r_l)

    # non-zero initial hidden state to exercise the full forward path
    h0 = 0.1 * jax.random.normal(
        k_h, (num_rnn_layers, batch, num_nodes * hid_dim), jnp.float32)

    fwd = jax.jit(functools.partial(
        dcrnn_encoder_forward, num_nodes=num_nodes, hid_dim=hid_dim,
        num_matrices=num_matrices))
    output_hidden, output = fwd(inputs, h0, support, params)
    output_hidden, output = jax.block_until_ready((output_hidden, output))

    ref_hidden, ref_output = reference_forward(
        inputs, h0, support, raw_params, num_nodes=num_nodes,
        hid_dim=hid_dim, num_matrices=num_matrices)

    assert output_hidden.shape == (num_rnn_layers, batch, num_nodes * hid_dim)
    assert output.shape == (seq_len, batch, num_nodes * hid_dim)
    assert bool(jnp.all(jnp.isfinite(output_hidden)))
    assert bool(jnp.all(jnp.isfinite(output)))

    err_h = float(jnp.max(jnp.abs(output_hidden - ref_hidden)))
    err_o = float(jnp.max(jnp.abs(output - ref_output)))
    assert err_h < 2e-3 and err_o < 2e-3, (err_h, err_o)

    print("KERNEL_OK")
</pallas_src>

<mosaic_0001>
module attributes {stable_mosaic.version = 11 : i64} {
  func.func @dcgru_recurrent_kernel(%arg0: memref<16x16xf32, #tpu.memory_space<vmem>>, %arg1: memref<8x32x64xf32, #tpu.memory_space<vmem>>, %arg2: memref<8x32x32xf32, #tpu.memory_space<vmem>>, %arg3: memref<32x32xf32, #tpu.memory_space<vmem>>, %arg4: memref<3x32x64xf32, #tpu.memory_space<vmem>>, %arg5: memref<3x32x32xf32, #tpu.memory_space<vmem>>, %arg6: memref<8x32x32xf32, #tpu.memory_space<vmem>>) attributes {dimension_semantics = [], scalar_prefetch = 0 : i64, scratch_operands = 0 : i64, tpu.core_type = #tpu.core_type<tc>} {
    %c0 = arith.constant 0 : index
    %c0_0 = arith.constant 0 : index
    %0 = vector.load %arg0[%c0, %c0_0] : memref<16x16xf32, #tpu.memory_space<vmem>>, vector<16x16xf32>
    %c0_1 = arith.constant 0 : index
    %c0_2 = arith.constant 0 : index
    %c0_3 = arith.constant 0 : index
    %1 = vector.load %arg4[%c0_1, %c0_2, %c0_3] : memref<3x32x64xf32, #tpu.memory_space<vmem>>, vector<3x32x64xf32>
    %c0_4 = arith.constant 0 : index
    %c0_5 = arith.constant 0 : index
    %c0_6 = arith.constant 0 : index
    %2 = vector.load %arg5[%c0_4, %c0_5, %c0_6] : memref<3x32x32xf32, #tpu.memory_space<vmem>>, vector<3x32x32xf32>
    %c0_7 = arith.constant 0 : index
    %c0_8 = arith.constant 0 : index
    %3 = vector.load %arg3[%c0_7, %c0_8] : memref<32x32xf32, #tpu.memory_space<vmem>>, vector<32x32xf32>
    %c0_9 = arith.constant 0 : index
    %c0_10 = arith.constant 0 : index
    %c0_11 = arith.constant 0 : index
    %4 = vector.load %arg1[%c0_9, %c0_10, %c0_11] : memref<8x32x64xf32, #tpu.memory_space<vmem>>, vector<1x32x64xf32>
    %5 = vector.shape_cast %4 : vector<1x32x64xf32> to vector<32x64xf32>
    %6 = vector.extract_strided_slice %1 {offsets = [0, 0, 0], sizes = [1, 32, 64], strides = [1, 1, 1]} : vector<3x32x64xf32> to vector<1x32x64xf32>
    %7 = vector.shape_cast %6 : vector<1x32x64xf32> to vector<32x64xf32>
    %cst = arith.constant dense<0.000000e+00> : vector<32x64xf32>
    %8 = tpu.matmul %3, %7, %cst {dimension_numbers = #tpu.dot_dimension_numbers<[1], [0], [0], [1], [0, 0, 1, 1], [], []>} : vector<32x32xf32>, vector<32x64xf32>, vector<32x64xf32> -> vector<32x64xf32>
    %9 = vector.extract_strided_slice %3 {offsets = [0, 0], sizes = [16, 32], strides = [1, 1]} : vector<32x32xf32> to vector<16x32xf32>
    %cst_12 = arith.constant dense<0.000000e+00> : vector<16x32xf32>
    %10 = tpu.matmul %0, %9, %cst_12 {dimension_numbers = #tpu.dot_dimension_numbers<[1], [0], [0], [1], [0, 0, 1, 1], [], []>} : vector<16x16xf32>, vector<16x32xf32>, vector<16x32xf32> -> vector<16x32xf32>
    %11 = vector.extract_strided_slice %3 {offsets = [16, 0], sizes = [16, 32], strides = [1, 1]} : vector<32x32xf32> to vector<16x32xf32>
    %cst_13 = arith.constant dense<0.000000e+00> : vector<16x32xf32>
    %12 = tpu.matmul %0, %11, %cst_13 {dimension_numbers = #tpu.dot_dimension_numbers<[1], [0], [0], [1], [0, 0, 1, 1], [], []>} : vector<16x16xf32>, vector<16x32xf32>, vector<16x32xf32> -> vector<16x32xf32>
    %13 = tpu.concatenate %10, %12 in 0 : vector<16x32xf32>, vector<16x32xf32> -> vector<32x32xf32>
    %14 = vector.extract_strided_slice %1 {offsets = [1, 0, 0], sizes = [1, 32, 64], strides = [1, 1, 1]} : vector<3x32x64xf32> to vector<1x32x64xf32>
    %15 = vector.shape_cast %14 : vector<1x32x64xf32> to vector<32x64xf32>
    %cst_14 = arith.constant dense<0.000000e+00> : vector<32x64xf32>
    %16 = tpu.matmul %13, %15, %cst_14 {dimension_numbers = #tpu.dot_dimension_numbers<[1], [0], [0], [1], [0, 0, 1, 1], [], []>} : vector<32x32xf32>, vector<32x64xf32>, vector<32x64xf32> -> vector<32x64xf32>
    %17 = arith.addf %8, %16 : vector<32x64xf32>
    %18 = vector.extract_strided_slice %13 {offsets = [0, 0], sizes = [16, 32], strides = [1, 1]} : vector<32x32xf32> to vector<16x32xf32>
    %cst_15 = arith.constant dense<0.000000e+00> : vector<16x32xf32>
    %19 = tpu.matmul %0, %18, %cst_15 {dimension_numbers = #tpu.dot_dimension_numbers<[1], [0], [0], [1], [0, 0, 1, 1], [], []>} : vector<16x16xf32>, vector<16x32xf32>, vector<16x32xf32> -> vector<16x32xf32>
    %20 = vector.extract_strided_slice %13 {offsets = [16, 0], sizes = [16, 32], strides = [1, 1]} : vector<32x32xf32> to vector<16x32xf32>
    %cst_16 = arith.constant dense<0.000000e+00> : vector<16x32xf32>
    %21 = tpu.matmul %0, %20, %cst_16 {dimension_numbers = #tpu.dot_dimension_numbers<[1], [0], [0], [1], [0, 0, 1, 1], [], []>} : vector<16x16xf32>, vector<16x32xf32>, vector<16x32xf32> -> vector<16x32xf32>
    %22 = tpu.concatenate %19, %21 in 0 : vector<16x32xf32>, vector<16x32xf32> -> vector<32x32xf32>
    %cst_17 = arith.constant 2.000000e+00 : f32
    %23 = vector.broadcast %cst_17 : f32 to vector<32x32xf32>
    %24 = arith.mulf %23, %22 : vector<32x32xf32>
    %25 = arith.subf %24, %3 : vector<32x32xf32>
    %26 = vector.extract_strided_slice %1 {offsets = [2, 0, 0], sizes = [1, 32, 64], strides = [1, 1, 1]} : vector<3x32x64xf32> to vector<1x32x64xf32>
    %27 = vector.shape_cast %26 : vector<1x32x64xf32> to vector<32x64xf32>
    %cst_18 = arith.constant dense<0.000000e+00> : vector<32x64xf32>
    %28 = tpu.matmul %25, %27, %cst_18 {dimension_numbers = #tpu.dot_dimension_numbers<[1], [0], [0], [1], [0, 0, 1, 1], [], []>} : vector<32x32xf32>, vector<32x64xf32>, vector<32x64xf32> -> vector<32x64xf32>
    %29 = arith.addf %17, %28 : vector<32x64xf32>
    %30 = arith.addf %5, %29 : vector<32x64xf32>
    %31 = arith.negf %30 : vector<32x64xf32>
    %32 = math.exp %31 : vector<32x64xf32>
    %cst_19 = arith.constant 1.000000e+00 : f32
    %33 = vector.broadcast %cst_19 : f32 to vector<32x64xf32>
    %34 = arith.addf %33, %32 : vector<32x64xf32>
    %35 = arith.divf %33, %34 : vector<32x64xf32>
    %36 = vector.extract_strided_slice %35 {offsets = [0, 0], sizes = [32, 32], strides = [1, 1]} : vector<32x64xf32> to vector<32x32xf32>
    %37 = vector.extract_strided_slice %35 {offsets = [0, 32], sizes = [32, 32], strides = [1, 1]} : vector<32x64xf32> to vector<32x32xf32>
    %c0_20 = arith.constant 0 : index
    %c0_21 = arith.constant 0 : index
    %c0_22 = arith.constant 0 : index
    %38 = vector.load %arg2[%c0_20, %c0_21, %c0_22] : memref<8x32x32xf32, #tpu.memory_space<vmem>>, vector<1x32x32xf32>
    %39 = vector.shape_cast %38 : vector<1x32x32xf32> to vector<32x32xf32>
    %40 = arith.mulf %36, %3 : vector<32x32xf32>
    %41 = vector.extract_strided_slice %2 {offsets = [0, 0, 0], sizes = [1, 32, 32], strides = [1, 1, 1]} : vector<3x32x32xf32> to vector<1x32x32xf32>
    %42 = vector.shape_cast %41 : vector<1x32x32xf32> to vector<32x32xf32>
    %cst_23 = arith.constant dense<0.000000e+00> : vector<32x32xf32>
    %43 = tpu.matmul %40, %42, %cst_23 {dimension_numbers = #tpu.dot_dimension_numbers<[1], [0], [0], [1], [0, 0, 1, 1], [], []>} : vector<32x32xf32>, vector<32x32xf32>, vector<32x32xf32> -> vector<32x32xf32>
    %44 = vector.extract_strided_slice %40 {offsets = [0, 0], sizes = [16, 32], strides = [1, 1]} : vector<32x32xf32> to vector<16x32xf32>
    %cst_24 = arith.constant dense<0.000000e+00> : vector<16x32xf32>
    %45 = tpu.matmul %0, %44, %cst_24 {dimension_numbers = #tpu.dot_dimension_numbers<[1], [0], [0], [1], [0, 0, 1, 1], [], []>} : vector<16x16xf32>, vector<16x32xf32>, vector<16x32xf32> -> vector<16x32xf32>
    %46 = vector.extract_strided_slice %40 {offsets = [16, 0], sizes = [16, 32], strides = [1, 1]} : vector<32x32xf32> to vector<16x32xf32>
    %cst_25 = arith.constant dense<0.000000e+00> : vector<16x32xf32>
    %47 = tpu.matmul %0, %46, %cst_25 {dimension_numbers = #tpu.dot_dimension_numbers<[1], [0], [0], [1], [0, 0, 1, 1], [], []>} : vector<16x16xf32>, vector<16x32xf32>, vector<16x32xf32> -> vector<16x32xf32>
    %48 = tpu.concatenate %45, %47 in 0 : vector<16x32xf32>, vector<16x32xf32> -> vector<32x32xf32>
    %49 = vector.extract_strided_slice %2 {offsets = [1, 0, 0], sizes = [1, 32, 32], strides = [1, 1, 1]} : vector<3x32x32xf32> to vector<1x32x32xf32>
    %50 = vector.shape_cast %49 : vector<1x32x32xf32> to vector<32x32xf32>
    %cst_26 = arith.constant dense<0.000000e+00> : vector<32x32xf32>
    %51 = tpu.matmul %48, %50, %cst_26 {dimension_numbers = #tpu.dot_dimension_numbers<[1], [0], [0], [1], [0, 0, 1, 1], [], []>} : vector<32x32xf32>, vector<32x32xf32>, vector<32x32xf32> -> vector<32x32xf32>
    %52 = arith.addf %43, %51 : vector<32x32xf32>
    %53 = vector.extract_strided_slice %48 {offsets = [0, 0], sizes = [16, 32], strides = [1, 1]} : vector<32x32xf32> to vector<16x32xf32>
    %cst_27 = arith.constant dense<0.000000e+00> : vector<16x32xf32>
    %54 = tpu.matmul %0, %53, %cst_27 {dimension_numbers = #tpu.dot_dimension_numbers<[1], [0], [0], [1], [0, 0, 1, 1], [], []>} : vector<16x16xf32>, vector<16x32xf32>, vector<16x32xf32> -> vector<16x32xf32>
    %55 = vector.extract_strided_slice %48 {offsets = [16, 0], sizes = [16, 32], strides = [1, 1]} : vector<32x32xf32> to vector<16x32xf32>
    %cst_28 = arith.constant dense<0.000000e+00> : vector<16x32xf32>
    %56 = tpu.matmul %0, %55, %cst_28 {dimension_numbers = #tpu.dot_dimension_numbers<[1], [0], [0], [1], [0, 0, 1, 1], [], []>} : vector<16x16xf32>, vector<16x32xf32>, vector<16x32xf32> -> vector<16x32xf32>
    %57 = tpu.concatenate %54, %56 in 0 : vector<16x32xf32>, vector<16x32xf32> -> vector<32x32xf32>
    %cst_29 = arith.constant 2.000000e+00 : f32
    %58 = vector.broadcast %cst_29 : f32 to vector<32x32xf32>
    %59 = arith.mulf %58, %57 : vector<32x32xf32>
    %60 = arith.subf %59, %40 : vector<32x32xf32>
    %61 = vector.extract_strided_slice %2 {offsets = [2, 0, 0], sizes = [1, 32, 32], strides = [1, 1, 1]} : vector<3x32x32xf32> to vector<1x32x32xf32>
    %62 = vector.shape_cast %61 : vector<1x32x32xf32> to vector<32x32xf32>
    %cst_30 = arith.constant dense<0.000000e+00> : vector<32x32xf32>
    %63 = tpu.matmul %60, %62, %cst_30 {dimension_numbers = #tpu.dot_dimension_numbers<[1], [0], [0], [1], [0, 0, 1, 1], [], []>} : vector<32x32xf32>, vector<32x32xf32>, vector<32x32xf32> -> vector<32x32xf32>
    %64 = arith.addf %52, %63 : vector<32x32xf32>
    %65 = arith.addf %39, %64 : vector<32x32xf32>
    %66 = math.tanh %65 : vector<32x32xf32>
    %67 = arith.mulf %37, %3 : vector<32x32xf32>
    %cst_31 = arith.constant 1.000000e+00 : f32
    %68 = vector.broadcast %cst_31 : f32 to vector<32x32xf32>
    %69 = arith.subf %68, %37 : vector<32x32xf32>
    %70 = arith.mulf %69, %66 : vector<32x32xf32>
    %71 = arith.addf %67, %70 : vector<32x32xf32>
    %c0_32 = arith.constant 0 : index
    %c0_33 = arith.constant 0 : index
    %c0_34 = arith.constant 0 : index
    %72 = vector.load %arg6[%c0_32, %c0_33, %c0_34] : memref<8x32x32xf32, #tpu.memory_space<vmem>>, vector<1x32x32xf32>
    %73 = vector.shape_cast %72 : vector<1x32x32xf32> to vector<32x32xf32>
    %74 = vector.shape_cast %71 : vector<32x32xf32> to vector<1x32x32xf32>
    tpu.vector_store %arg6[%c0_32, %c0_33, %c0_34], %74 {strides = array<i32>} : memref<8x32x32xf32, #tpu.memory_space<vmem>>, vector<1x32x32xf32>,
    %c1 = arith.constant 1 : index
    %c0_35 = arith.constant 0 : index
    %c0_36 = arith.constant 0 : index
    %75 = vector.load %arg1[%c1, %c0_35, %c0_36] : memref<8x32x64xf32, #tpu.memory_space<vmem>>, vector<1x32x64xf32>
    %76 = vector.shape_cast %75 : vector<1x32x64xf32> to vector<32x64xf32>
    %77 = vector.extract_strided_slice %1 {offsets = [0, 0, 0], sizes = [1, 32, 64], strides = [1, 1, 1]} : vector<3x32x64xf32> to vector<1x32x64xf32>
    %78 = vector.shape_cast %77 : vector<1x32x64xf32> to vector<32x64xf32>
    %cst_37 = arith.constant dense<0.000000e+00> : vector<32x64xf32>
    %79 = tpu.matmul %71, %78, %cst_37 {dimension_numbers = #tpu.dot_dimension_numbers<[1], [0], [0], [1], [0, 0, 1, 1], [], []>} : vector<32x32xf32>, vector<32x64xf32>, vector<32x64xf32> -> vector<32x64xf32>
    %80 = vector.extract_strided_slice %71 {offsets = [0, 0], sizes = [16, 32], strides = [1, 1]} : vector<32x32xf32> to vector<16x32xf32>
    %cst_38 = arith.constant dense<0.000000e+00> : vector<16x32xf32>
    %81 = tpu.matmul %0, %80, %cst_38 {dimension_numbers = #tpu.dot_dimension_numbers<[1], [0], [0], [1], [0, 0, 1, 1], [], []>} : vector<16x16xf32>, vector<16x32xf32>, vector<16x32xf32> -> vector<16x32xf32>
    %82 = vector.extract_strided_slice %71 {offsets = [16, 0], sizes = [16, 32], strides = [1, 1]} : vector<32x32xf32> to vector<16x32xf32>
    %cst_39 = arith.constant dense<0.000000e+00> : vector<16x32xf32>
    %83 = tpu.matmul %0, %82, %cst_39 {dimension_numbers = #tpu.dot_dimension_numbers<[1], [0], [0], [1], [0, 0, 1, 1], [], []>} : vector<16x16xf32>, vector<16x32xf32>, vector<16x32xf32> -> vector<16x32xf32>
    %84 = tpu.concatenate %81, %83 in 0 : vector<16x32xf32>, vector<16x32xf32> -> vector<32x32xf32>
    %85 = vector.extract_strided_slice %1 {offsets = [1, 0, 0], sizes = [1, 32, 64], strides = [1, 1, 1]} : vector<3x32x64xf32> to vector<1x32x64xf32>
    %86 = vector.shape_cast %85 : vector<1x32x64xf32> to vector<32x64xf32>
    %cst_40 = arith.constant dense<0.000000e+00> : vector<32x64xf32>
    %87 = tpu.matmul %84, %86, %cst_40 {dimension_numbers = #tpu.dot_dimension_numbers<[1], [0], [0], [1], [0, 0, 1, 1], [], []>} : vector<32x32xf32>, vector<32x64xf32>, vector<32x64xf32> -> vector<32x64xf32>
    %88 = arith.addf %79, %87 : vector<32x64xf32>
    %89 = vector.extract_strided_slice %84 {offsets = [0, 0], sizes = [16, 32], strides = [1, 1]} : vector<32x32xf32> to vector<16x32xf32>
    %cst_41 = arith.constant dense<0.000000e+00> : vector<16x32xf32>
    %90 = tpu.matmul %0, %89, %cst_41 {dimension_numbers = #tpu.dot_dimension_numbers<[1], [0], [0], [1], [0, 0, 1, 1], [], []>} : vector<16x16xf32>, vector<16x32xf32>, vector<16x32xf32> -> vector<16x32xf32>
    %91 = vector.extract_strided_slice %84 {offsets = [16, 0], sizes = [16, 32], strides = [1, 1]} : vector<32x32xf32> to vector<16x32xf32>
    %cst_42 = arith.constant dense<0.000000e+00> : vector<16x32xf32>
    %92 = tpu.matmul %0, %91, %cst_42 {dimension_numbers = #tpu.dot_dimension_numbers<[1], [0], [0], [1], [0, 0, 1, 1], [], []>} : vector<16x16xf32>, vector<16x32xf32>, vector<16x32xf32> -> vector<16x32xf32>
    %93 = tpu.concatenate %90, %92 in 0 : vector<16x32xf32>, vector<16x32xf32> -> vector<32x32xf32>
    %cst_43 = arith.constant 2.000000e+00 : f32
    %94 = vector.broadcast %cst_43 : f32 to vector<32x32xf32>
    %95 = arith.mulf %94, %93 : vector<32x32xf32>
    %96 = arith.subf %95, %71 : vector<32x32xf32>
    %97 = vector.extract_strided_slice %1 {offsets = [2, 0, 0], sizes = [1, 32, 64], strides = [1, 1, 1]} : vector<3x32x64xf32> to vector<1x32x64xf32>
    %98 = vector.shape_cast %97 : vector<1x32x64xf32> to vector<32x64xf32>
    %cst_44 = arith.constant dense<0.000000e+00> : vector<32x64xf32>
    %99 = tpu.matmul %96, %98, %cst_44 {dimension_numbers = #tpu.dot_dimension_numbers<[1], [0], [0], [1], [0, 0, 1, 1], [], []>} : vector<32x32xf32>, vector<32x64xf32>, vector<32x64xf32> -> vector<32x64xf32>
    %100 = arith.addf %88, %99 : vector<32x64xf32>
    %101 = arith.addf %76, %100 : vector<32x64xf32>
    %102 = arith.negf %101 : vector<32x64xf32>
    %103 = math.exp %102 : vector<32x64xf32>
    %cst_45 = arith.constant 1.000000e+00 : f32
    %104 = vector.broadcast %cst_45 : f32 to vector<32x64xf32>
    %105 = arith.addf %104, %103 : vector<32x64xf32>
    %106 = arith.divf %104, %105 : vector<32x64xf32>
    %107 = vector.extract_strided_slice %106 {offsets = [0, 0], sizes = [32, 32], strides = [1, 1]} : vector<32x64xf32> to vector<32x32xf32>
    %108 = vector.extract_strided_slice %106 {offsets = [0, 32], sizes = [32, 32], strides = [1, 1]} : vector<32x64xf32> to vector<32x32xf32>
    %c1_46 = arith.constant 1 : index
    %c0_47 = arith.constant 0 : index
    %c0_48 = arith.constant 0 : index
    %109 = vector.load %arg2[%c1_46, %c0_47, %c0_48] : memref<8x32x32xf32, #tpu.memory_space<vmem>>, vector<1x32x32xf32>
    %110 = vector.shape_cast %109 : vector<1x32x32xf32> to vector<32x32xf32>
    %111 = arith.mulf %107, %71 : vector<32x32xf32>
    %112 = vector.extract_strided_slice %2 {offsets = [0, 0, 0], sizes = [1, 32, 32], strides = [1, 1, 1]} : vector<3x32x32xf32> to vector<1x32x32xf32>
    %113 = vector.shape_cast %112 : vector<1x32x32xf32> to vector<32x32xf32>
    %cst_49 = arith.constant dense<0.000000e+00> : vector<32x32xf32>
    %114 = tpu.matmul %111, %113, %cst_49 {dimension_numbers = #tpu.dot_dimension_numbers<[1], [0], [0], [1], [0, 0, 1, 1], [], []>} : vector<32x32xf32>, vector<32x32xf32>, vector<32x32xf32> -> vector<32x32xf32>
    %115 = vector.extract_strided_slice %111 {offsets = [0, 0], sizes = [16, 32], strides = [1, 1]} : vector<32x32xf32> to vector<16x32xf32>
    %cst_50 = arith.constant dense<0.000000e+00> : vector<16x32xf32>
    %116 = tpu.matmul %0, %115, %cst_50 {dimension_numbers = #tpu.dot_dimension_numbers<[1], [0], [0], [1], [0, 0, 1, 1], [], []>} : vector<16x16xf32>, vector<16x32xf32>, vector<16x32xf32> -> vector<16x32xf32>
    %117 = vector.extract_strided_slice %111 {offsets = [16, 0], sizes = [16, 32], strides = [1, 1]} : vector<32x32xf32> to vector<16x32xf32>
    %cst_51 = arith.constant dense<0.000000e+00> : vector<16x32xf32>
    %118 = tpu.matmul %0, %117, %cst_51 {dimension_numbers = #tpu.dot_dimension_numbers<[1], [0], [0], [1], [0, 0, 1, 1], [], []>} : vector<16x16xf32>, vector<16x32xf32>, vector<16x32xf32> -> vector<16x32xf32>
    %119 = tpu.concatenate %116, %118 in 0 : vector<16x32xf32>, vector<16x32xf32> -> vector<32x32xf32>
    %120 = vector.extract_strided_slice %2 {offsets = [1, 0, 0], sizes = [1, 32, 32], strides = [1, 1, 1]} : vector<3x32x32xf32> to vector<1x32x32xf32>
    %121 = vector.shape_cast %120 : vector<1x32x32xf32> to vector<32x32xf32>
    %cst_52 = arith.constant dense<0.000000e+00> : vector<32x32xf32>
    %122 = tpu.matmul %119, %121, %cst_52 {dimension_numbers = #tpu.dot_dimension_numbers<[1], [0], [0], [1], [0, 0, 1, 1], [], []>} : vector<32x32xf32>, vector<32x32xf32>, vector<32x32xf32> -> vector<32x32xf32>
    %123 = arith.addf %114, %122 : vector<32x32xf32>
    %124 = vector.extract_strided_slice %119 {offsets = [0, 0], sizes = [16, 32], strides = [1, 1]} : vector<32x32xf32> to vector<16x32xf32>
    %cst_53 = arith.constant dense<0.000000e+00> : vector<16x32xf32>
    %125 = tpu.matmul %0, %124, %cst_53 {dimension_numbers = #tpu.dot_dimension_numbers<[1], [0], [0], [1], [0, 0, 1, 1], [], []>} : vector<16x16xf32>, vector<16x32xf32>, vector<16x32xf32> -> vector<16x32xf32>
    %126 = vector.extract_strided_slice %119 {offsets = [16, 0], sizes = [16, 32], strides = [1, 1]} : vector<32x32xf32> to vector<16x32xf32>
    %cst_54 = arith.constant dense<0.000000e+00> : vector<16x32xf32>
    %127 = tpu.matmul %0, %126, %cst_54 {dimension_numbers = #tpu.dot_dimension_numbers<[1], [0], [0], [1], [0, 0, 1, 1], [], []>} : vector<16x16xf32>, vector<16x32xf32>, vector<16x32xf32> -> vector<16x32xf32>
    %128 = tpu.concatenate %125, %127 in 0 : vector<16x32xf32>, vector<16x32xf32> -> vector<32x32xf32>
    %cst_55 = arith.constant 2.000000e+00 : f32
    %129 = vector.broadcast %cst_55 : f32 to vector<32x32xf32>
    %130 = arith.mulf %129, %128 : vector<32x32xf32>
    %131 = arith.subf %130, %111 : vector<32x32xf32>
    %132 = vector.extract_strided_slice %2 {offsets = [2, 0, 0], sizes = [1, 32, 32], strides = [1, 1, 1]} : vector<3x32x32xf32> to vector<1x32x32xf32>
    %133 = vector.shape_cast %132 : vector<1x32x32xf32> to vector<32x32xf32>
    %cst_56 = arith.constant dense<0.000000e+00> : vector<32x32xf32>
    %134 = tpu.matmul %131, %133, %cst_56 {dimension_numbers = #tpu.dot_dimension_numbers<[1], [0], [0], [1], [0, 0, 1, 1], [], []>} : vector<32x32xf32>, vector<32x32xf32>, vector<32x32xf32> -> vector<32x32xf32>
    %135 = arith.addf %123, %134 : vector<32x32xf32>
    %136 = arith.addf %110, %135 : vector<32x32xf32>
    %137 = math.tanh %136 : vector<32x32xf32>
    %138 = arith.mulf %108, %71 : vector<32x32xf32>
    %cst_57 = arith.constant 1.000000e+00 : f32
    %139 = vector.broadcast %cst_57 : f32 to vector<32x32xf32>
    %140 = arith.subf %139, %108 : vector<32x32xf32>
    %141 = arith.mulf %140, %137 : vector<32x32xf32>
    %142 = arith.addf %138, %141 : vector<32x32xf32>
    %c1_58 = arith.constant 1 : index
    %c0_59 = arith.constant 0 : index
    %c0_60 = arith.constant 0 : index
    %143 = vector.load %arg6[%c1_58, %c0_59, %c0_60] : memref<8x32x32xf32, #tpu.memory_space<vmem>>, vector<1x32x32xf32>
    %144 = vector.shape_cast %143 : vector<1x32x32xf32> to vector<32x32xf32>
    %145 = vector.shape_cast %142 : vector<32x32xf32> to vector<1x32x32xf32>
    tpu.vector_store %arg6[%c1_58, %c0_59, %c0_60], %145 {strides = array<i32>} : memref<8x32x32xf32, #tpu.memory_space<vmem>>, vector<1x32x32xf32>,
    %c2 = arith.constant 2 : index
    %c0_61 = arith.constant 0 : index
    %c0_62 = arith.constant 0 : index
    %146 = vector.load %arg1[%c2, %c0_61, %c0_62] : memref<8x32x64xf32, #tpu.memory_space<vmem>>, vector<1x32x64xf32>
    %147 = vector.shape_cast %146 : vector<1x32x64xf32> to vector<32x64xf32>
    %148 = vector.extract_strided_slice %1 {offsets = [0, 0, 0], sizes = [1, 32, 64], strides = [1, 1, 1]} : vector<3x32x64xf32> to vector<1x32x64xf32>
    %149 = vector.shape_cast %148 : vector<1x32x64xf32> to vector<32x64xf32>
    %cst_63 = arith.constant dense<0.000000e+00> : vector<32x64xf32>
    %150 = tpu.matmul %142, %149, %cst_63 {dimension_numbers = #tpu.dot_dimension_numbers<[1], [0], [0], [1], [0, 0, 1, 1], [], []>} : vector<32x32xf32>, vector<32x64xf32>, vector<32x64xf32> -> vector<32x64xf32>
    %151 = vector.extract_strided_slice %142 {offsets = [0, 0], sizes = [16, 32], strides = [1, 1]} : vector<32x32xf32> to vector<16x32xf32>
    %cst_64 = arith.constant dense<0.000000e+00> : vector<16x32xf32>
    %152 = tpu.matmul %0, %151, %cst_64 {dimension_numbers = #tpu.dot_dimension_numbers<[1], [0], [0], [1], [0, 0, 1, 1], [], []>} : vector<16x16xf32>, vector<16x32xf32>, vector<16x32xf32> -> vector<16x32xf32>
    %153 = vector.extract_strided_slice %142 {offsets = [16, 0], sizes = [16, 32], strides = [1, 1]} : vector<32x32xf32> to vector<16x32xf32>
    %cst_65 = arith.constant dense<0.000000e+00> : vector<16x32xf32>
    %154 = tpu.matmul %0, %153, %cst_65 {dimension_numbers = #tpu.dot_dimension_numbers<[1], [0], [0], [1], [0, 0, 1, 1], [], []>} : vector<16x16xf32>, vector<16x32xf32>, vector<16x32xf32> -> vector<16x32xf32>
    %155 = tpu.concatenate %152, %154 in 0 : vector<16x32xf32>, vector<16x32xf32> -> vector<32x32xf32>
    %156 = vector.extract_strided_slice %1 {offsets = [1, 0, 0], sizes = [1, 32, 64], strides = [1, 1, 1]} : vector<3x32x64xf32> to vector<1x32x64xf32>
    %157 = vector.shape_cast %156 : vector<1x32x64xf32> to vector<32x64xf32>
    %cst_66 = arith.constant dense<0.000000e+00> : vector<32x64xf32>
    %158 = tpu.matmul %155, %157, %cst_66 {dimension_numbers = #tpu.dot_dimension_numbers<[1], [0], [0], [1], [0, 0, 1, 1], [], []>} : vector<32x32xf32>, vector<32x64xf32>, vector<32x64xf32> -> vector<32x64xf32>
    %159 = arith.addf %150, %158 : vector<32x64xf32>
    %160 = vector.extract_strided_slice %155 {offsets = [0, 0], sizes = [16, 32], strides = [1, 1]} : vector<32x32xf32> to vector<16x32xf32>
    %cst_67 = arith.constant dense<0.000000e+00> : vector<16x32xf32>
    %161 = tpu.matmul %0, %160, %cst_67 {dimension_numbers = #tpu.dot_dimension_numbers<[1], [0], [0], [1], [0, 0, 1, 1], [], []>} : vector<16x16xf32>, vector<16x32xf32>, vector<16x32xf32> -> vector<16x32xf32>
    %162 = vector.extract_strided_slice %155 {offsets = [16, 0], sizes = [16, 32], strides = [1, 1]} : vector<32x32xf32> to vector<16x32xf32>
    %cst_68 = arith.constant dense<0.000000e+00> : vector<16x32xf32>
    %163 = tpu.matmul %0, %162, %cst_68 {dimension_numbers = #tpu.dot_dimension_numbers<[1], [0], [0], [1], [0, 0, 1, 1], [], []>} : vector<16x16xf32>, vector<16x32xf32>, vector<16x32xf32> -> vector<16x32xf32>
    %164 = tpu.concatenate %161, %163 in 0 : vector<16x32xf32>, vector<16x32xf32> -> vector<32x32xf32>
    %cst_69 = arith.constant 2.000000e+00 : f32
    %165 = vector.broadcast %cst_69 : f32 to vector<32x32xf32>
    %166 = arith.mulf %165, %164 : vector<32x32xf32>
    %167 = arith.subf %166, %142 : vector<32x32xf32>
    %168 = vector.extract_strided_slice %1 {offsets = [2, 0, 0], sizes = [1, 32, 64], strides = [1, 1, 1]} : vector<3x32x64xf32> to vector<1x32x64xf32>
    %169 = vector.shape_cast %168 : vector<1x32x64xf32> to vector<32x64xf32>
    %cst_70 = arith.constant dense<0.000000e+00> : vector<32x64xf32>
    %170 = tpu.matmul %167, %169, %cst_70 {dimension_numbers = #tpu.dot_dimension_numbers<[1], [0], [0], [1], [0, 0, 1, 1], [], []>} : vector<32x32xf32>, vector<32x64xf32>, vector<32x64xf32> -> vector<32x64xf32>
    %171 = arith.addf %159, %170 : vector<32x64xf32>
    %172 = arith.addf %147, %171 : vector<32x64xf32>
    %173 = arith.negf %172 : vector<32x64xf32>
    %174 = math.exp %173 : vector<32x64xf32>
    %cst_71 = arith.constant 1.000000e+00 : f32
    %175 = vector.broadcast %cst_71 : f32 to vector<32x64xf32>
    %176 = arith.addf %175, %174 : vector<32x64xf32>
    %177 = arith.divf %175, %176 : vector<32x64xf32>
    %178 = vector.extract_strided_slice %177 {offsets = [0, 0], sizes = [32, 32], strides = [1, 1]} : vector<32x64xf32> to vector<32x32xf32>
    %179 = vector.extract_strided_slice %177 {offsets = [0, 32], sizes = [32, 32], strides = [1, 1]} : vector<32x64xf32> to vector<32x32xf32>
    %c2_72 = arith.constant 2 : index
    %c0_73 = arith.constant 0 : index
    %c0_74 = arith.constant 0 : index
    %180 = vector.load %arg2[%c2_72, %c0_73, %c0_74] : memref<8x32x32xf32, #tpu.memory_space<vmem>>, vector<1x32x32xf32>
    %181 = vector.shape_cast %180 : vector<1x32x32xf32> to vector<32x32xf32>
    %182 = arith.mulf %178, %142 : vector<32x32xf32>
    %183 = vector.extract_strided_slice %2 {offsets = [0, 0, 0], sizes = [1, 32, 32], strides = [1, 1, 1]} : vector<3x32x32xf32> to vector<1x32x32xf32>
    %184 = vector.shape_cast %183 : vector<1x32x32xf32> to vector<32x32xf32>
    %cst_75 = arith.constant dense<0.000000e+00> : vector<32x32xf32>
    %185 = tpu.matmul %182, %184, %cst_75 {dimension_numbers = #tpu.dot_dimension_numbers<[1], [0], [0], [1], [0, 0, 1, 1], [], []>} : vector<32x32xf32>, vector<32x32xf32>, vector<32x32xf32> -> vector<32x32xf32>
    %186 = vector.extract_strided_slice %182 {offsets = [0, 0], sizes = [16, 32], strides = [1, 1]} : vector<32x32xf32> to vector<16x32xf32>
    %cst_76 = arith.constant dense<0.000000e+00> : vector<16x32xf32>
    %187 = tpu.matmul %0, %186, %cst_76 {dimension_numbers = #tpu.dot_dimension_numbers<[1], [0], [0], [1], [0, 0, 1, 1], [], []>} : vector<16x16xf32>, vector<16x32xf32>, vector<16x32xf32> -> vector<16x32xf32>
    %188 = vector.extract_strided_slice %182 {offsets = [16, 0], sizes = [16, 32], strides = [1, 1]} : vector<32x32xf32> to vector<16x32xf32>
    %cst_77 = arith.constant dense<0.000000e+00> : vector<16x32xf32>
    %189 = tpu.matmul %0, %188, %cst_77 {dimension_numbers = #tpu.dot_dimension_numbers<[1], [0], [0], [1], [0, 0, 1, 1], [], []>} : vector<16x16xf32>, vector<16x32xf32>, vector<16x32xf32> -> vector<16x32xf32>
    %190 = tpu.concatenate %187, %189 in 0 : vector<16x32xf32>, vector<16x32xf32> -> vector<32x32xf32>
    %191 = vector.extract_strided_slice %2 {offsets = [1, 0, 0], sizes = [1, 32, 32], strides = [1, 1, 1]} : vector<3x32x32xf32> to vector<1x32x32xf32>
    %192 = vector.shape_cast %191 : vector<1x32x32xf32> to vector<32x32xf32>
    %cst_78 = arith.constant dense<0.000000e+00> : vector<32x32xf32>
    %193 = tpu.matmul %190, %192, %cst_78 {dimension_numbers = #tpu.dot_dimension_numbers<[1], [0], [0], [1], [0, 0, 1, 1], [], []>} : vector<32x32xf32>, vector<32x32xf32>, vector<32x32xf32> -> vector<32x32xf32>
    %194 = arith.addf %185, %193 : vector<32x32xf32>
    %195 = vector.extract_strided_slice %190 {offsets = [0, 0], sizes = [16, 32], strides = [1, 1]} : vector<32x32xf32> to vector<16x32xf32>
    %cst_79 = arith.constant dense<0.000000e+00> : vector<16x32xf32>
    %196 = tpu.matmul %0, %195, %cst_79 {dimension_numbers = #tpu.dot_dimension_numbers<[1], [0], [0], [1], [0, 0, 1, 1], [], []>} : vector<16x16xf32>, vector<16x32xf32>, vector<16x32xf32> -> vector<16x32xf32>
    %197 = vector.extract_strided_slice %190 {offsets = [16, 0], sizes = [16, 32], strides = [1, 1]} : vector<32x32xf32> to vector<16x32xf32>
    %cst_80 = arith.constant dense<0.000000e+00> : vector<16x32xf32>
    %198 = tpu.matmul %0, %197, %cst_80 {dimension_numbers = #tpu.dot_dimension_numbers<[1], [0], [0], [1], [0, 0, 1, 1], [], []>} : vector<16x16xf32>, vector<16x32xf32>, vector<16x32xf32> -> vector<16x32xf32>
    %199 = tpu.concatenate %196, %198 in 0 : vector<16x32xf32>, vector<16x32xf32> -> vector<32x32xf32>
    %cst_81 = arith.constant 2.000000e+00 : f32
    %200 = vector.broadcast %cst_81 : f32 to vector<32x32xf32>
    %201 = arith.mulf %200, %199 : vector<32x32xf32>
    %202 = arith.subf %201, %182 : vector<32x32xf32>
    %203 = vector.extract_strided_slice %2 {offsets = [2, 0, 0], sizes = [1, 32, 32], strides = [1, 1, 1]} : vector<3x32x32xf32> to vector<1x32x32xf32>
    %204 = vector.shape_cast %203 : vector<1x32x32xf32> to vector<32x32xf32>
    %cst_82 = arith.constant dense<0.000000e+00> : vector<32x32xf32>
    %205 = tpu.matmul %202, %204, %cst_82 {dimension_numbers = #tpu.dot_dimension_numbers<[1], [0], [0], [1], [0, 0, 1, 1], [], []>} : vector<32x32xf32>, vector<32x32xf32>, vector<32x32xf32> -> vector<32x32xf32>
    %206 = arith.addf %194, %205 : vector<32x32xf32>
    %207 = arith.addf %181, %206 : vector<32x32xf32>
    %208 = math.tanh %207 : vector<32x32xf32>
    %209 = arith.mulf %179, %142 : vector<32x32xf32>
    %cst_83 = arith.constant 1.000000e+00 : f32
    %210 = vector.broadcast %cst_83 : f32 to vector<32x32xf32>
    %211 = arith.subf %210, %179 : vector<32x32xf32>
    %212 = arith.mulf %211, %208 : vector<32x32xf32>
    %213 = arith.addf %209, %212 : vector<32x32xf32>
    %c2_84 = arith.constant 2 : index
    %c0_85 = arith.constant 0 : index
    %c0_86 = arith.constant 0 : index
    %214 = vector.load %arg6[%c2_84, %c0_85, %c0_86] : memref<8x32x32xf32, #tpu.memory_space<vmem>>, vector<1x32x32xf32>
    %215 = vector.shape_cast %214 : vector<1x32x32xf32> to vector<32x32xf32>
    %216 = vector.shape_cast %213 : vector<32x32xf32> to vector<1x32x32xf32>
    tpu.vector_store %arg6[%c2_84, %c0_85, %c0_86], %216 {strides = array<i32>} : memref<8x32x32xf32, #tpu.memory_space<vmem>>, vector<1x32x32xf32>,
    %c3 = arith.constant 3 : index
    %c0_87 = arith.constant 0 : index
    %c0_88 = arith.constant 0 : index
    %217 = vector.load %arg1[%c3, %c0_87, %c0_88] : memref<8x32x64xf32, #tpu.memory_space<vmem>>, vector<1x32x64xf32>
    %218 = vector.shape_cast %217 : vector<1x32x64xf32> to vector<32x64xf32>
    %219 = vector.extract_strided_slice %1 {offsets = [0, 0, 0], sizes = [1, 32, 64], strides = [1, 1, 1]} : vector<3x32x64xf32> to vector<1x32x64xf32>
    %220 = vector.shape_cast %219 : vector<1x32x64xf32> to vector<32x64xf32>
    %cst_89 = arith.constant dense<0.000000e+00> : vector<32x64xf32>
    %221 = tpu.matmul %213, %220, %cst_89 {dimension_numbers = #tpu.dot_dimension_numbers<[1], [0], [0], [1], [0, 0, 1, 1], [], []>} : vector<32x32xf32>, vector<32x64xf32>, vector<32x64xf32> -> vector<32x64xf32>
    %222 = vector.extract_strided_slice %213 {offsets = [0, 0], sizes = [16, 32], strides = [1, 1]} : vector<32x32xf32> to vector<16x32xf32>
    %cst_90 = arith.constant dense<0.000000e+00> : vector<16x32xf32>
    %223 = tpu.matmul %0, %222, %cst_90 {dimension_numbers = #tpu.dot_dimension_numbers<[1], [0], [0], [1], [0, 0, 1, 1], [], []>} : vector<16x16xf32>, vector<16x32xf32>, vector<16x32xf32> -> vector<16x32xf32>
    %224 = vector.extract_strided_slice %213 {offsets = [16, 0], sizes = [16, 32], strides = [1, 1]} : vector<32x32xf32> to vector<16x32xf32>
    %cst_91 = arith.constant dense<0.000000e+00> : vector<16x32xf32>
    %225 = tpu.matmul %0, %224, %cst_91 {dimension_numbers = #tpu.dot_dimension_numbers<[1], [0], [0], [1], [0, 0, 1, 1], [], []>} : vector<16x16xf32>, vector<16x32xf32>, vector<16x32xf32> -> vector<16x32xf32>
    %226 = tpu.concatenate %223, %225 in 0 : vector<16x32xf32>, vector<16x32xf32> -> vector<32x32xf32>
    %227 = vector.extract_strided_slice %1 {offsets = [1, 0, 0], sizes = [1, 32, 64], strides = [1, 1, 1]} : vector<3x32x64xf32> to vector<1x32x64xf32>
    %228 = vector.shape_cast %227 : vector<1x32x64xf32> to vector<32x64xf32>
    %cst_92 = arith.constant dense<0.000000e+00> : vector<32x64xf32>
    %229 = tpu.matmul %226, %228, %cst_92 {dimension_numbers = #tpu.dot_dimension_numbers<[1], [0], [0], [1], [0, 0, 1, 1], [], []>} : vector<32x32xf32>, vector<32x64xf32>, vector<32x64xf32> -> vector<32x64xf32>
    %230 = arith.addf %221, %229 : vector<32x64xf32>
    %231 = vector.extract_strided_slice %226 {offsets = [0, 0], sizes = [16, 32], strides = [1, 1]} : vector<32x32xf32> to vector<16x32xf32>
    %cst_93 = arith.constant dense<0.000000e+00> : vector<16x32xf32>
    %232 = tpu.matmul %0, %231, %cst_93 {dimension_numbers = #tpu.dot_dimension_numbers<[1], [0], [0], [1], [0, 0, 1, 1], [], []>} : vector<16x16xf32>, vector<16x32xf32>, vector<16x32xf32> -> vector<16x32xf32>
    %233 = vector.extract_strided_slice %226 {offsets = [16, 0], sizes = [16, 32], strides = [1, 1]} : vector<32x32xf32> to vector<16x32xf32>
    %cst_94 = arith.constant dense<0.000000e+00> : vector<16x32xf32>
    %234 = tpu.matmul %0, %233, %cst_94 {dimension_numbers = #tpu.dot_dimension_numbers<[1], [0], [0], [1], [0, 0, 1, 1], [], []>} : vector<16x16xf32>, vector<16x32xf32>, vector<16x32xf32> -> vector<16x32xf32>
    %235 = tpu.concatenate %232, %234 in 0 : vector<16x32xf32>, vector<16x32xf32> -> vector<32x32xf32>
    %cst_95 = arith.constant 2.000000e+00 : f32
    %236 = vector.broadcast %cst_95 : f32 to vector<32x32xf32>
    %237 = arith.mulf %236, %235 : vector<32x32xf32>
    %238 = arith.subf %237, %213 : vector<32x32xf32>
    %239 = vector.extract_strided_slice %1 {offsets = [2, 0, 0], sizes = [1, 32, 64], strides = [1, 1, 1]} : vector<3x32x64xf32> to vector<1x32x64xf32>
    %240 = vector.shape_cast %239 : vector<1x32x64xf32> to vector<32x64xf32>
    %cst_96 = arith.constant dense<0.000000e+00> : vector<32x64xf32>
    %241 = tpu.matmul %238, %240, %cst_96 {dimension_numbers = #tpu.dot_dimension_numbers<[1], [0], [0], [1], [0, 0, 1, 1], [], []>} : vector<32x32xf32>, vector<32x64xf32>, vector<32x64xf32> -> vector<32x64xf32>
    %242 = arith.addf %230, %241 : vector<32x64xf32>
    %243 = arith.addf %218, %242 : vector<32x64xf32>
    %244 = arith.negf %243 : vector<32x64xf32>
    %245 = math.exp %244 : vector<32x64xf32>
    %cst_97 = arith.constant 1.000000e+00 : f32
    %246 = vector.broadcast %cst_97 : f32 to vector<32x64xf32>
    %247 = arith.addf %246, %245 : vector<32x64xf32>
    %248 = arith.divf %246, %247 : vector<32x64xf32>
    %249 = vector.extract_strided_slice %248 {offsets = [0, 0], sizes = [32, 32], strides = [1, 1]} : vector<32x64xf32> to vector<32x32xf32>
    %250 = vector.extract_strided_slice %248 {offsets = [0, 32], sizes = [32, 32], strides = [1, 1]} : vector<32x64xf32> to vector<32x32xf32>
    %c3_98 = arith.constant 3 : index
    %c0_99 = arith.constant 0 : index
    %c0_100 = arith.constant 0 : index
    %251 = vector.load %arg2[%c3_98, %c0_99, %c0_100] : memref<8x32x32xf32, #tpu.memory_space<vmem>>, vector<1x32x32xf32>
    %252 = vector.shape_cast %251 : vector<1x32x32xf32> to vector<32x32xf32>
    %253 = arith.mulf %249, %213 : vector<32x32xf32>
    %254 = vector.extract_strided_slice %2 {offsets = [0, 0, 0], sizes = [1, 32, 32], strides = [1, 1, 1]} : vector<3x32x32xf32> to vector<1x32x32xf32>
    %255 = vector.shape_cast %254 : vector<1x32x32xf32> to vector<32x32xf32>
    %cst_101 = arith.constant dense<0.000000e+00> : vector<32x32xf32>
    %256 = tpu.matmul %253, %255, %cst_101 {dimension_numbers = #tpu.dot_dimension_numbers<[1], [0], [0], [1], [0, 0, 1, 1], [], []>} : vector<32x32xf32>, vector<32x32xf32>, vector<32x32xf32> -> vector<32x32xf32>
    %257 = vector.extract_strided_slice %253 {offsets = [0, 0], sizes = [16, 32], strides = [1, 1]} : vector<32x32xf32> to vector<16x32xf32>
    %cst_102 = arith.constant dense<0.000000e+00> : vector<16x32xf32>
    %258 = tpu.matmul %0, %257, %cst_102 {dimension_numbers = #tpu.dot_dimension_numbers<[1], [0], [0], [1], [0, 0, 1, 1], [], []>} : vector<16x16xf32>, vector<16x32xf32>, vector<16x32xf32> -> vector<16x32xf32>
    %259 = vector.extract_strided_slice %253 {offsets = [16, 0], sizes = [16, 32], strides = [1, 1]} : vector<32x32xf32> to vector<16x32xf32>
    %cst_103 = arith.constant dense<0.000000e+00> : vector<16x32xf32>
    %260 = tpu.matmul %0, %259, %cst_103 {dimension_numbers = #tpu.dot_dimension_numbers<[1], [0], [0], [1], [0, 0, 1, 1], [], []>} : vector<16x16xf32>, vector<16x32xf32>, vector<16x32xf32> -> vector<16x32xf32>
    %261 = tpu.concatenate %258, %260 in 0 : vector<16x32xf32>, vector<16x32xf32> -> vector<32x32xf32>
    %262 = vector.extract_strided_slice %2 {offsets = [1, 0, 0], sizes = [1, 32, 32], strides = [1, 1, 1]} : vector<3x32x32xf32> to vector<1x32x32xf32>
    %263 = vector.shape_cast %262 : vector<1x32x32xf32> to vector<32x32xf32>
    %cst_104 = arith.constant dense<0.000000e+00> : vector<32x32xf32>
    %264 = tpu.matmul %261, %263, %cst_104 {dimension_numbers = #tpu.dot_dimension_numbers<[1], [0], [0], [1], [0, 0, 1, 1], [], []>} : vector<32x32xf32>, vector<32x32xf32>, vector<32x32xf32> -> vector<32x32xf32>
    %265 = arith.addf %256, %264 : vector<32x32xf32>
    %266 = vector.extract_strided_slice %261 {offsets = [0, 0], sizes = [16, 32], strides = [1, 1]} : vector<32x32xf32> to vector<16x32xf32>
    %cst_105 = arith.constant dense<0.000000e+00> : vector<16x32xf32>
    %267 = tpu.matmul %0, %266, %cst_105 {dimension_numbers = #tpu.dot_dimension_numbers<[1], [0], [0], [1], [0, 0, 1, 1], [], []>} : vector<16x16xf32>, vector<16x32xf32>, vector<16x32xf32> -> vector<16x32xf32>
    %268 = vector.extract_strided_slice %261 {offsets = [16, 0], sizes = [16, 32], strides = [1, 1]} : vector<32x32xf32> to vector<16x32xf32>
    %cst_106 = arith.constant dense<0.000000e+00> : vector<16x32xf32>
    %269 = tpu.matmul %0, %268, %cst_106 {dimension_numbers = #tpu.dot_dimension_numbers<[1], [0], [0], [1], [0, 0, 1, 1], [], []>} : vector<16x16xf32>, vector<16x32xf32>, vector<16x32xf32> -> vector<16x32xf32>
    %270 = tpu.concatenate %267, %269 in 0 : vector<16x32xf32>, vector<16x32xf32> -> vector<32x32xf32>
    %cst_107 = arith.constant 2.000000e+00 : f32
    %271 = vector.broadcast %cst_107 : f32 to vector<32x32xf32>
    %272 = arith.mulf %271, %270 : vector<32x32xf32>
    %273 = arith.subf %272, %253 : vector<32x32xf32>
    %274 = vector.extract_strided_slice %2 {offsets = [2, 0, 0], sizes = [1, 32, 32], strides = [1, 1, 1]} : vector<3x32x32xf32> to vector<1x32x32xf32>
    %275 = vector.shape_cast %274 : vector<1x32x32xf32> to vector<32x32xf32>
    %cst_108 = arith.constant dense<0.000000e+00> : vector<32x32xf32>
    %276 = tpu.matmul %273, %275, %cst_108 {dimension_numbers = #tpu.dot_dimension_numbers<[1], [0], [0], [1], [0, 0, 1, 1], [], []>} : vector<32x32xf32>, vector<32x32xf32>, vector<32x32xf32> -> vector<32x32xf32>
    %277 = arith.addf %265, %276 : vector<32x32xf32>
    %278 = arith.addf %252, %277 : vector<32x32xf32>
    %279 = math.tanh %278 : vector<32x32xf32>
    %280 = arith.mulf %250, %213 : vector<32x32xf32>
    %cst_109 = arith.constant 1.000000e+00 : f32
    %281 = vector.broadcast %cst_109 : f32 to vector<32x32xf32>
    %282 = arith.subf %281, %250 : vector<32x32xf32>
    %283 = arith.mulf %282, %279 : vector<32x32xf32>
    %284 = arith.addf %280, %283 : vector<32x32xf32>
    %c3_110 = arith.constant 3 : index
    %c0_111 = arith.constant 0 : index
    %c0_112 = arith.constant 0 : index
    %285 = vector.load %arg6[%c3_110, %c0_111, %c0_112] : memref<8x32x32xf32, #tpu.memory_space<vmem>>, vector<1x32x32xf32>
    %286 = vector.shape_cast %285 : vector<1x32x32xf32> to vector<32x32xf32>
    %287 = vector.shape_cast %284 : vector<32x32xf32> to vector<1x32x32xf32>
    tpu.vector_store %arg6[%c3_110, %c0_111, %c0_112], %287 {strides = array<i32>} : memref<8x32x32xf32, #tpu.memory_space<vmem>>, vector<1x32x32xf32>,
    %c4 = arith.constant 4 : index
    %c0_113 = arith.constant 0 : index
    %c0_114 = arith.constant 0 : index
    %288 = vector.load %arg1[%c4, %c0_113, %c0_114] : memref<8x32x64xf32, #tpu.memory_space<vmem>>, vector<1x32x64xf32>
    %289 = vector.shape_cast %288 : vector<1x32x64xf32> to vector<32x64xf32>
    %290 = vector.extract_strided_slice %1 {offsets = [0, 0, 0], sizes = [1, 32, 64], strides = [1, 1, 1]} : vector<3x32x64xf32> to vector<1x32x64xf32>
    %291 = vector.shape_cast %290 : vector<1x32x64xf32> to vector<32x64xf32>
    %cst_115 = arith.constant dense<0.000000e+00> : vector<32x64xf32>
    %292 = tpu.matmul %284, %291, %cst_115 {dimension_numbers = #tpu.dot_dimension_numbers<[1], [0], [0], [1], [0, 0, 1, 1], [], []>} : vector<32x32xf32>, vector<32x64xf32>, vector<32x64xf32> -> vector<32x64xf32>
    %293 = vector.extract_strided_slice %284 {offsets = [0, 0], sizes = [16, 32], strides = [1, 1]} : vector<32x32xf32> to vector<16x32xf32>
    %cst_116 = arith.constant dense<0.000000e+00> : vector<16x32xf32>
    %294 = tpu.matmul %0, %293, %cst_116 {dimension_numbers = #tpu.dot_dimension_numbers<[1], [0], [0], [1], [0, 0, 1, 1], [], []>} : vector<16x16xf32>, vector<16x32xf32>, vector<16x32xf32> -> vector<16x32xf32>
    %295 = vector.extract_strided_slice %284 {offsets = [16, 0], sizes = [16, 32], strides = [1, 1]} : vector<32x32xf32> to vector<16x32xf32>
    %cst_117 = arith.constant dense<0.000000e+00> : vector<16x32xf32>
    %296 = tpu.matmul %0, %295, %cst_117 {dimension_numbers = #tpu.dot_dimension_numbers<[1], [0], [0], [1], [0, 0, 1, 1], [], []>} : vector<16x16xf32>, vector<16x32xf32>, vector<16x32xf32> -> vector<16x32xf32>
    %297 = tpu.concatenate %294, %296 in 0 : vector<16x32xf32>, vector<16x32xf32> -> vector<32x32xf32>
    %298 = vector.extract_strided_slice %1 {offsets = [1, 0, 0], sizes = [1, 32, 64], strides = [1, 1, 1]} : vector<3x32x64xf32> to vector<1x32x64xf32>
    %299 = vector.shape_cast %298 : vector<1x32x64xf32> to vector<32x64xf32>
    %cst_118 = arith.constant dense<0.000000e+00> : vector<32x64xf32>
    %300 = tpu.matmul %297, %299, %cst_118 {dimension_numbers = #tpu.dot_dimension_numbers<[1], [0], [0], [1], [0, 0, 1, 1], [], []>} : vector<32x32xf32>, vector<32x64xf32>, vector<32x64xf32> -> vector<32x64xf32>
    %301 = arith.addf %292, %300 : vector<32x64xf32>
    %302 = vector.extract_strided_slice %297 {offsets = [0, 0], sizes = [16, 32], strides = [1, 1]} : vector<32x32xf32> to vector<16x32xf32>
    %cst_119 = arith.constant dense<0.000000e+00> : vector<16x32xf32>
    %303 = tpu.matmul %0, %302, %cst_119 {dimension_numbers = #tpu.dot_dimension_numbers<[1], [0], [0], [1], [0, 0, 1, 1], [], []>} : vector<16x16xf32>, vector<16x32xf32>, vector<16x32xf32> -> vector<16x32xf32>
    %304 = vector.extract_strided_slice %297 {offsets = [16, 0], sizes = [16, 32], strides = [1, 1]} : vector<32x32xf32> to vector<16x32xf32>
    %cst_120 = arith.constant dense<0.000000e+00> : vector<16x32xf32>
    %305 = tpu.matmul %0, %304, %cst_120 {dimension_numbers = #tpu.dot_dimension_numbers<[1], [0], [0], [1], [0, 0, 1, 1], [], []>} : vector<16x16xf32>, vector<16x32xf32>, vector<16x32xf32> -> vector<16x32xf32>
    %306 = tpu.concatenate %303, %305 in 0 : vector<16x32xf32>, vector<16x32xf32> -> vector<32x32xf32>
    %cst_121 = arith.constant 2.000000e+00 : f32
    %307 = vector.broadcast %cst_121 : f32 to vector<32x32xf32>
    %308 = arith.mulf %307, %306 : vector<32x32xf32>
    %309 = arith.subf %308, %284 : vector<32x32xf32>
    %310 = vector.extract_strided_slice %1 {offsets = [2, 0, 0], sizes = [1, 32, 64], strides = [1, 1, 1]} : vector<3x32x64xf32> to vector<1x32x64xf32>
    %311 = vector.shape_cast %310 : vector<1x32x64xf32> to vector<32x64xf32>
    %cst_122 = arith.constant dense<0.000000e+00> : vector<32x64xf32>
    %312 = tpu.matmul %309, %311, %cst_122 {dimension_numbers = #tpu.dot_dimension_numbers<[1], [0], [0], [1], [0, 0, 1, 1], [], []>} : vector<32x32xf32>, vector<32x64xf32>, vector<32x64xf32> -> vector<32x64xf32>
    %313 = arith.addf %301, %312 : vector<32x64xf32>
    %314 = arith.addf %289, %313 : vector<32x64xf32>
    %315 = arith.negf %314 : vector<32x64xf32>
    %316 = math.exp %315 : vector<32x64xf32>
    %cst_123 = arith.constant 1.000000e+00 : f32
    %317 = vector.broadcast %cst_123 : f32 to vector<32x64xf32>
    %318 = arith.addf %317, %316 : vector<32x64xf32>
    %319 = arith.divf %317, %318 : vector<32x64xf32>
    %320 = vector.extract_strided_slice %319 {offsets = [0, 0], sizes = [32, 32], strides = [1, 1]} : vector<32x64xf32> to vector<32x32xf32>
    %321 = vector.extract_strided_slice %319 {offsets = [0, 32], sizes = [32, 32], strides = [1, 1]} : vector<32x64xf32> to vector<32x32xf32>
    %c4_124 = arith.constant 4 : index
    %c0_125 = arith.constant 0 : index
    %c0_126 = arith.constant 0 : index
    %322 = vector.load %arg2[%c4_124, %c0_125, %c0_126] : memref<8x32x32xf32, #tpu.memory_space<vmem>>, vector<1x32x32xf32>
    %323 = vector.shape_cast %322 : vector<1x32x32xf32> to vector<32x32xf32>
    %324 = arith.mulf %320, %284 : vector<32x32xf32>
    %325 = vector.extract_strided_slice %2 {offsets = [0, 0, 0], sizes = [1, 32, 32], strides = [1, 1, 1]} : vector<3x32x32xf32> to vector<1x32x32xf32>
    %326 = vector.shape_cast %325 : vector<1x32x32xf32> to vector<32x32xf32>
    %cst_127 = arith.constant dense<0.000000e+00> : vector<32x32xf32>
    %327 = tpu.matmul %324, %326, %cst_127 {dimension_numbers = #tpu.dot_dimension_numbers<[1], [0], [0], [1], [0, 0, 1, 1], [], []>} : vector<32x32xf32>, vector<32x32xf32>, vector<32x32xf32> -> vector<32x32xf32>
    %328 = vector.extract_strided_slice %324 {offsets = [0, 0], sizes = [16, 32], strides = [1, 1]} : vector<32x32xf32> to vector<16x32xf32>
    %cst_128 = arith.constant dense<0.000000e+00> : vector<16x32xf32>
    %329 = tpu.matmul %0, %328, %cst_128 {dimension_numbers = #tpu.dot_dimension_numbers<[1], [0], [0], [1], [0, 0, 1, 1], [], []>} : vector<16x16xf32>, vector<16x32xf32>, vector<16x32xf32> -> vector<16x32xf32>
    %330 = vector.extract_strided_slice %324 {offsets = [16, 0], sizes = [16, 32], strides = [1, 1]} : vector<32x32xf32> to vector<16x32xf32>
    %cst_129 = arith.constant dense<0.000000e+00> : vector<16x32xf32>
    %331 = tpu.matmul %0, %330, %cst_129 {dimension_numbers = #tpu.dot_dimension_numbers<[1], [0], [0], [1], [0, 0, 1, 1], [], []>} : vector<16x16xf32>, vector<16x32xf32>, vector<16x32xf32> -> vector<16x32xf32>
    %332 = tpu.concatenate %329, %331 in 0 : vector<16x32xf32>, vector<16x32xf32> -> vector<32x32xf32>
    %333 = vector.extract_strided_slice %2 {offsets = [1, 0, 0], sizes = [1, 32, 32], strides = [1, 1, 1]} : vector<3x32x32xf32> to vector<1x32x32xf32>
    %334 = vector.shape_cast %333 : vector<1x32x32xf32> to vector<32x32xf32>
    %cst_130 = arith.constant dense<0.000000e+00> : vector<32x32xf32>
    %335 = tpu.matmul %332, %334, %cst_130 {dimension_numbers = #tpu.dot_dimension_numbers<[1], [0], [0], [1], [0, 0, 1, 1], [], []>} : vector<32x32xf32>, vector<32x32xf32>, vector<32x32xf32> -> vector<32x32xf32>
    %336 = arith.addf %327, %335 : vector<32x32xf32>
    %337 = vector.extract_strided_slice %332 {offsets = [0, 0], sizes = [16, 32], strides = [1, 1]} : vector<32x32xf32> to vector<16x32xf32>
    %cst_131 = arith.constant dense<0.000000e+00> : vector<16x32xf32>
    %338 = tpu.matmul %0, %337, %cst_131 {dimension_numbers = #tpu.dot_dimension_numbers<[1], [0], [0], [1], [0, 0, 1, 1], [], []>} : vector<16x16xf32>, vector<16x32xf32>, vector<16x32xf32> -> vector<16x32xf32>
    %339 = vector.extract_strided_slice %332 {offsets = [16, 0], sizes = [16, 32], strides = [1, 1]} : vector<32x32xf32> to vector<16x32xf32>
    %cst_132 = arith.constant dense<0.000000e+00> : vector<16x32xf32>
    %340 = tpu.matmul %0, %339, %cst_132 {dimension_numbers = #tpu.dot_dimension_numbers<[1], [0], [0], [1], [0, 0, 1, 1], [], []>} : vector<16x16xf32>, vector<16x32xf32>, vector<16x32xf32> -> vector<16x32xf32>
    %341 = tpu.concatenate %338, %340 in 0 : vector<16x32xf32>, vector<16x32xf32> -> vector<32x32xf32>
    %cst_133 = arith.constant 2.000000e+00 : f32
    %342 = vector.broadcast %cst_133 : f32 to vector<32x32xf32>
    %343 = arith.mulf %342, %341 : vector<32x32xf32>
    %344 = arith.subf %343, %324 : vector<32x32xf32>
    %345 = vector.extract_strided_slice %2 {offsets = [2, 0, 0], sizes = [1, 32, 32], strides = [1, 1, 1]} : vector<3x32x32xf32> to vector<1x32x32xf32>
    %346 = vector.shape_cast %345 : vector<1x32x32xf32> to vector<32x32xf32>
    %cst_134 = arith.constant dense<0.000000e+00> : vector<32x32xf32>
    %347 = tpu.matmul %344, %346, %cst_134 {dimension_numbers = #tpu.dot_dimension_numbers<[1], [0], [0], [1], [0, 0, 1, 1], [], []>} : vector<32x32xf32>, vector<32x32xf32>, vector<32x32xf32> -> vector<32x32xf32>
    %348 = arith.addf %336, %347 : vector<32x32xf32>
    %349 = arith.addf %323, %348 : vector<32x32xf32>
    %350 = math.tanh %349 : vector<32x32xf32>
    %351 = arith.mulf %321, %284 : vector<32x32xf32>
    %cst_135 = arith.constant 1.000000e+00 : f32
    %352 = vector.broadcast %cst_135 : f32 to vector<32x32xf32>
    %353 = arith.subf %352, %321 : vector<32x32xf32>
    %354 = arith.mulf %353, %350 : vector<32x32xf32>
    %355 = arith.addf %351, %354 : vector<32x32xf32>
    %c4_136 = arith.constant 4 : index
    %c0_137 = arith.constant 0 : index
    %c0_138 = arith.constant 0 : index
    %356 = vector.load %arg6[%c4_136, %c0_137, %c0_138] : memref<8x32x32xf32, #tpu.memory_space<vmem>>, vector<1x32x32xf32>
    %357 = vector.shape_cast %356 : vector<1x32x32xf32> to vector<32x32xf32>
    %358 = vector.shape_cast %355 : vector<32x32xf32> to vector<1x32x32xf32>
    tpu.vector_store %arg6[%c4_136, %c0_137, %c0_138], %358 {strides = array<i32>} : memref<8x32x32xf32, #tpu.memory_space<vmem>>, vector<1x32x32xf32>,
    %c5 = arith.constant 5 : index
    %c0_139 = arith.constant 0 : index
    %c0_140 = arith.constant 0 : index
    %359 = vector.load %arg1[%c5, %c0_139, %c0_140] : memref<8x32x64xf32, #tpu.memory_space<vmem>>, vector<1x32x64xf32>
    %360 = vector.shape_cast %359 : vector<1x32x64xf32> to vector<32x64xf32>
    %361 = vector.extract_strided_slice %1 {offsets = [0, 0, 0], sizes = [1, 32, 64], strides = [1, 1, 1]} : vector<3x32x64xf32> to vector<1x32x64xf32>
    %362 = vector.shape_cast %361 : vector<1x32x64xf32> to vector<32x64xf32>
    %cst_141 = arith.constant dense<0.000000e+00> : vector<32x64xf32>
    %363 = tpu.matmul %355, %362, %cst_141 {dimension_numbers = #tpu.dot_dimension_numbers<[1], [0], [0], [1], [0, 0, 1, 1], [], []>} : vector<32x32xf32>, vector<32x64xf32>, vector<32x64xf32> -> vector<32x64xf32>
    %364 = vector.extract_strided_slice %355 {offsets = [0, 0], sizes = [16, 32], strides = [1, 1]} : vector<32x32xf32> to vector<16x32xf32>
    %cst_142 = arith.constant dense<0.000000e+00> : vector<16x32xf32>
    %365 = tpu.matmul %0, %364, %cst_142 {dimension_numbers = #tpu.dot_dimension_numbers<[1], [0], [0], [1], [0, 0, 1, 1], [], []>} : vector<16x16xf32>, vector<16x32xf32>, vector<16x32xf32> -> vector<16x32xf32>
    %366 = vector.extract_strided_slice %355 {offsets = [16, 0], sizes = [16, 32], strides = [1, 1]} : vector<32x32xf32> to vector<16x32xf32>
    %cst_143 = arith.constant dense<0.000000e+00> : vector<16x32xf32>
    %367 = tpu.matmul %0, %366, %cst_143 {dimension_numbers = #tpu.dot_dimension_numbers<[1], [0], [0], [1], [0, 0, 1, 1], [], []>} : vector<16x16xf32>, vector<16x32xf32>, vector<16x32xf32> -> vector<16x32xf32>
    %368 = tpu.concatenate %365, %367 in 0 : vector<16x32xf32>, vector<16x32xf32> -> vector<32x32xf32>
    %369 = vector.extract_strided_slice %1 {offsets = [1, 0, 0], sizes = [1, 32, 64], strides = [1, 1, 1]} : vector<3x32x64xf32> to vector<1x32x64xf32>
    %370 = vector.shape_cast %369 : vector<1x32x64xf32> to vector<32x64xf32>
    %cst_144 = arith.constant dense<0.000000e+00> : vector<32x64xf32>
    %371 = tpu.matmul %368, %370, %cst_144 {dimension_numbers = #tpu.dot_dimension_numbers<[1], [0], [0], [1], [0, 0, 1, 1], [], []>} : vector<32x32xf32>, vector<32x64xf32>, vector<32x64xf32> -> vector<32x64xf32>
    %372 = arith.addf %363, %371 : vector<32x64xf32>
    %373 = vector.extract_strided_slice %368 {offsets = [0, 0], sizes = [16, 32], strides = [1, 1]} : vector<32x32xf32> to vector<16x32xf32>
    %cst_145 = arith.constant dense<0.000000e+00> : vector<16x32xf32>
    %374 = tpu.matmul %0, %373, %cst_145 {dimension_numbers = #tpu.dot_dimension_numbers<[1], [0], [0], [1], [0, 0, 1, 1], [], []>} : vector<16x16xf32>, vector<16x32xf32>, vector<16x32xf32> -> vector<16x32xf32>
    %375 = vector.extract_strided_slice %368 {offsets = [16, 0], sizes = [16, 32], strides = [1, 1]} : vector<32x32xf32> to vector<16x32xf32>
    %cst_146 = arith.constant dense<0.000000e+00> : vector<16x32xf32>
    %376 = tpu.matmul %0, %375, %cst_146 {dimension_numbers = #tpu.dot_dimension_numbers<[1], [0], [0], [1], [0, 0, 1, 1], [], []>} : vector<16x16xf32>, vector<16x32xf32>, vector<16x32xf32> -> vector<16x32xf32>
    %377 = tpu.concatenate %374, %376 in 0 : vector<16x32xf32>, vector<16x32xf32> -> vector<32x32xf32>
    %cst_147 = arith.constant 2.000000e+00 : f32
    %378 = vector.broadcast %cst_147 : f32 to vector<32x32xf32>
    %379 = arith.mulf %378, %377 : vector<32x32xf32>
    %380 = arith.subf %379, %355 : vector<32x32xf32>
    %381 = vector.extract_strided_slice %1 {offsets = [2, 0, 0], sizes = [1, 32, 64], strides = [1, 1, 1]} : vector<3x32x64xf32> to vector<1x32x64xf32>
    %382 = vector.shape_cast %381 : vector<1x32x64xf32> to vector<32x64xf32>
    %cst_148 = arith.constant dense<0.000000e+00> : vector<32x64xf32>
    %383 = tpu.matmul %380, %382, %cst_148 {dimension_numbers = #tpu.dot_dimension_numbers<[1], [0], [0], [1], [0, 0, 1, 1], [], []>} : vector<32x32xf32>, vector<32x64xf32>, vector<32x64xf32> -> vector<32x64xf32>
    %384 = arith.addf %372, %383 : vector<32x64xf32>
    %385 = arith.addf %360, %384 : vector<32x64xf32>
    %386 = arith.negf %385 : vector<32x64xf32>
    %387 = math.exp %386 : vector<32x64xf32>
    %cst_149 = arith.constant 1.000000e+00 : f32
    %388 = vector.broadcast %cst_149 : f32 to vector<32x64xf32>
    %389 = arith.addf %388, %387 : vector<32x64xf32>
    %390 = arith.divf %388, %389 : vector<32x64xf32>
    %391 = vector.extract_strided_slice %390 {offsets = [0, 0], sizes = [32, 32], strides = [1, 1]} : vector<32x64xf32> to vector<32x32xf32>
    %392 = vector.extract_strided_slice %390 {offsets = [0, 32], sizes = [32, 32], strides = [1, 1]} : vector<32x64xf32> to vector<32x32xf32>
    %c5_150 = arith.constant 5 : index
    %c0_151 = arith.constant 0 : index
    %c0_152 = arith.constant 0 : index
    %393 = vector.load %arg2[%c5_150, %c0_151, %c0_152] : memref<8x32x32xf32, #tpu.memory_space<vmem>>, vector<1x32x32xf32>
    %394 = vector.shape_cast %393 : vector<1x32x32xf32> to vector<32x32xf32>
    %395 = arith.mulf %391, %355 : vector<32x32xf32>
    %396 = vector.extract_strided_slice %2 {offsets = [0, 0, 0], sizes = [1, 32, 32], strides = [1, 1, 1]} : vector<3x32x32xf32> to vector<1x32x32xf32>
    %397 = vector.shape_cast %396 : vector<1x32x32xf32> to vector<32x32xf32>
    %cst_153 = arith.constant dense<0.000000e+00> : vector<32x32xf32>
    %398 = tpu.matmul %395, %397, %cst_153 {dimension_numbers = #tpu.dot_dimension_numbers<[1], [0], [0], [1], [0, 0, 1, 1], [], []>} : vector<32x32xf32>, vector<32x32xf32>, vector<32x32xf32> -> vector<32x32xf32>
    %399 = vector.extract_strided_slice %395 {offsets = [0, 0], sizes = [16, 32], strides = [1, 1]} : vector<32x32xf32> to vector<16x32xf32>
    %cst_154 = arith.constant dense<0.000000e+00> : vector<16x32xf32>
    %400 = tpu.matmul %0, %399, %cst_154 {dimension_numbers = #tpu.dot_dimension_numbers<[1], [0], [0], [1], [0, 0, 1, 1], [], []>} : vector<16x16xf32>, vector<16x32xf32>, vector<16x32xf32> -> vector<16x32xf32>
    %401 = vector.extract_strided_slice %395 {offsets = [16, 0], sizes = [16, 32], strides = [1, 1]} : vector<32x32xf32> to vector<16x32xf32>
    %cst_155 = arith.constant dense<0.000000e+00> : vector<16x32xf32>
    %402 = tpu.matmul %0, %401, %cst_155 {dimension_numbers = #tpu.dot_dimension_numbers<[1], [0], [0], [1], [0, 0, 1, 1], [], []>} : vector<16x16xf32>, vector<16x32xf32>, vector<16x32xf32> -> vector<16x32xf32>
    %403 = tpu.concatenate %400, %402 in 0 : vector<16x32xf32>, vector<16x32xf32> -> vector<32x32xf32>
    %404 = vector.extract_strided_slice %2 {offsets = [1, 0, 0], sizes = [1, 32, 32], strides = [1, 1, 1]} : vector<3x32x32xf32> to vector<1x32x32xf32>
    %405 = vector.shape_cast %404 : vector<1x32x32xf32> to vector<32x32xf32>
    %cst_156 = arith.constant dense<0.000000e+00> : vector<32x32xf32>
    %406 = tpu.matmul %403, %405, %cst_156 {dimension_numbers = #tpu.dot_dimension_numbers<[1], [0], [0], [1], [0, 0, 1, 1], [], []>} : vector<32x32xf32>, vector<32x32xf32>, vector<32x32xf32> -> vector<32x32xf32>
    %407 = arith.addf %398, %406 : vector<32x32xf32>
    %408 = vector.extract_strided_slice %403 {offsets = [0, 0], sizes = [16, 32], strides = [1, 1]} : vector<32x32xf32> to vector<16x32xf32>
    %cst_157 = arith.constant dense<0.000000e+00> : vector<16x32xf32>
    %409 = tpu.matmul %0, %408, %cst_157 {dimension_numbers = #tpu.dot_dimension_numbers<[1], [0], [0], [1], [0, 0, 1, 1], [], []>} : vector<16x16xf32>, vector<16x32xf32>, vector<16x32xf32> -> vector<16x32xf32>
    %410 = vector.extract_strided_slice %403 {offsets = [16, 0], sizes = [16, 32], strides = [1, 1]} : vector<32x32xf32> to vector<16x32xf32>
    %cst_158 = arith.constant dense<0.000000e+00> : vector<16x32xf32>
    %411 = tpu.matmul %0, %410, %cst_158 {dimension_numbers = #tpu.dot_dimension_numbers<[1], [0], [0], [1], [0, 0, 1, 1], [], []>} : vector<16x16xf32>, vector<16x32xf32>, vector<16x32xf32> -> vector<16x32xf32>
    %412 = tpu.concatenate %409, %411 in 0 : vector<16x32xf32>, vector<16x32xf32> -> vector<32x32xf32>
    %cst_159 = arith.constant 2.000000e+00 : f32
    %413 = vector.broadcast %cst_159 : f32 to vector<32x32xf32>
    %414 = arith.mulf %413, %412 : vector<32x32xf32>
    %415 = arith.subf %414, %395 : vector<32x32xf32>
    %416 = vector.extract_strided_slice %2 {offsets = [2, 0, 0], sizes = [1, 32, 32], strides = [1, 1, 1]} : vector<3x32x32xf32> to vector<1x32x32xf32>
    %417 = vector.shape_cast %416 : vector<1x32x32xf32> to vector<32x32xf32>
    %cst_160 = arith.constant dense<0.000000e+00> : vector<32x32xf32>
    %418 = tpu.matmul %415, %417, %cst_160 {dimension_numbers = #tpu.dot_dimension_numbers<[1], [0], [0], [1], [0, 0, 1, 1], [], []>} : vector<32x32xf32>, vector<32x32xf32>, vector<32x32xf32> -> vector<32x32xf32>
    %419 = arith.addf %407, %418 : vector<32x32xf32>
    %420 = arith.addf %394, %419 : vector<32x32xf32>
    %421 = math.tanh %420 : vector<32x32xf32>
    %422 = arith.mulf %392, %355 : vector<32x32xf32>
    %cst_161 = arith.constant 1.000000e+00 : f32
    %423 = vector.broadcast %cst_161 : f32 to vector<32x32xf32>
    %424 = arith.subf %423, %392 : vector<32x32xf32>
    %425 = arith.mulf %424, %421 : vector<32x32xf32>
    %426 = arith.addf %422, %425 : vector<32x32xf32>
    %c5_162 = arith.constant 5 : index
    %c0_163 = arith.constant 0 : index
    %c0_164 = arith.constant 0 : index
    %427 = vector.load %arg6[%c5_162, %c0_163, %c0_164] : memref<8x32x32xf32, #tpu.memory_space<vmem>>, vector<1x32x32xf32>
    %428 = vector.shape_cast %427 : vector<1x32x32xf32> to vector<32x32xf32>
    %429 = vector.shape_cast %426 : vector<32x32xf32> to vector<1x32x32xf32>
    tpu.vector_store %arg6[%c5_162, %c0_163, %c0_164], %429 {strides = array<i32>} : memref<8x32x32xf32, #tpu.memory_space<vmem>>, vector<1x32x32xf32>,
    %c6 = arith.constant 6 : index
    %c0_165 = arith.constant 0 : index
    %c0_166 = arith.constant 0 : index
    %430 = vector.load %arg1[%c6, %c0_165, %c0_166] : memref<8x32x64xf32, #tpu.memory_space<vmem>>, vector<1x32x64xf32>
    %431 = vector.shape_cast %430 : vector<1x32x64xf32> to vector<32x64xf32>
    %432 = vector.extract_strided_slice %1 {offsets = [0, 0, 0], sizes = [1, 32, 64], strides = [1, 1, 1]} : vector<3x32x64xf32> to vector<1x32x64xf32>
    %433 = vector.shape_cast %432 : vector<1x32x64xf32> to vector<32x64xf32>
    %cst_167 = arith.constant dense<0.000000e+00> : vector<32x64xf32>
    %434 = tpu.matmul %426, %433, %cst_167 {dimension_numbers = #tpu.dot_dimension_numbers<[1], [0], [0], [1], [0, 0, 1, 1], [], []>} : vector<32x32xf32>, vector<32x64xf32>, vector<32x64xf32> -> vector<32x64xf32>
    %435 = vector.extract_strided_slice %426 {offsets = [0, 0], sizes = [16, 32], strides = [1, 1]} : vector<32x32xf32> to vector<16x32xf32>
    %cst_168 = arith.constant dense<0.000000e+00> : vector<16x32xf32>
    %436 = tpu.matmul %0, %435, %cst_168 {dimension_numbers = #tpu.dot_dimension_numbers<[1], [0], [0], [1], [0, 0, 1, 1], [], []>} : vector<16x16xf32>, vector<16x32xf32>, vector<16x32xf32> -> vector<16x32xf32>
    %437 = vector.extract_strided_slice %426 {offsets = [16, 0], sizes = [16, 32], strides = [1, 1]} : vector<32x32xf32> to vector<16x32xf32>
    %cst_169 = arith.constant dense<0.000000e+00> : vector<16x32xf32>
    %438 = tpu.matmul %0, %437, %cst_169 {dimension_numbers = #tpu.dot_dimension_numbers<[1], [0], [0], [1], [0, 0, 1, 1], [], []>} : vector<16x16xf32>, vector<16x32xf32>, vector<16x32xf32> -> vector<16x32xf32>
    %439 = tpu.concatenate %436, %438 in 0 : vector<16x32xf32>, vector<16x32xf32> -> vector<32x32xf32>
    %440 = vector.extract_strided_slice %1 {offsets = [1, 0, 0], sizes = [1, 32, 64], strides = [1, 1, 1]} : vector<3x32x64xf32> to vector<1x32x64xf32>
    %441 = vector.shape_cast %440 : vector<1x32x64xf32> to vector<32x64xf32>
    %cst_170 = arith.constant dense<0.000000e+00> : vector<32x64xf32>
    %442 = tpu.matmul %439, %441, %cst_170 {dimension_numbers = #tpu.dot_dimension_numbers<[1], [0], [0], [1], [0, 0, 1, 1], [], []>} : vector<32x32xf32>, vector<32x64xf32>, vector<32x64xf32> -> vector<32x64xf32>
    %443 = arith.addf %434, %442 : vector<32x64xf32>
    %444 = vector.extract_strided_slice %439 {offsets = [0, 0], sizes = [16, 32], strides = [1, 1]} : vector<32x32xf32> to vector<16x32xf32>
    %cst_171 = arith.constant dense<0.000000e+00> : vector<16x32xf32>
    %445 = tpu.matmul %0, %444, %cst_171 {dimension_numbers = #tpu.dot_dimension_numbers<[1], [0], [0], [1], [0, 0, 1, 1], [], []>} : vector<16x16xf32>, vector<16x32xf32>, vector<16x32xf32> -> vector<16x32xf32>
    %446 = vector.extract_strided_slice %439 {offsets = [16, 0], sizes = [16, 32], strides = [1, 1]} : vector<32x32xf32> to vector<16x32xf32>
    %cst_172 = arith.constant dense<0.000000e+00> : vector<16x32xf32>
    %447 = tpu.matmul %0, %446, %cst_172 {dimension_numbers = #tpu.dot_dimension_numbers<[1], [0], [0], [1], [0, 0, 1, 1], [], []>} : vector<16x16xf32>, vector<16x32xf32>, vector<16x32xf32> -> vector<16x32xf32>
    %448 = tpu.concatenate %445, %447 in 0 : vector<16x32xf32>, vector<16x32xf32> -> vector<32x32xf32>
    %cst_173 = arith.constant 2.000000e+00 : f32
    %449 = vector.broadcast %cst_173 : f32 to vector<32x32xf32>
    %450 = arith.mulf %449, %448 : vector<32x32xf32>
    %451 = arith.subf %450, %426 : vector<32x32xf32>
    %452 = vector.extract_strided_slice %1 {offsets = [2, 0, 0], sizes = [1, 32, 64], strides = [1, 1, 1]} : vector<3x32x64xf32> to vector<1x32x64xf32>
    %453 = vector.shape_cast %452 : vector<1x32x64xf32> to vector<32x64xf32>
    %cst_174 = arith.constant dense<0.000000e+00> : vector<32x64xf32>
    %454 = tpu.matmul %451, %453, %cst_174 {dimension_numbers = #tpu.dot_dimension_numbers<[1], [0], [0], [1], [0, 0, 1, 1], [], []>} : vector<32x32xf32>, vector<32x64xf32>, vector<32x64xf32> -> vector<32x64xf32>
    %455 = arith.addf %443, %454 : vector<32x64xf32>
    %456 = arith.addf %431, %455 : vector<32x64xf32>
    %457 = arith.negf %456 : vector<32x64xf32>
    %458 = math.exp %457 : vector<32x64xf32>
    %cst_175 = arith.constant 1.000000e+00 : f32
    %459 = vector.broadcast %cst_175 : f32 to vector<32x64xf32>
    %460 = arith.addf %459, %458 : vector<32x64xf32>
    %461 = arith.divf %459, %460 : vector<32x64xf32>
    %462 = vector.extract_strided_slice %461 {offsets = [0, 0], sizes = [32, 32], strides = [1, 1]} : vector<32x64xf32> to vector<32x32xf32>
    %463 = vector.extract_strided_slice %461 {offsets = [0, 32], sizes = [32, 32], strides = [1, 1]} : vector<32x64xf32> to vector<32x32xf32>
    %c6_176 = arith.constant 6 : index
    %c0_177 = arith.constant 0 : index
    %c0_178 = arith.constant 0 : index
    %464 = vector.load %arg2[%c6_176, %c0_177, %c0_178] : memref<8x32x32xf32, #tpu.memory_space<vmem>>, vector<1x32x32xf32>
    %465 = vector.shape_cast %464 : vector<1x32x32xf32> to vector<32x32xf32>
    %466 = arith.mulf %462, %426 : vector<32x32xf32>
    %467 = vector.extract_strided_slice %2 {offsets = [0, 0, 0], sizes = [1, 32, 32], strides = [1, 1, 1]} : vector<3x32x32xf32> to vector<1x32x32xf32>
    %468 = vector.shape_cast %467 : vector<1x32x32xf32> to vector<32x32xf32>
    %cst_179 = arith.constant dense<0.000000e+00> : vector<32x32xf32>
    %469 = tpu.matmul %466, %468, %cst_179 {dimension_numbers = #tpu.dot_dimension_numbers<[1], [0], [0], [1], [0, 0, 1, 1], [], []>} : vector<32x32xf32>, vector<32x32xf32>, vector<32x32xf32> -> vector<32x32xf32>
    %470 = vector.extract_strided_slice %466 {offsets = [0, 0], sizes = [16, 32], strides = [1, 1]} : vector<32x32xf32> to vector<16x32xf32>
    %cst_180 = arith.constant dense<0.000000e+00> : vector<16x32xf32>
    %471 = tpu.matmul %0, %470, %cst_180 {dimension_numbers = #tpu.dot_dimension_numbers<[1], [0], [0], [1], [0, 0, 1, 1], [], []>} : vector<16x16xf32>, vector<16x32xf32>, vector<16x32xf32> -> vector<16x32xf32>
    %472 = vector.extract_strided_slice %466 {offsets = [16, 0], sizes = [16, 32], strides = [1, 1]} : vector<32x32xf32> to vector<16x32xf32>
    %cst_181 = arith.constant dense<0.000000e+00> : vector<16x32xf32>
    %473 = tpu.matmul %0, %472, %cst_181 {dimension_numbers = #tpu.dot_dimension_numbers<[1], [0], [0], [1], [0, 0, 1, 1], [], []>} : vector<16x16xf32>, vector<16x32xf32>, vector<16x32xf32> -> vector<16x32xf32>
    %474 = tpu.concatenate %471, %473 in 0 : vector<16x32xf32>, vector<16x32xf32> -> vector<32x32xf32>
    %475 = vector.extract_strided_slice %2 {offsets = [1, 0, 0], sizes = [1, 32, 32], strides = [1, 1, 1]} : vector<3x32x32xf32> to vector<1x32x32xf32>
    %476 = vector.shape_cast %475 : vector<1x32x32xf32> to vector<32x32xf32>
    %cst_182 = arith.constant dense<0.000000e+00> : vector<32x32xf32>
    %477 = tpu.matmul %474, %476, %cst_182 {dimension_numbers = #tpu.dot_dimension_numbers<[1], [0], [0], [1], [0, 0, 1, 1], [], []>} : vector<32x32xf32>, vector<32x32xf32>, vector<32x32xf32> -> vector<32x32xf32>
    %478 = arith.addf %469, %477 : vector<32x32xf32>
    %479 = vector.extract_strided_slice %474 {offsets = [0, 0], sizes = [16, 32], strides = [1, 1]} : vector<32x32xf32> to vector<16x32xf32>
    %cst_183 = arith.constant dense<0.000000e+00> : vector<16x32xf32>
    %480 = tpu.matmul %0, %479, %cst_183 {dimension_numbers = #tpu.dot_dimension_numbers<[1], [0], [0], [1], [0, 0, 1, 1], [], []>} : vector<16x16xf32>, vector<16x32xf32>, vector<16x32xf32> -> vector<16x32xf32>
    %481 = vector.extract_strided_slice %474 {offsets = [16, 0], sizes = [16, 32], strides = [1, 1]} : vector<32x32xf32> to vector<16x32xf32>
    %cst_184 = arith.constant dense<0.000000e+00> : vector<16x32xf32>
    %482 = tpu.matmul %0, %481, %cst_184 {dimension_numbers = #tpu.dot_dimension_numbers<[1], [0], [0], [1], [0, 0, 1, 1], [], []>} : vector<16x16xf32>, vector<16x32xf32>, vector<16x32xf32> -> vector<16x32xf32>
    %483 = tpu.concatenate %480, %482 in 0 : vector<16x32xf32>, vector<16x32xf32> -> vector<32x32xf32>
    %cst_185 = arith.constant 2.000000e+00 : f32
    %484 = vector.broadcast %cst_185 : f32 to vector<32x32xf32>
    %485 = arith.mulf %484, %483 : vector<32x32xf32>
    %486 = arith.subf %485, %466 : vector<32x32xf32>
    %487 = vector.extract_strided_slice %2 {offsets = [2, 0, 0], sizes = [1, 32, 32], strides = [1, 1, 1]} : vector<3x32x32xf32> to vector<1x32x32xf32>
    %488 = vector.shape_cast %487 : vector<1x32x32xf32> to vector<32x32xf32>
    %cst_186 = arith.constant dense<0.000000e+00> : vector<32x32xf32>
    %489 = tpu.matmul %486, %488, %cst_186 {dimension_numbers = #tpu.dot_dimension_numbers<[1], [0], [0], [1], [0, 0, 1, 1], [], []>} : vector<32x32xf32>, vector<32x32xf32>, vector<32x32xf32> -> vector<32x32xf32>
    %490 = arith.addf %478, %489 : vector<32x32xf32>
    %491 = arith.addf %465, %490 : vector<32x32xf32>
    %492 = math.tanh %491 : vector<32x32xf32>
    %493 = arith.mulf %463, %426 : vector<32x32xf32>
    %cst_187 = arith.constant 1.000000e+00 : f32
    %494 = vector.broadcast %cst_187 : f32 to vector<32x32xf32>
    %495 = arith.subf %494, %463 : vector<32x32xf32>
    %496 = arith.mulf %495, %492 : vector<32x32xf32>
    %497 = arith.addf %493, %496 : vector<32x32xf32>
    %c6_188 = arith.constant 6 : index
    %c0_189 = arith.constant 0 : index
    %c0_190 = arith.constant 0 : index
    %498 = vector.load %arg6[%c6_188, %c0_189, %c0_190] : memref<8x32x32xf32, #tpu.memory_space<vmem>>, vector<1x32x32xf32>
    %499 = vector.shape_cast %498 : vector<1x32x32xf32> to vector<32x32xf32>
    %500 = vector.shape_cast %497 : vector<32x32xf32> to vector<1x32x32xf32>
    tpu.vector_store %arg6[%c6_188, %c0_189, %c0_190], %500 {strides = array<i32>} : memref<8x32x32xf32, #tpu.memory_space<vmem>>, vector<1x32x32xf32>,
    %c7 = arith.constant 7 : index
    %c0_191 = arith.constant 0 : index
    %c0_192 = arith.constant 0 : index
    %501 = vector.load %arg1[%c7, %c0_191, %c0_192] : memref<8x32x64xf32, #tpu.memory_space<vmem>>, vector<1x32x64xf32>
    %502 = vector.shape_cast %501 : vector<1x32x64xf32> to vector<32x64xf32>
    %503 = vector.extract_strided_slice %1 {offsets = [0, 0, 0], sizes = [1, 32, 64], strides = [1, 1, 1]} : vector<3x32x64xf32> to vector<1x32x64xf32>
    %504 = vector.shape_cast %503 : vector<1x32x64xf32> to vector<32x64xf32>
    %cst_193 = arith.constant dense<0.000000e+00> : vector<32x64xf32>
    %505 = tpu.matmul %497, %504, %cst_193 {dimension_numbers = #tpu.dot_dimension_numbers<[1], [0], [0], [1], [0, 0, 1, 1], [], []>} : vector<32x32xf32>, vector<32x64xf32>, vector<32x64xf32> -> vector<32x64xf32>
    %506 = vector.extract_strided_slice %497 {offsets = [0, 0], sizes = [16, 32], strides = [1, 1]} : vector<32x32xf32> to vector<16x32xf32>
    %cst_194 = arith.constant dense<0.000000e+00> : vector<16x32xf32>
    %507 = tpu.matmul %0, %506, %cst_194 {dimension_numbers = #tpu.dot_dimension_numbers<[1], [0], [0], [1], [0, 0, 1, 1], [], []>} : vector<16x16xf32>, vector<16x32xf32>, vector<16x32xf32> -> vector<16x32xf32>
    %508 = vector.extract_strided_slice %497 {offsets = [16, 0], sizes = [16, 32], strides = [1, 1]} : vector<32x32xf32> to vector<16x32xf32>
    %cst_195 = arith.constant dense<0.000000e+00> : vector<16x32xf32>
    %509 = tpu.matmul %0, %508, %cst_195 {dimension_numbers = #tpu.dot_dimension_numbers<[1], [0], [0], [1], [0, 0, 1, 1], [], []>} : vector<16x16xf32>, vector<16x32xf32>, vector<16x32xf32> -> vector<16x32xf32>
    %510 = tpu.concatenate %507, %509 in 0 : vector<16x32xf32>, vector<16x32xf32> -> vector<32x32xf32>
    %511 = vector.extract_strided_slice %1 {offsets = [1, 0, 0], sizes = [1, 32, 64], strides = [1, 1, 1]} : vector<3x32x64xf32> to vector<1x32x64xf32>
    %512 = vector.shape_cast %511 : vector<1x32x64xf32> to vector<32x64xf32>
    %cst_196 = arith.constant dense<0.000000e+00> : vector<32x64xf32>
    %513 = tpu.matmul %510, %512, %cst_196 {dimension_numbers = #tpu.dot_dimension_numbers<[1], [0], [0], [1], [0, 0, 1, 1], [], []>} : vector<32x32xf32>, vector<32x64xf32>, vector<32x64xf32> -> vector<32x64xf32>
    %514 = arith.addf %505, %513 : vector<32x64xf32>
    %515 = vector.extract_strided_slice %510 {offsets = [0, 0], sizes = [16, 32], strides = [1, 1]} : vector<32x32xf32> to vector<16x32xf32>
    %cst_197 = arith.constant dense<0.000000e+00> : vector<16x32xf32>
    %516 = tpu.matmul %0, %515, %cst_197 {dimension_numbers = #tpu.dot_dimension_numbers<[1], [0], [0], [1], [0, 0, 1, 1], [], []>} : vector<16x16xf32>, vector<16x32xf32>, vector<16x32xf32> -> vector<16x32xf32>
    %517 = vector.extract_strided_slice %510 {offsets = [16, 0], sizes = [16, 32], strides = [1, 1]} : vector<32x32xf32> to vector<16x32xf32>
    %cst_198 = arith.constant dense<0.000000e+00> : vector<16x32xf32>
    %518 = tpu.matmul %0, %517, %cst_198 {dimension_numbers = #tpu.dot_dimension_numbers<[1], [0], [0], [1], [0, 0, 1, 1], [], []>} : vector<16x16xf32>, vector<16x32xf32>, vector<16x32xf32> -> vector<16x32xf32>
    %519 = tpu.concatenate %516, %518 in 0 : vector<16x32xf32>, vector<16x32xf32> -> vector<32x32xf32>
    %cst_199 = arith.constant 2.000000e+00 : f32
    %520 = vector.broadcast %cst_199 : f32 to vector<32x32xf32>
    %521 = arith.mulf %520, %519 : vector<32x32xf32>
    %522 = arith.subf %521, %497 : vector<32x32xf32>
    %523 = vector.extract_strided_slice %1 {offsets = [2, 0, 0], sizes = [1, 32, 64], strides = [1, 1, 1]} : vector<3x32x64xf32> to vector<1x32x64xf32>
    %524 = vector.shape_cast %523 : vector<1x32x64xf32> to vector<32x64xf32>
    %cst_200 = arith.constant dense<0.000000e+00> : vector<32x64xf32>
    %525 = tpu.matmul %522, %524, %cst_200 {dimension_numbers = #tpu.dot_dimension_numbers<[1], [0], [0], [1], [0, 0, 1, 1], [], []>} : vector<32x32xf32>, vector<32x64xf32>, vector<32x64xf32> -> vector<32x64xf32>
    %526 = arith.addf %514, %525 : vector<32x64xf32>
    %527 = arith.addf %502, %526 : vector<32x64xf32>
    %528 = arith.negf %527 : vector<32x64xf32>
    %529 = math.exp %528 : vector<32x64xf32>
    %cst_201 = arith.constant 1.000000e+00 : f32
    %530 = vector.broadcast %cst_201 : f32 to vector<32x64xf32>
    %531 = arith.addf %530, %529 : vector<32x64xf32>
    %532 = arith.divf %530, %531 : vector<32x64xf32>
    %533 = vector.extract_strided_slice %532 {offsets = [0, 0], sizes = [32, 32], strides = [1, 1]} : vector<32x64xf32> to vector<32x32xf32>
    %534 = vector.extract_strided_slice %532 {offsets = [0, 32], sizes = [32, 32], strides = [1, 1]} : vector<32x64xf32> to vector<32x32xf32>
    %c7_202 = arith.constant 7 : index
    %c0_203 = arith.constant 0 : index
    %c0_204 = arith.constant 0 : index
    %535 = vector.load %arg2[%c7_202, %c0_203, %c0_204] : memref<8x32x32xf32, #tpu.memory_space<vmem>>, vector<1x32x32xf32>
    %536 = vector.shape_cast %535 : vector<1x32x32xf32> to vector<32x32xf32>
    %537 = arith.mulf %533, %497 : vector<32x32xf32>
    %538 = vector.extract_strided_slice %2 {offsets = [0, 0, 0], sizes = [1, 32, 32], strides = [1, 1, 1]} : vector<3x32x32xf32> to vector<1x32x32xf32>
    %539 = vector.shape_cast %538 : vector<1x32x32xf32> to vector<32x32xf32>
    %cst_205 = arith.constant dense<0.000000e+00> : vector<32x32xf32>
    %540 = tpu.matmul %537, %539, %cst_205 {dimension_numbers = #tpu.dot_dimension_numbers<[1], [0], [0], [1], [0, 0, 1, 1], [], []>} : vector<32x32xf32>, vector<32x32xf32>, vector<32x32xf32> -> vector<32x32xf32>
    %541 = vector.extract_strided_slice %537 {offsets = [0, 0], sizes = [16, 32], strides = [1, 1]} : vector<32x32xf32> to vector<16x32xf32>
    %cst_206 = arith.constant dense<0.000000e+00> : vector<16x32xf32>
    %542 = tpu.matmul %0, %541, %cst_206 {dimension_numbers = #tpu.dot_dimension_numbers<[1], [0], [0], [1], [0, 0, 1, 1], [], []>} : vector<16x16xf32>, vector<16x32xf32>, vector<16x32xf32> -> vector<16x32xf32>
    %543 = vector.extract_strided_slice %537 {offsets = [16, 0], sizes = [16, 32], strides = [1, 1]} : vector<32x32xf32> to vector<16x32xf32>
    %cst_207 = arith.constant dense<0.000000e+00> : vector<16x32xf32>
    %544 = tpu.matmul %0, %543, %cst_207 {dimension_numbers = #tpu.dot_dimension_numbers<[1], [0], [0], [1], [0, 0, 1, 1], [], []>} : vector<16x16xf32>, vector<16x32xf32>, vector<16x32xf32> -> vector<16x32xf32>
    %545 = tpu.concatenate %542, %544 in 0 : vector<16x32xf32>, vector<16x32xf32> -> vector<32x32xf32>
    %546 = vector.extract_strided_slice %2 {offsets = [1, 0, 0], sizes = [1, 32, 32], strides = [1, 1, 1]} : vector<3x32x32xf32> to vector<1x32x32xf32>
    %547 = vector.shape_cast %546 : vector<1x32x32xf32> to vector<32x32xf32>
    %cst_208 = arith.constant dense<0.000000e+00> : vector<32x32xf32>
    %548 = tpu.matmul %545, %547, %cst_208 {dimension_numbers = #tpu.dot_dimension_numbers<[1], [0], [0], [1], [0, 0, 1, 1], [], []>} : vector<32x32xf32>, vector<32x32xf32>, vector<32x32xf32> -> vector<32x32xf32>
    %549 = arith.addf %540, %548 : vector<32x32xf32>
    %550 = vector.extract_strided_slice %545 {offsets = [0, 0], sizes = [16, 32], strides = [1, 1]} : vector<32x32xf32> to vector<16x32xf32>
    %cst_209 = arith.constant dense<0.000000e+00> : vector<16x32xf32>
    %551 = tpu.matmul %0, %550, %cst_209 {dimension_numbers = #tpu.dot_dimension_numbers<[1], [0], [0], [1], [0, 0, 1, 1], [], []>} : vector<16x16xf32>, vector<16x32xf32>, vector<16x32xf32> -> vector<16x32xf32>
    %552 = vector.extract_strided_slice %545 {offsets = [16, 0], sizes = [16, 32], strides = [1, 1]} : vector<32x32xf32> to vector<16x32xf32>
    %cst_210 = arith.constant dense<0.000000e+00> : vector<16x32xf32>
    %553 = tpu.matmul %0, %552, %cst_210 {dimension_numbers = #tpu.dot_dimension_numbers<[1], [0], [0], [1], [0, 0, 1, 1], [], []>} : vector<16x16xf32>, vector<16x32xf32>, vector<16x32xf32> -> vector<16x32xf32>
    %554 = tpu.concatenate %551, %553 in 0 : vector<16x32xf32>, vector<16x32xf32> -> vector<32x32xf32>
    %cst_211 = arith.constant 2.000000e+00 : f32
    %555 = vector.broadcast %cst_211 : f32 to vector<32x32xf32>
    %556 = arith.mulf %555, %554 : vector<32x32xf32>
    %557 = arith.subf %556, %537 : vector<32x32xf32>
    %558 = vector.extract_strided_slice %2 {offsets = [2, 0, 0], sizes = [1, 32, 32], strides = [1, 1, 1]} : vector<3x32x32xf32> to vector<1x32x32xf32>
    %559 = vector.shape_cast %558 : vector<1x32x32xf32> to vector<32x32xf32>
    %cst_212 = arith.constant dense<0.000000e+00> : vector<32x32xf32>
    %560 = tpu.matmul %557, %559, %cst_212 {dimension_numbers = #tpu.dot_dimension_numbers<[1], [0], [0], [1], [0, 0, 1, 1], [], []>} : vector<32x32xf32>, vector<32x32xf32>, vector<32x32xf32> -> vector<32x32xf32>
    %561 = arith.addf %549, %560 : vector<32x32xf32>
    %562 = arith.addf %536, %561 : vector<32x32xf32>
    %563 = math.tanh %562 : vector<32x32xf32>
    %564 = arith.mulf %534, %497 : vector<32x32xf32>
    %cst_213 = arith.constant 1.000000e+00 : f32
    %565 = vector.broadcast %cst_213 : f32 to vector<32x32xf32>
    %566 = arith.subf %565, %534 : vector<32x32xf32>
    %567 = arith.mulf %566, %563 : vector<32x32xf32>
    %568 = arith.addf %564, %567 : vector<32x32xf32>
    %c7_214 = arith.constant 7 : index
    %c0_215 = arith.constant 0 : index
    %c0_216 = arith.constant 0 : index
    %569 = vector.load %arg6[%c7_214, %c0_215, %c0_216] : memref<8x32x32xf32, #tpu.memory_space<vmem>>, vector<1x32x32xf32>
    %570 = vector.shape_cast %569 : vector<1x32x32xf32> to vector<32x32xf32>
    %571 = vector.shape_cast %568 : vector<32x32xf32> to vector<1x32x32xf32>
    tpu.vector_store %arg6[%c7_214, %c0_215, %c0_216], %571 {strides = array<i32>} : memref<8x32x32xf32, #tpu.memory_space<vmem>>, vector<1x32x32xf32>,
    return
  }
}

</mosaic_0001>

<bundles_post_ra>
// kernel: squeeze.4
= control target key start
LH: loop header
LB: loop body
LE: loop exit
PB: predicated region body
PF: predicated region fallthrough
CT: control target
= control target key end

     0   :  { %vm42_vm0 = vcmask 1047556   ;;  %vm22_vm1 = vcmask 261120   ;;  %s83_s19 = smov 96   ;;  %s84_s20 = smov 32   ;;  %s139_s0 = inlined_call_operand.vmem [shape: f32[1,2,512], index: 0, kind: input, shape index: {}]   ;;  %s140_s1 = inlined_call_operand.vmem [shape: f32[32,32], index: 1, kind: output, shape index: {}]  }
   0x1   :  { %v71_v0 = vld [vmem:[%s139_s0 + $0x6] sm:$0x3]  ;;  %v72_v1 = vld [vmem:[%s139_s0 + $0x4] sm:$0x3]  ;;  %v73_v2 = vld [vmem:[%s139_s0 + $0x2] sm:$0x3] }
   0x2   :  { %9 = vst [vmem:[#allocation0 + $0x18] sm:$0x3] %v71_v0  ;;  %14 = vst [vmem:[#allocation0 + $0x10] sm:$0x3] %v72_v1  ;;  %v19_v3 = vld [vmem:[%s139_s0] sm:$0x3] }
   0x3   :  { %18 = vst [vmem:[#allocation0 + $0x8] sm:$0x3] %v73_v2  ;;  %20 = vst [vmem:[#allocation0] sm:$0x3] %v19_v3  ;;  %s85_s23 = smov 64  }
   0x9   :  { %v30_v5 = vld [vmem:[#allocation0 + $0x10] sm:$0x3]   ;;  %v35_v6 = vld [vmem:[#allocation0 + $0x18] sm:$0x3]  }
   0xa   :  { %v25_v4 = vld [vmem:[#allocation0 + $0x8] sm:$0x3]   ;;  %75 = vst.msk [vmem:[%s140_s1 + $0x8] ss:$16 sm:$0x3] %vm22_vm1, %v30_v5  }
   0xb   :  { %v39_v7 = vld [vmem:[#allocation0] ss:$8 sm:$0xf]   ;;  %v41_v8 = vld [vmem:[#allocation0 - $0x1f] ss:$8 sm:$0xf0]  }
   0xc   :  { %74 = vst.msk [vmem:[%s140_s1 + $0x4] ss:$16 sm:$0x3] %vm22_vm1, %v25_v4   ;;  %76 = vst.msk [vmem:[%s140_s1 + $0xc] ss:$16 sm:$0x3] %vm22_vm1, %v35_v6   ;;  %v43_v9 = vsel %vm42_vm0, %v41_v8, %v39_v7 }
   0xd   :  { %v59_v10 = vld [vmem:[#allocation0] ss:$8 sm:$0xf]   ;;  %v61_v11 = vld [vmem:[#allocation0 - $0x1f] ss:$8 sm:$0xf0]   ;;  %44 = vrot.lane.b32.xlu0 %v43_v9, %s83_s19 }
   0xe   :  { %v63_v12 = vsel %vm42_vm0, %v61_v11, %v59_v10  ;;  %v49_v13 = vld [vmem:[#allocation0] ss:$8 sm:$0xf]   ;;  %v51_v14 = vld [vmem:[#allocation0 - $0x1f] ss:$8 sm:$0xf0]  }
   0xf   :  { %64 = vrot.lane.b32.xlu1 %v63_v12, %s84_s20  ;;  %v53_v15 = vsel %vm42_vm0, %v51_v14, %v49_v13  ;;  %v21_v16 = vld [vmem:[#allocation0] sm:$0x3]  }
  0x10   :  { %23 = vst.msk [vmem:[%s140_s1] ss:$16 sm:$0x3] %vm22_vm1, %v21_v16  }
  0x11   :  { %54 = vrot.lane.b32.xlu0 %v53_v15, %s85_s23 }
  0x7f   :  { %v45_v17 = vpop.permute.xlu0 %44  }
  0x80   :  { %77 = vst.msk [vmem:[%s140_s1 + $0x1] ss:$4 sm:$0xff] %vm22_vm1, %v45_v17  }
  0x81   :  { %v65_v18 = vpop.permute.xlu1 %64  }
  0x82   :  { %79 = vst.msk [vmem:[%s140_s1 + $0x3] ss:$4 sm:$0xff] %vm22_vm1, %v65_v18  }
  0x83   :  { %v55_v19 = vpop.permute.xlu0 %54  }
  0x84   :  { %78 = vst.msk [vmem:[%s140_s1 + $0x2] ss:$4 sm:$0xff] %vm22_vm1, %v55_v19  }

// kernel: squeeze.7
= control target key start
LH: loop header
LB: loop body
LE: loop exit
PB: predicated region body
PF: predicated region fallthrough
CT: control target
= control target key end

     0   :  { %s8_s6 = smov 3  ;;  %s11_s7 = smov 12  ;;  %vm13_vm0 = vcmask 1043458   ;;  %vm18_vm1 = vcmask 1045508   ;;  %vm23_vm2 = vcmask 1047558   ;;  %vm3_vm3 = vcmask 261120   ;;  %s212_s0 = inlined_call_operand.vmem [shape: f32[1,32,32], index: 0, kind: input, shape index: {}]   ;;  %s213_s1 = inlined_call_operand.vmem [shape: f32[1,2,512], index: 1, kind: output, shape index: {}]  }
   0x1   :  { %v121_v0 = vld [vmem:[%s212_s0 + $0x3] ss:$16 sm:%s8_s6]   ;;  %v122_v1 = vld [vmem:[%s212_s0 - $0x19] ss:$16 sm:%s11_s7]   ;;  %s16_s12 = smov 48  ;;  %s21_s13 = smov 192 }
   0x2   :  { %v14_v2 = vsel %vm13_vm0, %v122_v1, %v121_v0  ;;  %v123_v3 = vld [vmem:[%s212_s0 - $0x35] ss:$16 sm:%s16_s12]   ;;  %v124_v4 = vld [vmem:[%s212_s0 - $0x51] ss:$16 sm:%s21_s13]   ;;  %s36_s18 = smov 3  ;;  %s39_s21 = smov 12 }
   0x3   :  { %v19_v5 = vsel %vm18_vm1, %v123_v3, %v14_v2  ;;  %v125_v6 = vld [vmem:[%s212_s0 + $0x2] ss:$16 sm:%s36_s18]   ;;  %s44_s22 = smov 48  ;;  %v2_v7 = vld [vmem:[%s212_s0] ss:$4 sm:$0xff]   ;;  %s49_s29 = smov 192 }
   0x4   :  { %v24_v8 = vsel %vm23_vm2, %v124_v4, %v19_v5  ;;  %v126_v9 = vld [vmem:[%s212_s0 - $0x1a] ss:$16 sm:%s39_s21]   ;;  %v127_v10 = vld [vmem:[%s212_s0 - $0x36] ss:$16 sm:%s44_s22]   ;;  %s139_s30 = smov 96   ;;  %s64_s4 = smov 3 }
   0x5   :  { %25 = vrot.lane.b32.xlu0 %v24_v8, %s139_s30  ;;  %v42_v11 = vsel %vm13_vm0, %v126_v9, %v125_v6  ;;  %v128_v12 = vld [vmem:[%s212_s0 - $0x52] ss:$16 sm:%s49_s29]   ;;  %s67_s5 = smov 12  ;;  %s72_s10 = smov 48  ;;  %vm27_vm4 = vcmask 1048320   ;;  %vm55_vm5 = vcmask 785920  }
   0x6   :  { %v47_v13 = vsel %vm18_vm1, %v127_v10, %v42_v11  ;;  %v129_v14 = vld [vmem:[%s212_s0 + $0x1] ss:$16 sm:%s64_s4]   ;;  %v130_v15 = vld [vmem:[%s212_s0 - $0x1b] ss:$16 sm:%s67_s5]   ;;  %s77_s11 = smov 192  ;;  %s141_s16 = smov 32  }
   0x7   :  { %4 = vst.msk [vmem:[#allocation0] ss:$8 sm:$0xf] %vm3_vm3, %v2_v7   ;;  %6 = vst.msk [vmem:[#allocation0 - $0x1f] ss:$8 sm:$0xf0] %vm3_vm3, %v2_v7   ;;  %v52_v16 = vsel %vm23_vm2, %v128_v12, %v47_v13  ;;  %v70_v17 = vsel %vm13_vm0, %v130_v15, %v129_v14 }
   0x8   :  { %v131_v18 = vld [vmem:[%s212_s0 - $0x37] ss:$16 sm:%s72_s10]   ;;  %v132_v19 = vld [vmem:[%s212_s0 - $0x53] ss:$16 sm:%s77_s11]   ;;  %s140_s0 = smov 64   ;;  %vm83_vm6 = vcmask 523520  }
   0x9   :  { %v75_v20 = vsel %vm18_vm1, %v131_v18, %v70_v17  ;;  %53 = vrot.lane.b32.xlu0 %v52_v16, %s140_s0 }
   0xa   :  { %v80_v21 = vsel %vm23_vm2, %v132_v19, %v75_v20 }
   0xb   :  { %81 = vrot.lane.b32.xlu1 %v80_v21, %s141_s16 }
  0x77   :  { %v26_v22 = vpop.permute.xlu0 %25  }
  0x78   :  { %28 = vst.msk [vmem:[#allocation0] sm:$0x3] %vm27_vm4, %v26_v22   ;;  %30 = vst.msk [vmem:[#allocation0 + $0x6] sm:$0xc] %vm27_vm4, %v26_v22  }
  0x79   :  { %32 = vst.msk [vmem:[#allocation0 + $0xc] sm:$0x30] %vm27_vm4, %v26_v22   ;;  %34 = vst.msk [vmem:[#allocation0 + $0x12] sm:$0xc0] %vm27_vm4, %v26_v22  }
  0x7b   :  { %v54_v23 = vpop.permute.xlu0 %53  }
  0x7c   :  { %56 = vst.msk [vmem:[#allocation0] sm:$0x3] %vm55_vm5, %v54_v23   ;;  %58 = vst.msk [vmem:[#allocation0 + $0x6] sm:$0xc] %vm55_vm5, %v54_v23  }
  0x7d   :  { %60 = vst.msk [vmem:[#allocation0 + $0xc] sm:$0x30] %vm55_vm5, %v54_v23   ;;  %62 = vst.msk [vmem:[#allocation0 + $0x12] sm:$0xc0] %vm55_vm5, %v54_v23   ;;  %v82_v24 = vpop.permute.xlu1 %81  }
  0x7e   :  { %84 = vst.msk [vmem:[#allocation0] sm:$0x3] %vm83_vm6, %v82_v24   ;;  %86 = vst.msk [vmem:[#allocation0 + $0x6] sm:$0xc] %vm83_vm6, %v82_v24  }
  0x7f   :  { %88 = vst.msk [vmem:[#allocation0 + $0xc] sm:$0x30] %vm83_vm6, %v82_v24   ;;  %90 = vst.msk [vmem:[#allocation0 + $0x12] sm:$0xc0] %vm83_vm6, %v82_v24  }
  0x85   :  { %v95_v25 = vld [vmem:[#allocation0] sm:$0x3]  ;;  %v100_v26 = vld [vmem:[#allocation0 + $0x8] sm:$0x3] }
  0x86   :  { %v106_v27 = vld [vmem:[#allocation0 + $0x10] sm:$0x3]  ;;  %98 = vst [vmem:[%s213_s1] sm:$0x3] %v95_v25  ;;  %133 = vst [vmem:[%s213_s1 + $0x2] sm:$0x3] %v100_v26 }
  0x87   :  { %134 = vst [vmem:[%s213_s1 + $0x4] sm:$0x3] %v106_v27  ;;  %v113_v28 = vld [vmem:[#allocation0 + $0x18] sm:$0x3] }
  0x88   :  { %135 = vst [vmem:[%s213_s1 + $0x6] sm:$0x3] %v113_v28 }

// kernel: dcrnn_encoder_forward.2
= control target key start
LH: loop header
LB: loop body
LE: loop exit
PB: predicated region body
PF: predicated region fallthrough
CT: control target
= control target key end

     0   :  { %vm57_vm0 = vcmask 130048   ;;  %vm214_vm1 = vcmask 261120   ;;  %s12986_s8 = smov 32   ;;  %s12987_s24 = smov 96   ;;  %s15483_s3 = inlined_call_operand.vmem [shape: f32[32,32], index: 3, kind: input, shape index: {}]   ;;  %s15484_s0 = inlined_call_operand.vmem [shape: f32[16,16], index: 0, kind: input, shape index: {}]   ;;  %s15485_s4 = inlined_call_operand.vmem [shape: f32[3,32,64], index: 4, kind: input, shape index: {}]   ;;  %s15486_s5 = inlined_call_operand.vmem [shape: f32[3,32,32], index: 5, kind: input, shape index: {}]   ;;  %s15487_s1 = inlined_call_operand.vmem [shape: f32[8,32,64], index: 1, kind: input, shape index: {}]   ;;  %s15488_s2 = inlined_call_operand.vmem [shape: f32[8,32,32], index: 2, kind: input, shape index: {}]   ;;  %s15489_s6 = inlined_call_operand.vmem [shape: f32[8,32,32], index: 6, kind: output, shape index: {}]  }
   0x1   :  { %v13026_v0 = vld [vmem:[%s15483_s3 + $0x8] sm:$0xff]  ;;  %v13031_v1 = vld [vmem:[%s15483_s3] sm:$0xff]  ;;  %v13044_v3 = vld [vmem:[%s15483_s3 + $0x18] sm:$0xff] }
   0x2   :  { %v13036_v2 = vld [vmem:[%s15484_s0] sm:$0xff]  ;;  %11594 = vmatprep.subr.mxu0 %v13026_v0  ;;  %v13049_v4 = vld [vmem:[%s15483_s3 + $0x10] sm:$0xff]  ;;  %v13055_v5 = vld [vmem:[%s15484_s0 + $0x8] sm:$0xff]  ;;  %11601 = vmatprep.subr.mxu1 %v13044_v3 }
   0x3   :  { %11598 = vmatprep.mubr.msk.f32.mxu0 %vm57_vm0, %v13036_v2  ;;  %11595 = vmatpush3.msra.mxu0 %v13026_v0  ;;  %v13063_v6 = vld [vmem:[%s15485_s4 + $0x18] sm:$0xff]  ;;  %v13081_v8 = vld [vmem:[%s15485_s4 + $0x10] sm:$0xff]  ;;  %v13095_v10 = vld [vmem:[%s15485_s4 + $0x8] sm:$0xff] }
   0x4   :  { %11596 = vmatprep.subr.mxu0 %v13031_v1  ;;  %11602 = vmatpush3.msra.mxu1 %v13044_v3  ;;  %v13070_v7 = vld [vmem:[%s15485_s4 + $0x38] sm:$0xff]  ;;  %v13089_v9 = vld [vmem:[%s15485_s4 + $0x30] sm:$0xff]  ;;  %v13105_v11 = vld [vmem:[%s15485_s4] sm:$0xff] }
   0x5   :  { %11597 = vmatpush3.msra.mxu0 %v13031_v1  ;;  %11603 = vmatprep.subr.mxu1 %v13049_v4  ;;  %v13124_v12 = vld [vmem:[%s15485_s4 + $0x28] sm:$0xff]  ;;  %v13131_v13 = vld [vmem:[%s15485_s4 + $0x20] sm:$0xff]  ;;  %v13150_v18 = vld [vmem:[%s15485_s4 + $0x58] sm:$0xff] }
   0x6   :  { %11599 = vmatmul.mubr.msk.f32.vlgmr.msra.gmra.mxu0 %vm57_vm0, %v13055_v5  ;;  %11604 = vmatpush3.msra.mxu1 %v13049_v4  ;;  %v13157_v19 = vld [vmem:[%s15485_s4 + $0x50] sm:$0xff]  ;;  %v13164_v20 = vld [vmem:[%s15485_s4 + $0x48] sm:$0xff]  ;;  %v13171_v21 = vld [vmem:[%s15485_s4 + $0x40] sm:$0xff] }
   0x7   :  { %11605 = vmatprep.mubr.msk.f32.mxu1 %vm57_vm0, %v13036_v2  ;;  %11622 = vmatprep.subr.mxu1 %v13063_v6  ;;  %v13190_v38 = vld [vmem:[%s15486_s5 + $0x38] sm:$0xff]  ;;  %v13195_v39 = vld [vmem:[%s15486_s5 + $0x30] sm:$0xff]  ;;  %v13202_v40 = vld [vmem:[%s15486_s5 + $0x28] sm:$0xff] }
   0x8   :  { %11606 = vmatmul.mubr.msk.f32.vlgmr.msra.gmra.mxu1 %vm57_vm0, %v13055_v5  ;;  %11608 = vmatprep.subr.mxu0 %v13070_v7  ;;  %v54_v46 = vld [vmem:[%s15487_s1 + $0x8] sm:$0xff]  ;;  %v53_v50 = vld [vmem:[%s15487_s1] sm:$0xff]  ;;  %v56_v55 = vld [vmem:[%s15487_s1 + $0x18] sm:$0xff] }
   0x9   :  { %11623 = vmatpush3.msra.mxu1 %v13063_v6  ;;  %11630 = vmatprep.mubr.msk.f32.mxu1 %vm214_vm1, %v13031_v1  ;;  %v55_v61 = vld [vmem:[%s15487_s1 + $0x10] sm:$0xff] }
   0xa   :  { %11624 = vmatprep.subr.mxu1 %v13081_v8  ;;  %11609 = vmatpush3.msra.mxu0 %v13070_v7 }
   0xb   :  { %11625 = vmatpush3.msra.mxu1 %v13081_v8  ;;  %11610 = vmatprep.subr.mxu0 %v13089_v9 }
   0xc   :  { %11626 = vmatprep.subr.mxu1 %v13095_v10  ;;  %11611 = vmatpush3.msra.mxu0 %v13089_v9 }
   0xd   :  { %11627 = vmatpush3.msra.mxu1 %v13095_v10  ;;  %11612 = vmatprep.subr.mxu0 %v13124_v12 }
   0xe   :  { %11628 = vmatprep.subr.mxu1 %v13105_v11  ;;  %11613 = vmatpush3.msra.mxu0 %v13124_v12 }
   0xf   :  { %11629 = vmatpush3.msra.mxu1 %v13105_v11  ;;  %11614 = vmatprep.subr.mxu0 %v13131_v13 }
  0x10   :  { %11631 = vmatmul.mubr.msk.f32.vlgmr.msra.gmra.mxu1 %vm214_vm1, %v13026_v0  ;;  %11615 = vmatpush3.msra.mxu0 %v13131_v13 }
  0x11   :  { %11633 = vmatprep.mubr.msk.f32.mxu1 %vm214_vm1, %v13049_v4  ;;  %11650 = vmatprep.subr.mxu0 %v13150_v18 }
  0x12   :  { %1317 = vrot.lane.b32.xlu0 %v13026_v0, %s12986_s8  ;;  %1315 = vrot.lane.b32.xlu1 %v13031_v1, %s12986_s8 }
  0x14   :  { %11634 = vmatmul.mubr.msk.f32.gmra.mxu1 %vm214_vm1, %v13044_v3 }
  0x15   :  { %11640 = vmatprep.mubr.msk.f32.mxu1 %vm57_vm0, %v13036_v2 }
  0xc6   :  { %v11600_v14 = vpop.f32.mrf.mxu0 }
  0xc7   :  { %11636 = vmatprep.subr.mxu1 %v11600_v14 }
  0xc8   :  { %v130_v15 = vpop.f32.mrf.mxu0  ;;  %11637 = vmatpush3.msra.mxu1 %v11600_v14  ;;  %v11607_v16 = vpop.f32.mrf.mxu1 }
  0xc9   :  { %11616 = vmatprep.mubr.msk.f32.mxu0 %vm214_vm1, %v130_v15  ;;  %11638 = vmatprep.subr.mxu1 %v130_v15 }
  0xca   :  { %11617 = vmatmul.mubr.msk.f32.vlgmr.msra.gmra.mxu0 %vm214_vm1, %v11600_v14  ;;  %11639 = vmatpush3.msra.mxu1 %v130_v15  ;;  %v205_v17 = vpop.f32.mrf.mxu1 }
  0xcb   :  { %11641 = vmatmul.mubr.msk.f32.vlgmr.msra.gmra.mxu1 %vm57_vm0, %v13055_v5  ;;  %11643 = vmatprep.subr.mxu1 %v11607_v16 }
  0xcc   :  { %11644 = vmatpush3.msra.mxu1 %v11607_v16  ;;  %11619 = vmatprep.mubr.msk.f32.mxu0 %vm214_vm1, %v205_v17 }
  0xcd   :  { %11645 = vmatprep.subr.mxu1 %v205_v17  ;;  %11647 = vmatprep.mubr.msk.f32.mxu1 %vm57_vm0, %v13036_v2 }
  0xce   :  { %11620 = vmatmul.mubr.msk.f32.gmra.mxu0 %vm214_vm1, %v11607_v16  ;;  %11646 = vmatpush3.msra.mxu1 %v205_v17 }
  0xcf   :  { %11648 = vmatmul.mubr.msk.f32.vlgmr.msra.gmra.mxu1 %vm57_vm0, %v13055_v5  ;;  %11651 = vmatpush3.msra.mxu0 %v13150_v18 }
  0xd0   :  { %11668 = vmatprep.mubr.msk.f32.mxu1 %vm57_vm0, %v13036_v2  ;;  %11652 = vmatprep.subr.mxu0 %v13157_v19  ;;  %v11632_v22 = vpop.f32.mrf.mxu1 }
  0xd1   :  { %11653 = vmatpush3.msra.mxu0 %v13157_v19 }
  0xd2   :  { %11654 = vmatprep.subr.mxu0 %v13164_v20  ;;  %v390_v23 = vpop.f32.mrf.mxu1 }
  0xd3   :  { %11655 = vmatpush3.msra.mxu0 %v13164_v20 }
  0xd4   :  { %11656 = vmatprep.subr.mxu0 %v13171_v21  ;;  %v11635_v24 = vpop.f32.mrf.mxu1 }
  0xd5   :  { %11657 = vmatpush3.msra.mxu0 %v13171_v21 }
  0xd6   :  { %v400_v25 = vpop.f32.mrf.mxu1  ;;  %11678 = vmatprep.subr.mxu0 %v13190_v38 }
 0x18a   :  { %v11618_v41 = vpop.f32.mrf.mxu0 }
 0x18b   :  { %v11642_v26 = vpop.f32.mrf.mxu1  ;;  %v396_v45 = vadd.f32 %v11632_v22, %v11618_v41  ;;  %v13264_v41 = vld [vmem:[%s15486_s5 + $0x10] sm:$0xff] }
 0x18c   :  { %v560_v27 = vmul.f32 2.0, %v11642_v26  ;;  %v293_v42 = vpop.f32.mrf.mxu0 }
 0x18d   :  { %v475_v28 = vpop.f32.mrf.mxu1  ;;  %v391_v48 = vadd.f32 %v390_v23, %v293_v42  ;;  %v13275_v42 = vld [vmem:[%s15486_s5 + $0x8] sm:$0xff] }
 0x18e   :  { %v559_v29 = vmul.f32 2.0, %v475_v28  ;;  %v564_v32 = vsub.f32 %v560_v27, %v13026_v0  ;;  %v11621_v43 = vpop.f32.mrf.mxu0 }
 0x18f   :  { %v11649_v30 = vpop.f32.mrf.mxu1  ;;  %v406_v52 = vadd.f32 %v11635_v24, %v11621_v43  ;;  %v13282_v43 = vld [vmem:[%s15486_s5] sm:$0xff] }
 0x190   :  { %v563_v31 = vsub.f32 %v559_v29, %v13031_v1  ;;  %v562_v33 = vmul.f32 2.0, %v11649_v30  ;;  %v303_v44 = vpop.f32.mrf.mxu0 }
 0x191   :  { %v550_v34 = vpop.f32.mrf.mxu1  ;;  %v401_v57 = vadd.f32 %v400_v25, %v303_v44  ;;  %v13299_v44 = vld [vmem:[%s15486_s5 + $0x20] sm:$0xff] }
 0x192   :  { %v561_v35 = vmul.f32 2.0, %v550_v34  ;;  %11658 = vmatprep.mubr.msk.f32.mxu0 %vm214_vm1, %v563_v31  ;;  %v566_v37 = vsub.f32 %v562_v33, %v13044_v3 }
 0x193   :  { %11659 = vmatmul.mubr.msk.f32.vlgmr.msra.gmra.mxu0 %vm214_vm1, %v564_v32 }
 0x194   :  { %v565_v36 = vsub.f32 %v561_v35, %v13049_v4  ;;  %11679 = vmatpush3.msra.mxu0 %v13190_v38 }
 0x195   :  { %11680 = vmatprep.subr.mxu0 %v13195_v39 }
 0x196   :  { %11661 = vmatprep.mubr.msk.f32.mxu0 %vm214_vm1, %v565_v36  ;;  %11681 = vmatpush3.msra.mxu0 %v13195_v39 }
 0x197   :  { %11662 = vmatmul.mubr.msk.f32.gmra.mxu0 %vm214_vm1, %v566_v37  ;;  %11682 = vmatprep.subr.mxu0 %v13202_v40  ;;  %v13257_v37 = vld [vmem:[%s15486_s5 + $0x18] sm:$0xff] }
 0x198   :  { %11683 = vmatpush3.msra.mxu0 %v13202_v40 }
 0x199   :  { %11684 = vmatprep.subr.mxu0 %v13299_v44 }
 0x19a   :  { %11685 = vmatpush3.msra.mxu0 %v13299_v44 }
 0x253   :  { %v11660_v47 = vpop.f32.mrf.mxu0 }
 0x254   :  { %v665_v49 = vadd.f32 %v11660_v47, %v396_v45 }
 0x255   :  { %v645_v51 = vpop.f32.mrf.mxu0 }
 0x256   :  { %v669_v53 = vadd.f32 %v665_v49, %v54_v46  ;;  %v664_v54 = vadd.f32 %v645_v51, %v391_v48  ;;  %v13318_v49 = vld [vmem:[%s15486_s5 + $0x58] sm:$0xff]  ;;  %v13332_v51 = vld [vmem:[%s15486_s5 + $0x48] sm:$0xff] }
 0x257   :  { %v11663_v56 = vpop.f32.mrf.mxu0 }
 0x258   :  { %v10539_v58 = vmul.f32 -1.442695, %v669_v53  ;;  %v668_v59 = vadd.f32 %v664_v54, %v53_v50  ;;  %v667_v60 = vadd.f32 %v11663_v56, %v406_v52  ;;  %v13325_v50 = vld [vmem:[%s15486_s5 + $0x50] sm:$0xff]  ;;  %v13338_v52 = vld [vmem:[%s15486_s5 + $0x40] sm:$0xff] }
 0x259   :  { %v655_v62 = vpop.f32.mrf.mxu0 }
 0x25a   :  { %12716 = vpow2.f32 %v10539_v58  ;;  %v10538_v63 = vmul.f32 -1.442695, %v668_v59  ;;  %v671_v14 = vadd.f32 %v667_v60, %v56_v55  ;;  %v666_v15 = vadd.f32 %v655_v62, %v401_v57 }
 0x25c   :  { %12718 = vpow2.f32 %v10538_v63  ;;  %v10541_v16 = vmul.f32 -1.442695, %v671_v14  ;;  %v670_v17 = vadd.f32 %v666_v15, %v55_v61 }
 0x25e   :  { %12720 = vpow2.f32 %v10541_v16  ;;  %v10540_v22 = vmul.f32 -1.442695, %v670_v17 }
 0x260   :  { %12722 = vpow2.f32 %v10540_v22 }
 0x267   :  { %v12717_v23 = vpop.eup %12716 }
 0x268   :  { %v685_v24 = vadd.f32 1.0, %v12717_v23 }
 0x269   :  { %v12719_v25 = vpop.eup %12718 }
 0x26a   :  { %12724 = vrcp.f32 %v685_v24  ;;  %v684_v26 = vadd.f32 1.0, %v12719_v25 }
 0x26b   :  { %v12721_v27 = vpop.eup %12720 }
 0x26c   :  { %12726 = vrcp.f32 %v684_v26  ;;  %v687_v28 = vadd.f32 1.0, %v12721_v27 }
 0x26d   :  { %v12723_v29 = vpop.eup %12722 }
 0x26e   :  { %12728 = vrcp.f32 %v687_v28  ;;  %v686_v30 = vadd.f32 1.0, %v12723_v29  ;;  %v697_v28 = vld [vmem:[%s15488_s2 + $0x8] sm:$0xff] }
 0x270   :  { %12730 = vrcp.f32 %v686_v30 }
 0x277   :  { %v13220_v31 = vpop.eup %12724 }
 0x278   :  { %v13224_v32 = vmul.f32 %v13220_v31, %v13026_v0 }
 0x279   :  { %v13226_v33 = vpop.eup %12726 }
 0x27a   :  { %11664 = vmatprep.subr.mxu1 %v13224_v32  ;;  %v13231_v34 = vmul.f32 %v13226_v33, %v13031_v1 }
 0x27b   :  { %v13233_v35 = vpop.eup %12728  ;;  %11665 = vmatpush3.msra.mxu1 %v13224_v32 }
 0x27c   :  { %11666 = vmatprep.subr.mxu1 %v13231_v34  ;;  %v13239_v36 = vmul.f32 %v13233_v35, %v13044_v3 }
 0x27d   :  { %v13241_v0 = vpop.eup %12730  ;;  %11667 = vmatpush3.msra.mxu1 %v13231_v34 }
 0x27e   :  { %11669 = vmatmul.mubr.msk.f32.vlgmr.msra.gmra.mxu1 %vm57_vm0, %v13055_v5  ;;  %11671 = vmatprep.subr.mxu1 %v13239_v36  ;;  %v13249_v1 = vmul.f32 %v13241_v0, %v13049_v4 }
 0x27f   :  { %11672 = vmatpush3.msra.mxu1 %v13239_v36  ;;  %11675 = vmatprep.mubr.msk.f32.mxu1 %vm57_vm0, %v13036_v2 }
 0x280   :  { %11673 = vmatprep.subr.mxu1 %v13249_v1 }
 0x281   :  { %11674 = vmatpush3.msra.mxu1 %v13249_v1 }
 0x282   :  { %11676 = vmatmul.mubr.msk.f32.vlgmr.msra.gmra.mxu1 %vm57_vm0, %v13055_v5  ;;  %11692 = vmatprep.subr.mxu1 %v13257_v37 }
 0x283   :  { %11693 = vmatpush3.msra.mxu1 %v13257_v37  ;;  %11700 = vmatprep.mubr.msk.f32.mxu1 %vm214_vm1, %v13231_v34 }
 0x284   :  { %11694 = vmatprep.subr.mxu1 %v13264_v41 }
 0x285   :  { %11695 = vmatpush3.msra.mxu1 %v13264_v41 }
 0x286   :  { %11696 = vmatprep.subr.mxu1 %v13275_v42 }
 0x287   :  { %11697 = vmatpush3.msra.mxu1 %v13275_v42 }
 0x288   :  { %11698 = vmatprep.subr.mxu1 %v13282_v43 }
 0x289   :  { %11699 = vmatpush3.msra.mxu1 %v13282_v43 }
 0x28a   :  { %11701 = vmatmul.mubr.msk.f32.vlgmr.msra.gmra.mxu1 %vm214_vm1, %v13224_v32 }
 0x28b   :  { %11703 = vmatprep.mubr.msk.f32.mxu1 %vm214_vm1, %v13249_v1 }
 0x28e   :  { %11704 = vmatmul.mubr.msk.f32.gmra.mxu1 %vm214_vm1, %v13239_v36 }
 0x28f   :  { %11717 = vmatprep.mubr.msk.f32.mxu1 %vm57_vm0, %v13036_v2 }
 0x33e   :  { %v11670_v45 = vpop.f32.mrf.mxu1 }
 0x33f   :  { %11706 = vmatprep.subr.mxu0 %v11670_v45 }
 0x340   :  { %v770_v46 = vpop.f32.mrf.mxu1 }
 0x341   :  { %11686 = vmatprep.mubr.msk.f32.mxu0 %vm214_vm1, %v770_v46 }
 0x342   :  { %v11677_v47 = vpop.f32.mrf.mxu1  ;;  %11687 = vmatmul.mubr.msk.f32.vlgmr.msra.gmra.mxu0 %vm214_vm1, %v11670_v45 }
 0x343   :  { %11707 = vmatpush3.msra.mxu0 %v11670_v45  ;;  %11713 = vmatprep.subr.mxu1 %v11677_v47 }
 0x344   :  { %11708 = vmatprep.subr.mxu0 %v770_v46  ;;  %v845_v48 = vpop.f32.mrf.mxu1  ;;  %11714 = vmatpush3.msra.mxu1 %v11677_v47 }
 0x345   :  { %11709 = vmatpush3.msra.mxu0 %v770_v46  ;;  %11689 = vmatprep.mubr.msk.f32.mxu0 %vm214_vm1, %v845_v48  ;;  %v699_v46 = vld [vmem:[%s15488_s2 + $0x18] sm:$0xff] }
 0x346   :  { %11715 = vmatprep.subr.mxu1 %v845_v48  ;;  %11690 = vmatmul.mubr.msk.f32.gmra.mxu0 %vm214_vm1, %v11677_v47 }
 0x347   :  { %11716 = vmatpush3.msra.mxu1 %v845_v48  ;;  %11710 = vmatprep.mubr.msk.f32.mxu0 %vm57_vm0, %v13036_v2 }
 0x348   :  { %11718 = vmatmul.mubr.msk.f32.vlgmr.msra.gmra.mxu1 %vm57_vm0, %v13055_v5  ;;  %11720 = vmatprep.subr.mxu0 %v13318_v49 }
 0x349   :  { %11738 = vmatprep.mubr.msk.f32.mxu1 %vm57_vm0, %v13036_v2 }
 0x34a   :  { %11711 = vmatmul.mubr.msk.f32.vlgmr.msra.gmra.mxu0 %vm57_vm0, %v13055_v5  ;;  %v11702_v53 = vpop.f32.mrf.mxu1 }
 0x34b   :  { %11721 = vmatpush3.msra.mxu0 %v13318_v49 }
 0x34c   :  { %11722 = vmatprep.subr.mxu0 %v13325_v50  ;;  %v1029_v54 = vpop.f32.mrf.mxu1 }
 0x34d   :  { %11723 = vmatpush3.msra.mxu0 %v13325_v50 }
 0x34e   :  { %11724 = vmatprep.subr.mxu0 %v13332_v51  ;;  %v11705_v55 = vpop.f32.mrf.mxu1 }
 0x34f   :  { %11725 = vmatpush3.msra.mxu0 %v13332_v51 }
 0x350   :  { %11726 = vmatprep.subr.mxu0 %v13338_v52  ;;  %v1039_v58 = vpop.f32.mrf.mxu1 }
 0x351   :  { %11727 = vmatpush3.msra.mxu0 %v13338_v52 }
 0x352   :  { %11748 = vmatprep.subr.mxu0 %v13070_v7 }
 0x402   :  { %v11688_v56 = vpop.f32.mrf.mxu0 }
 0x403   :  { %v1035_v27 = vadd.f32 %v11702_v53, %v11688_v56 }
 0x404   :  { %v932_v57 = vpop.f32.mrf.mxu0 }
 0x405   :  { %v1030_v30 = vadd.f32 %v1029_v54, %v932_v57 }
 0x406   :  { %v11691_v59 = vpop.f32.mrf.mxu0 }
 0x408   :  { %v11719_v60 = vpop.f32.mrf.mxu1  ;;  %v942_v61 = vpop.f32.mrf.mxu0 }
 0x409   :  { %v1201_v23 = vmul.f32 2.0, %v11719_v60  ;;  %v1040_v48 = vadd.f32 %v1039_v58, %v942_v61 }
 0x40a   :  { %v1189_v62 = vpop.f32.mrf.mxu1  ;;  %v11712_v63 = vpop.f32.mrf.mxu0 }
 0x40b   :  { %v1199_v14 = vmul.f32 2.0, %v11712_v63  ;;  %v1200_v16 = vmul.f32 2.0, %v1189_v62  ;;  %v1205_v26 = vsub.f32 %v1201_v23, %v13239_v36  ;;  %v1045_v36 = vadd.f32 %v11705_v55, %v11691_v59  ;;  %v698_v62 = vld [vmem:[%s15488_s2 + $0x10] sm:$0xff] }
 0x40c   :  { %v1114_v15 = vpop.f32.mrf.mxu0 }
 0x40d   :  { %v1198_v17 = vmul.f32 2.0, %v1114_v15  ;;  %v1203_v24 = vsub.f32 %v1199_v14, %v13224_v32  ;;  %v1204_v25 = vsub.f32 %v1200_v16, %v13249_v1  ;;  %v1318_v14 = vpop.permute.xlu0 %1317  ;;  %v1316_v15 = vpop.permute.xlu1 %1315  ;;  %v1332_v16 = vsub.f32 1.0, %v13220_v31 }
 0x40f   :  { %v1202_v22 = vsub.f32 %v1198_v17, %v13231_v34 }
 0x411   :  { %11728 = vmatprep.mubr.msk.f32.mxu0 %vm214_vm1, %v1202_v22  ;;  %v1328_v22 = vmul.f32 %v13220_v31, %v1318_v14 }
 0x412   :  { %11729 = vmatmul.mubr.msk.f32.vlgmr.msra.gmra.mxu0 %vm214_vm1, %v1203_v24  ;;  %v1331_v24 = vsub.f32 1.0, %v13226_v33 }
 0x413   :  { %11731 = vmatprep.mubr.msk.f32.mxu0 %vm214_vm1, %v1204_v25  ;;  %11749 = vmatpush3.msra.mxu0 %v13070_v7  ;;  %v1327_v25 = vmul.f32 %v13226_v33, %v1316_v15 }
 0x414   :  { %11750 = vmatprep.subr.mxu0 %v13089_v9 }
 0x415   :  { %11751 = vmatpush3.msra.mxu0 %v13089_v9  ;;  %v696_v9 = vld [vmem:[%s15488_s2] sm:$0xff] }
 0x416   :  { %11732 = vmatmul.mubr.msk.f32.gmra.mxu0 %vm214_vm1, %v1205_v26  ;;  %11752 = vmatprep.subr.mxu0 %v13124_v12 }
 0x417   :  { %11753 = vmatpush3.msra.mxu0 %v13124_v12 }
 0x418   :  { %11754 = vmatprep.subr.mxu0 %v13131_v13 }
 0x419   :  { %11755 = vmatpush3.msra.mxu0 %v13131_v13 }
 0x4d2   :  { %v11730_v29 = vpop.f32.mrf.mxu0 }
 0x4d3   :  { %v1304_v32 = vadd.f32 %v11730_v29, %v1035_v27  ;;  %v1334_v29 = vsub.f32 1.0, %v13233_v35 }
 0x4d4   :  { %v1284_v34 = vpop.f32.mrf.mxu0 }
 0x4d5   :  { %v1308_v1 = vadd.f32 %v1304_v32, %v697_v28  ;;  %v1303_v45 = vadd.f32 %v1284_v34, %v1030_v30  ;;  %v1333_v34 = vsub.f32 1.0, %v13241_v0 }
 0x4d6   :  { %v11733_v47 = vpop.f32.mrf.mxu0 }
 0x4d7   :  { %12732 = vtanh.f32 %v1308_v1  ;;  %v1307_v53 = vadd.f32 %v1303_v45, %v696_v9  ;;  %v1306_v56 = vadd.f32 %v11733_v47, %v1045_v36 }
 0x4d8   :  { %v1294_v60 = vpop.f32.mrf.mxu0 }
 0x4d9   :  { %12734 = vtanh.f32 %v1307_v53  ;;  %v1310_v54 = vadd.f32 %v1306_v56, %v699_v46  ;;  %v1305_v57 = vadd.f32 %v1294_v60, %v1040_v48 }
 0x4db   :  { %12736 = vtanh.f32 %v1310_v54  ;;  %v1309_v55 = vadd.f32 %v1305_v57, %v698_v62 }
 0x4dd   :  { %12738 = vtanh.f32 %v1309_v55 }
 0x4e4   :  { %v12733_v59 = vpop.eup %12732 }
 0x4e5   :  { %1341 = vrot.lane.b32.xlu0 %v12733_v59, %s12986_s8 }
 0x4e6   :  { %v12735_v63 = vpop.eup %12734 }
 0x4e7   :  { %1339 = vrot.lane.b32.xlu1 %v12735_v63, %s12986_s8 }
 0x4e8   :  { %v12737_v58 = vpop.eup %12736 }
 0x4e9   :  { %1321 = vrot.lane.b32.xlu0 %v13044_v3, %s12986_s8 }
 0x4ea   :  { %v12739_v61 = vpop.eup %12738 }
 0x4eb   :  { %1345 = vrot.lane.b32.xlu1 %v12737_v58, %s12986_s8 }
 0x4ed   :  { %1319 = vrot.lane.b32.xlu0 %v13049_v4, %s12986_s8 }
 0x4ef   :  { %1343 = vrot.lane.b32.xlu1 %v12739_v61, %s12986_s8 }
 0x557   :  { %v1342_v17 = vpop.permute.xlu0 %1341 }
 0x558   :  { %v1352_v23 = vmul.f32 %v1342_v17, %v1332_v16 }
 0x559   :  { %v1340_v3 = vpop.permute.xlu1 %1339 }
 0x55a   :  { %v13383_v26 = vadd.f32 %v1352_v23, %v1328_v22  ;;  %v1351_v27 = vmul.f32 %v1340_v3, %v1331_v24 }
 0x55b   :  { %v1322_v4 = vpop.permute.xlu0 %1321 }
 0x55c   :  { %v13385_v28 = vadd.f32 %v1351_v27, %v1327_v25  ;;  %1365 = vrot.lane.b32.xlu0 %v13383_v26, %s12987_s24  ;;  %v1330_v31 = vmul.f32 %v13233_v35, %v1322_v4 }
 0x55d   :  { %v1346_v30 = vpop.permute.xlu1 %1345 }
 0x55e   :  { %v1354_v32 = vmul.f32 %v1346_v30, %v1334_v29  ;;  %1363 = vrot.lane.b32.xlu1 %v13385_v28, %s12987_s24  ;;  %v10565_v30 = vld [vmem:[%s15487_s1 + $0x38] sm:$0xff] }
 0x55f   :  { %v1320_v33 = vpop.permute.xlu0 %1319 }
 0x560   :  { %v13393_v9 = vadd.f32 %v1354_v32, %v1330_v31  ;;  %v1329_v1 = vmul.f32 %v13241_v0, %v1320_v33 }
 0x561   :  { %v1344_v36 = vpop.permute.xlu1 %1343 }
 0x562   :  { %v1353_v45 = vmul.f32 %v1344_v36, %v1333_v34  ;;  %1369 = vrot.lane.b32.xlu0 %v13393_v9, %s12987_s24 }
 0x564   :  { %v13399_v46 = vadd.f32 %v1353_v45, %v1329_v1  ;;  %v10564_v1 = vld [vmem:[%s15487_s1 + $0x30] sm:$0xff] }
 0x566   :  { %1367 = vrot.lane.b32.xlu1 %v13399_v46, %s12987_s24 }
 0x5ce   :  { %v13403_v35 = vpop.permute.xlu0 %1365 }
 0x5cf   :  { %1376 = vst.msk [vmem:[%s15489_s6 + $0x8] sm:$0xff] %vm214_vm1, %v13403_v35  ;;  %11734 = vmatprep.subr.mxu1 %v13403_v35 }
 0x5d0   :  { %11735 = vmatpush3.msra.mxu1 %v13403_v35  ;;  %v13412_v0 = vpop.permute.xlu1 %1363 }
 0x5d1   :  { %1375 = vst.msk [vmem:[%s15489_s6] sm:$0xff] %vm214_vm1, %v13412_v0  ;;  %11736 = vmatprep.subr.mxu1 %v13412_v0 }
 0x5d2   :  { %11737 = vmatpush3.msra.mxu1 %v13412_v0 }
 0x5d3   :  { %11739 = vmatmul.mubr.msk.f32.vlgmr.msra.gmra.mxu1 %vm57_vm0, %v13055_v5 }
 0x5d4   :  { %v13423_v47 = vpop.permute.xlu0 %1369  ;;  %11745 = vmatprep.mubr.msk.f32.mxu1 %vm57_vm0, %v13036_v2 }
 0x5d5   :  { %1378 = vst.msk [vmem:[%s15489_s6 + $0x18] sm:$0xff] %vm214_vm1, %v13423_v47  ;;  %11741 = vmatprep.subr.mxu1 %v13423_v47 }
 0x5d6   :  { %11742 = vmatpush3.msra.mxu1 %v13423_v47 }
 0x5d8   :  { %v13434_v48 = vpop.permute.xlu1 %1367 }
 0x5d9   :  { %1377 = vst.msk [vmem:[%s15489_s6 + $0x10] sm:$0xff] %vm214_vm1, %v13434_v48  ;;  %11743 = vmatprep.subr.mxu1 %v13434_v48 }
 0x5da   :  { %11744 = vmatpush3.msra.mxu1 %v13434_v48 }
 0x5db   :  { %11746 = vmatmul.mubr.msk.f32.vlgmr.msra.gmra.mxu1 %vm57_vm0, %v13055_v5  ;;  %11762 = vmatprep.subr.mxu1 %v13063_v6 }
 0x5dc   :  { %11763 = vmatpush3.msra.mxu1 %v13063_v6  ;;  %11770 = vmatprep.mubr.msk.f32.mxu1 %vm214_vm1, %v13412_v0 }
 0x5dd   :  { %11764 = vmatprep.subr.mxu1 %v13081_v8 }
 0x5de   :  { %11765 = vmatpush3.msra.mxu1 %v13081_v8 }
 0x5df   :  { %11766 = vmatprep.subr.mxu1 %v13095_v10 }
 0x5e0   :  { %11767 = vmatpush3.msra.mxu1 %v13095_v10 }
 0x5e1   :  { %11768 = vmatprep.subr.mxu1 %v13105_v11 }
 0x5e2   :  { %11769 = vmatpush3.msra.mxu1 %v13105_v11 }
 0x5e3   :  { %11771 = vmatmul.mubr.msk.f32.vlgmr.msra.gmra.mxu1 %vm214_vm1, %v13403_v35 }
 0x5e4   :  { %11773 = vmatprep.mubr.msk.f32.mxu1 %vm214_vm1, %v13434_v48 }
 0x5e7   :  { %11774 = vmatmul.mubr.msk.f32.gmra.mxu1 %vm214_vm1, %v13423_v47 }
 0x5e8   :  { %11787 = vmatprep.mubr.msk.f32.mxu1 %vm57_vm0, %v13036_v2 }
 0x693   :  { %v11740_v6 = vpop.f32.mrf.mxu1 }
 0x694   :  { %11776 = vmatprep.subr.mxu0 %v11740_v6 }
 0x695   :  { %v1450_v8 = vpop.f32.mrf.mxu1 }
 0x696   :  { %11756 = vmatprep.mubr.msk.f32.mxu0 %vm214_vm1, %v1450_v8 }
 0x697   :  { %11757 = vmatmul.mubr.msk.f32.vlgmr.msra.gmra.mxu0 %vm214_vm1, %v11740_v6 }
 0x698   :  { %11777 = vmatpush3.msra.mxu0 %v11740_v6 }
 0x699   :  { %11778 = vmatprep.subr.mxu0 %v1450_v8 }
 0x69a   :  { %11779 = vmatpush3.msra.mxu0 %v1450_v8 }
 0x69b   :  { %v11747_v10 = vpop.f32.mrf.mxu1  ;;  %11790 = vmatprep.subr.mxu0 %v13150_v18 }
 0x69c   :  { %11783 = vmatprep.subr.mxu1 %v11747_v10 }
 0x69d   :  { %v1525_v11 = vpop.f32.mrf.mxu1  ;;  %11784 = vmatpush3.msra.mxu1 %v11747_v10 }
 0x69e   :  { %11759 = vmatprep.mubr.msk.f32.mxu0 %vm214_vm1, %v1525_v11  ;;  %11785 = vmatprep.subr.mxu1 %v1525_v11 }
 0x69f   :  { %11760 = vmatmul.mubr.msk.f32.gmra.mxu0 %vm214_vm1, %v11747_v10  ;;  %11786 = vmatpush3.msra.mxu1 %v1525_v11 }
 0x6a0   :  { %11788 = vmatmul.mubr.msk.f32.vlgmr.msra.gmra.mxu1 %vm57_vm0, %v13055_v5  ;;  %11780 = vmatprep.mubr.msk.f32.mxu0 %vm57_vm0, %v13036_v2 }
 0x6a1   :  { %11808 = vmatprep.mubr.msk.f32.mxu1 %vm57_vm0, %v13036_v2 }
 0x6a3   :  { %11781 = vmatmul.mubr.msk.f32.vlgmr.msra.gmra.mxu0 %vm57_vm0, %v13055_v5  ;;  %v11772_v53 = vpop.f32.mrf.mxu1 }
 0x6a4   :  { %11791 = vmatpush3.msra.mxu0 %v13150_v18 }
 0x6a5   :  { %11792 = vmatprep.subr.mxu0 %v13157_v19  ;;  %v1705_v56 = vpop.f32.mrf.mxu1 }
 0x6a6   :  { %11793 = vmatpush3.msra.mxu0 %v13157_v19 }
 0x6a7   :  { %11794 = vmatprep.subr.mxu0 %v13164_v20  ;;  %v11775_v54 = vpop.f32.mrf.mxu1 }
 0x6a8   :  { %11795 = vmatpush3.msra.mxu0 %v13164_v20 }
 0x6a9   :  { %11796 = vmatprep.subr.mxu0 %v13171_v21  ;;  %v1715_v18 = vpop.f32.mrf.mxu1 }
 0x6aa   :  { %11797 = vmatpush3.msra.mxu0 %v13171_v21 }
 0x6ab   :  { %11818 = vmatprep.subr.mxu0 %v13190_v38 }
 0x757   :  { %v11758_v60 = vpop.f32.mrf.mxu0 }
 0x758   :  { %v1711_v23 = vadd.f32 %v11772_v53, %v11758_v60 }
 0x759   :  { %v1612_v57 = vpop.f32.mrf.mxu0 }
 0x75a   :  { %v1706_v3 = vadd.f32 %v1705_v56, %v1612_v57 }
 0x75f   :  { %v11761_v62 = vpop.f32.mrf.mxu0 }
 0x760   :  { %v11789_v55 = vpop.f32.mrf.mxu1  ;;  %v1721_v4 = vadd.f32 %v11775_v54, %v11761_v62 }
 0x761   :  { %v1622_v59 = vpop.f32.mrf.mxu0  ;;  %v1877_v21 = vmul.f32 2.0, %v11789_v55 }
 0x762   :  { %v1865_v19 = vpop.f32.mrf.mxu1  ;;  %v1716_v32 = vadd.f32 %v1715_v18, %v1622_v59 }
 0x763   :  { %v11782_v63 = vpop.f32.mrf.mxu0  ;;  %v1876_v20 = vmul.f32 2.0, %v1865_v19  ;;  %v1881_v22 = vsub.f32 %v1877_v21, %v13423_v47 }
 0x764   :  { %v1875_v58 = vmul.f32 2.0, %v11782_v63 }
 0x765   :  { %v1790_v61 = vpop.f32.mrf.mxu0  ;;  %v1880_v17 = vsub.f32 %v1876_v20, %v13434_v48 }
 0x766   :  { %v1874_v14 = vmul.f32 2.0, %v1790_v61  ;;  %v1879_v16 = vsub.f32 %v1875_v58, %v13403_v35 }
 0x768   :  { %v1878_v15 = vsub.f32 %v1874_v14, %v13412_v0 }
 0x76a   :  { %11798 = vmatprep.mubr.msk.f32.mxu0 %vm214_vm1, %v1878_v15 }
 0x76b   :  { %11799 = vmatmul.mubr.msk.f32.vlgmr.msra.gmra.mxu0 %vm214_vm1, %v1879_v16 }
 0x76c   :  { %11801 = vmatprep.mubr.msk.f32.mxu0 %vm214_vm1, %v1880_v17  ;;  %11819 = vmatpush3.msra.mxu0 %v13190_v38  ;;  %v10563_v38 = vld [vmem:[%s15487_s1 + $0x28] sm:$0xff] }
 0x76d   :  { %11820 = vmatprep.subr.mxu0 %v13195_v39 }
 0x76e   :  { %11821 = vmatpush3.msra.mxu0 %v13195_v39  ;;  %v10562_v39 = vld [vmem:[%s15487_s1 + $0x20] sm:$0xff] }
 0x76f   :  { %11802 = vmatmul.mubr.msk.f32.gmra.mxu0 %vm214_vm1, %v1881_v22  ;;  %11822 = vmatprep.subr.mxu0 %v13202_v40 }
 0x770   :  { %11823 = vmatpush3.msra.mxu0 %v13202_v40 }
 0x771   :  { %11824 = vmatprep.subr.mxu0 %v13299_v44 }
 0x772   :  { %11825 = vmatpush3.msra.mxu0 %v13299_v44 }
 0x82b   :  { %v11800_v24 = vpop.f32.mrf.mxu0 }
 0x82c   :  { %v1980_v25 = vadd.f32 %v11800_v24, %v1711_v23 }
 0x82d   :  { %v1960_v27 = vpop.f32.mrf.mxu0 }
 0x82e   :  { %v1984_v29 = vadd.f32 %v10563_v38, %v1980_v25  ;;  %v1979_v40 = vadd.f32 %v1960_v27, %v1706_v3  ;;  %v13597_v27 = vld [vmem:[%s15485_s4 + $0x38] sm:$0xff] }
 0x82f   :  { %v11803_v31 = vpop.f32.mrf.mxu0 }
 0x830   :  { %v10587_v33 = vmul.f32 -1.442695, %v1984_v29  ;;  %v1983_v34 = vadd.f32 %v10562_v39, %v1979_v40  ;;  %v1982_v36 = vadd.f32 %v11803_v31, %v1721_v4  ;;  %v13604_v29 = vld [vmem:[%s15485_s4 + $0x30] sm:$0xff] }
 0x831   :  { %v1970_v45 = vpop.f32.mrf.mxu0 }
 0x832   :  { %12740 = vpow2.f32 %v10587_v33  ;;  %v10586_v6 = vmul.f32 -1.442695, %v1983_v34  ;;  %v1986_v8 = vadd.f32 %v10565_v30, %v1982_v36  ;;  %v1981_v10 = vadd.f32 %v1970_v45, %v1716_v32  ;;  %v10591_v30 = vld [vmem:[%s15488_s2 + $0x28] sm:$0xff]  ;;  %v10590_v34 = vld [vmem:[%s15488_s2 + $0x20] sm:$0xff] }
 0x834   :  { %12742 = vpow2.f32 %v10586_v6  ;;  %v10589_v11 = vmul.f32 -1.442695, %v1986_v8  ;;  %v1985_v53 = vadd.f32 %v10564_v1, %v1981_v10 }
 0x836   :  { %12744 = vpow2.f32 %v10589_v11  ;;  %v10588_v56 = vmul.f32 -1.442695, %v1985_v53  ;;  %v10592_v53 = vld [vmem:[%s15488_s2 + $0x30] sm:$0xff] }
 0x838   :  { %12746 = vpow2.f32 %v10588_v56 }
 0x83f   :  { %v12741_v60 = vpop.eup %12740 }
 0x840   :  { %v2000_v54 = vadd.f32 1.0, %v12741_v60 }
 0x841   :  { %v12743_v57 = vpop.eup %12742 }
 0x842   :  { %12748 = vrcp.f32 %v2000_v54  ;;  %v1999_v18 = vadd.f32 1.0, %v12743_v57 }
 0x843   :  { %v12745_v62 = vpop.eup %12744 }
 0x844   :  { %12750 = vrcp.f32 %v1999_v18  ;;  %v2002_v55 = vadd.f32 1.0, %v12745_v62 }
 0x845   :  { %v12747_v59 = vpop.eup %12746 }
 0x846   :  { %12752 = vrcp.f32 %v2002_v55  ;;  %v2001_v19 = vadd.f32 1.0, %v12747_v59 }
 0x848   :  { %12754 = vrcp.f32 %v2001_v19 }
 0x84f   :  { %v13511_v63 = vpop.eup %12748 }
 0x850   :  { %v13515_v58 = vmul.f32 %v13511_v63, %v13403_v35  ;;  %v2636_v19 = vsub.f32 1.0, %v13511_v63 }
 0x851   :  { %v13517_v61 = vpop.eup %12750 }
 0x852   :  { %11804 = vmatprep.subr.mxu1 %v13515_v58  ;;  %v13522_v20 = vmul.f32 %v13517_v61, %v13412_v0 }
 0x853   :  { %v13524_v14 = vpop.eup %12752  ;;  %11805 = vmatpush3.msra.mxu1 %v13515_v58 }
 0x854   :  { %11806 = vmatprep.subr.mxu1 %v13522_v20  ;;  %v13530_v15 = vmul.f32 %v13524_v14, %v13423_v47 }
 0x855   :  { %v13532_v35 = vpop.eup %12754  ;;  %11807 = vmatpush3.msra.mxu1 %v13522_v20 }
 0x856   :  { %11809 = vmatmul.mubr.msk.f32.vlgmr.msra.gmra.mxu1 %vm57_vm0, %v13055_v5  ;;  %11811 = vmatprep.subr.mxu1 %v13530_v15  ;;  %v13540_v0 = vmul.f32 %v13532_v35, %v13434_v48 }
 0x857   :  { %11812 = vmatpush3.msra.mxu1 %v13530_v15  ;;  %11815 = vmatprep.mubr.msk.f32.mxu1 %vm57_vm0, %v13036_v2 }
 0x858   :  { %11813 = vmatprep.subr.mxu1 %v13540_v0 }
 0x859   :  { %11814 = vmatpush3.msra.mxu1 %v13540_v0 }
 0x85a   :  { %11816 = vmatmul.mubr.msk.f32.vlgmr.msra.gmra.mxu1 %vm57_vm0, %v13055_v5  ;;  %11832 = vmatprep.subr.mxu1 %v13257_v37 }
 0x85b   :  { %11833 = vmatpush3.msra.mxu1 %v13257_v37  ;;  %11840 = vmatprep.mubr.msk.f32.mxu1 %vm214_vm1, %v13522_v20 }
 0x85c   :  { %11834 = vmatprep.subr.mxu1 %v13264_v41 }
 0x85d   :  { %11835 = vmatpush3.msra.mxu1 %v13264_v41 }
 0x85e   :  { %11836 = vmatprep.subr.mxu1 %v13275_v42 }
 0x85f   :  { %11837 = vmatpush3.msra.mxu1 %v13275_v42 }
 0x860   :  { %11838 = vmatprep.subr.mxu1 %v13282_v43 }
 0x861   :  { %11839 = vmatpush3.msra.mxu1 %v13282_v43 }
 0x862   :  { %11841 = vmatmul.mubr.msk.f32.vlgmr.msra.gmra.mxu1 %vm214_vm1, %v13515_v58 }
 0x863   :  { %11843 = vmatprep.mubr.msk.f32.mxu1 %vm214_vm1, %v13540_v0 }
 0x866   :  { %11844 = vmatmul.mubr.msk.f32.gmra.mxu1 %vm214_vm1, %v13530_v15 }
 0x867   :  { %11857 = vmatprep.mubr.msk.f32.mxu1 %vm57_vm0, %v13036_v2 }
 0x916   :  { %v11810_v37 = vpop.f32.mrf.mxu1 }
 0x917   :  { %11846 = vmatprep.subr.mxu0 %v11810_v37 }
 0x918   :  { %v2086_v41 = vpop.f32.mrf.mxu1 }
 0x919   :  { %11826 = vmatprep.mubr.msk.f32.mxu0 %vm214_vm1, %v2086_v41 }
 0x91a   :  { %v11817_v42 = vpop.f32.mrf.mxu1  ;;  %11827 = vmatmul.mubr.msk.f32.vlgmr.msra.gmra.mxu0 %vm214_vm1, %v11810_v37 }
 0x91b   :  { %11847 = vmatpush3.msra.mxu0 %v11810_v37  ;;  %11853 = vmatprep.subr.mxu1 %v11817_v42 }
 0x91c   :  { %11848 = vmatprep.subr.mxu0 %v2086_v41  ;;  %v2161_v43 = vpop.f32.mrf.mxu1  ;;  %11854 = vmatpush3.msra.mxu1 %v11817_v42 }
 0x91d   :  { %11849 = vmatpush3.msra.mxu0 %v2086_v41  ;;  %11829 = vmatprep.mubr.msk.f32.mxu0 %vm214_vm1, %v2161_v43 }
 0x91e   :  { %11855 = vmatprep.subr.mxu1 %v2161_v43  ;;  %11830 = vmatmul.mubr.msk.f32.gmra.mxu0 %vm214_vm1, %v11817_v42  ;;  %v2631_v42 = vmul.f32 %v13517_v61, %v13385_v28  ;;  %v2633_v28 = vmul.f32 %v13532_v35, %v13399_v46 }
 0x91f   :  { %11856 = vmatpush3.msra.mxu1 %v2161_v43  ;;  %11850 = vmatprep.mubr.msk.f32.mxu0 %vm57_vm0, %v13036_v2 }
 0x920   :  { %11858 = vmatmul.mubr.msk.f32.vlgmr.msra.gmra.mxu1 %vm57_vm0, %v13055_v5  ;;  %11860 = vmatprep.subr.mxu0 %v13318_v49 }
 0x921   :  { %11878 = vmatprep.mubr.msk.f32.mxu1 %vm57_vm0, %v13036_v2 }
 0x922   :  { %11851 = vmatmul.mubr.msk.f32.vlgmr.msra.gmra.mxu0 %vm57_vm0, %v13055_v5  ;;  %v11842_v2 = vpop.f32.mrf.mxu1 }
 0x923   :  { %11861 = vmatpush3.msra.mxu0 %v13318_v49 }
 0x924   :  { %11862 = vmatprep.subr.mxu0 %v13325_v50  ;;  %v2345_v47 = vpop.f32.mrf.mxu1 }
 0x925   :  { %11863 = vmatpush3.msra.mxu0 %v13325_v50 }
 0x926   :  { %11864 = vmatprep.subr.mxu0 %v13332_v51  ;;  %v11845_v48 = vpop.f32.mrf.mxu1 }
 0x927   :  { %11865 = vmatpush3.msra.mxu0 %v13332_v51 }
 0x928   :  { %11866 = vmatprep.subr.mxu0 %v13338_v52  ;;  %v2355_v49 = vpop.f32.mrf.mxu1 }
 0x929   :  { %11867 = vmatpush3.msra.mxu0 %v13338_v52 }
 0x92a   :  { %11888 = vmatprep.subr.mxu0 %v13070_v7 }
 0x9da   :  { %v11828_v5 = vpop.f32.mrf.mxu0 }
 0x9db   :  { %v2351_v40 = vadd.f32 %v11842_v2, %v11828_v5  ;;  %v2638_v2 = vsub.f32 1.0, %v13524_v14  ;;  %v2634_v5 = vmul.f32 %v13524_v14, %v13393_v9 }
 0x9dc   :  { %v2248_v21 = vpop.f32.mrf.mxu0 }
 0x9dd   :  { %v2346_v32 = vadd.f32 %v2345_v47, %v2248_v21 }
 0x9de   :  { %v11831_v16 = vpop.f32.mrf.mxu0 }
 0x9df   :  { %v2361_v1 = vadd.f32 %v11845_v48, %v11831_v16 }
 0x9e0   :  { %v11859_v17 = vpop.f32.mrf.mxu1  ;;  %v2258_v22 = vpop.f32.mrf.mxu0 }
 0x9e1   :  { %v2517_v52 = vmul.f32 2.0, %v11859_v17  ;;  %v2356_v8 = vadd.f32 %v2355_v49, %v2258_v22  ;;  %v13696_v22 = vld [vmem:[%s15484_s0] sm:$0xff] }
 0x9e2   :  { %v2505_v50 = vpop.f32.mrf.mxu1  ;;  %v11852_v23 = vpop.f32.mrf.mxu0 }
 0x9e3   :  { %v2515_v38 = vmul.f32 2.0, %v11852_v23  ;;  %v2516_v51 = vmul.f32 2.0, %v2505_v50  ;;  %v2521_v4 = vsub.f32 %v2517_v52, %v13530_v15  ;;  %v13712_v50 = vld [vmem:[%s15485_s4 + $0x18] sm:$0xff]  ;;  %v13721_v23 = vld [vmem:[%s15485_s4 + $0x10] sm:$0xff] }
 0x9e4   :  { %v2430_v24 = vpop.f32.mrf.mxu0 }
 0x9e5   :  { %v2514_v3 = vmul.f32 2.0, %v2430_v24  ;;  %v2519_v7 = vsub.f32 %v2515_v38, %v13515_v58  ;;  %v2520_v39 = vsub.f32 %v2516_v51, %v13540_v0  ;;  %v2635_v0 = vsub.f32 1.0, %v13517_v61  ;;  %v13728_v38 = vld [vmem:[%s15485_s4 + $0x8] sm:$0xff]  ;;  %v13735_v24 = vld [vmem:[%s15485_s4] sm:$0xff] }
 0x9e7   :  { %v2518_v25 = vsub.f32 %v2514_v3, %v13522_v20  ;;  %v2632_v20 = vmul.f32 %v13511_v63, %v13383_v26  ;;  %v2637_v26 = vsub.f32 1.0, %v13532_v35  ;;  %v13685_v35 = vld [vmem:[%s15484_s0 + $0x8] sm:$0xff] }
 0x9e9   :  { %11868 = vmatprep.mubr.msk.f32.mxu0 %vm214_vm1, %v2518_v25 }
 0x9ea   :  { %11869 = vmatmul.mubr.msk.f32.vlgmr.msra.gmra.mxu0 %vm214_vm1, %v2519_v7  ;;  %v13758_v7 = vld [vmem:[%s15485_s4 + $0x58] sm:$0xff] }
 0x9eb   :  { %11871 = vmatprep.mubr.msk.f32.mxu0 %vm214_vm1, %v2520_v39  ;;  %11889 = vmatpush3.msra.mxu0 %v13597_v27  ;;  %v13769_v39 = vld [vmem:[%s15485_s4 + $0x50] sm:$0xff] }
 0x9ec   :  { %11890 = vmatprep.subr.mxu0 %v13604_v29 }
 0x9ed   :  { %11891 = vmatpush3.msra.mxu0 %v13604_v29 }
 0x9ee   :  { %11872 = vmatmul.mubr.msk.f32.gmra.mxu0 %vm214_vm1, %v2521_v4  ;;  %11892 = vmatprep.subr.mxu0 %v13124_v12  ;;  %v13776_v4 = vld [vmem:[%s15485_s4 + $0x48] sm:$0xff] }
 0x9ef   :  { %11893 = vmatpush3.msra.mxu0 %v13124_v12 }
 0x9f0   :  { %11894 = vmatprep.subr.mxu0 %v13131_v13 }
 0x9f1   :  { %11895 = vmatpush3.msra.mxu0 %v13131_v13  ;;  %v10593_v13 = vld [vmem:[%s15488_s2 + $0x38] sm:$0xff] }
 0xaaa   :  { %v11870_v31 = vpop.f32.mrf.mxu0 }
 0xaab   :  { %v2620_v33 = vadd.f32 %v11870_v31, %v2351_v40  ;;  %v13783_v40 = vld [vmem:[%s15485_s4 + $0x40] sm:$0xff] }
 0xaac   :  { %v2600_v36 = vpop.f32.mrf.mxu0 }
 0xaad   :  { %v2624_v45 = vadd.f32 %v10591_v30, %v2620_v33  ;;  %v2619_v12 = vadd.f32 %v2600_v36, %v2346_v32  ;;  %v13790_v30 = vld [vmem:[%s15486_s5 + $0x38] sm:$0xff] }
 0xaae   :  { %v11873_v6 = vpop.f32.mrf.mxu0 }
 0xaaf   :  { %12756 = vtanh.f32 %v2624_v45  ;;  %v2623_v10 = vadd.f32 %v10590_v34, %v2619_v12  ;;  %v2622_v11 = vadd.f32 %v11873_v6, %v2361_v1 }
 0xab0   :  { %v2610_v56 = vpop.f32.mrf.mxu0 }
 0xab1   :  { %12758 = vtanh.f32 %v2623_v10  ;;  %v2626_v60 = vadd.f32 %v10593_v13, %v2622_v11  ;;  %v2621_v54 = vadd.f32 %v2610_v56, %v2356_v8 }
 0xab3   :  { %12760 = vtanh.f32 %v2626_v60  ;;  %v2625_v57 = vadd.f32 %v10592_v53, %v2621_v54 }
 0xab5   :  { %12762 = vtanh.f32 %v2625_v57 }
 0xabc   :  { %v12757_v18 = vpop.eup %12756 }
 0xabd   :  { %2645 = vrot.lane.b32.xlu0 %v12757_v18, %s12986_s8 }
 0xabe   :  { %v12759_v62 = vpop.eup %12758 }
 0xabf   :  { %2643 = vrot.lane.b32.xlu1 %v12759_v62, %s12986_s8 }
 0xac0   :  { %v12761_v55 = vpop.eup %12760 }
 0xac1   :  { %2649 = vrot.lane.b32.xlu0 %v12761_v55, %s12986_s8  ;;  %v13804_v55 = vld [vmem:[%s15486_s5 + $0x30] sm:$0xff] }
 0xac2   :  { %v12763_v59 = vpop.eup %12762 }
 0xac3   :  { %2647 = vrot.lane.b32.xlu1 %v12763_v59, %s12986_s8  ;;  %v13812_v59 = vld [vmem:[%s15486_s5 + $0x28] sm:$0xff] }
 0xb2f   :  { %v2646_v58 = vpop.permute.xlu0 %2645 }
 0xb30   :  { %v2656_v15 = vmul.f32 %v2646_v58, %v2636_v19  ;;  %v10619_v58 = vld [vmem:[%s15487_s1 + $0x48] sm:$0xff] }
 0xb31   :  { %v2644_v37 = vpop.permute.xlu1 %2643 }
 0xb32   :  { %v13633_v41 = vadd.f32 %v2656_v15, %v2632_v20  ;;  %v2655_v43 = vmul.f32 %v2644_v37, %v2635_v0  ;;  %v10618_v37 = vld [vmem:[%s15487_s1 + $0x40] sm:$0xff] }
 0xb33   :  { %v2650_v47 = vpop.permute.xlu0 %2649 }
 0xb34   :  { %v13638_v48 = vadd.f32 %v2655_v43, %v2631_v42  ;;  %v2658_v21 = vmul.f32 %v2650_v47, %v2638_v2  ;;  %2669 = vrot.lane.b32.xlu0 %v13633_v41, %s12987_s24 }
 0xb35   :  { %v2648_v63 = vpop.permute.xlu1 %2647 }
 0xb36   :  { %v13645_v49 = vadd.f32 %v2658_v21, %v2634_v5  ;;  %v2657_v61 = vmul.f32 %v2648_v63, %v2637_v26  ;;  %2667 = vrot.lane.b32.xlu1 %v13638_v48, %s12987_s24 }
 0xb38   :  { %v13651_v16 = vadd.f32 %v2657_v61, %v2633_v28  ;;  %2673 = vrot.lane.b32.xlu0 %v13645_v49, %s12987_s24  ;;  %v10620_v61 = vld [vmem:[%s15487_s1 + $0x50] sm:$0xff] }
 0xb3a   :  { %2671 = vrot.lane.b32.xlu1 %v13651_v16, %s12987_s24 }
 0xba6   :  { %v13657_v9 = vpop.permute.xlu0 %2669 }
 0xba7   :  { %10615 = vst.msk [vmem:[%s15489_s6 + $0x28] sm:$0xff] %vm214_vm1, %v13657_v9  ;;  %11874 = vmatprep.subr.mxu1 %v13657_v9 }
 0xba8   :  { %11875 = vmatpush3.msra.mxu1 %v13657_v9  ;;  %v13666_v46 = vpop.permute.xlu1 %2667 }
 0xba9   :  { %10614 = vst.msk [vmem:[%s15489_s6 + $0x20] sm:$0xff] %vm214_vm1, %v13666_v46  ;;  %11876 = vmatprep.subr.mxu1 %v13666_v46 }
 0xbaa   :  { %v13674_v14 = vpop.permute.xlu0 %2673  ;;  %11877 = vmatpush3.msra.mxu1 %v13666_v46 }
 0xbab   :  { %10617 = vst.msk [vmem:[%s15489_s6 + $0x38] sm:$0xff] %vm214_vm1, %v13674_v14  ;;  %11879 = vmatmul.mubr.msk.f32.vlgmr.msra.gmra.mxu1 %vm57_vm0, %v13685_v35  ;;  %11881 = vmatprep.subr.mxu1 %v13674_v14 }
 0xbac   :  { %11882 = vmatpush3.msra.mxu1 %v13674_v14  ;;  %v13691_v17 = vpop.permute.xlu1 %2671  ;;  %11885 = vmatprep.mubr.msk.f32.mxu1 %vm57_vm0, %v13696_v22 }
 0xbad   :  { %10616 = vst.msk [vmem:[%s15489_s6 + $0x30] sm:$0xff] %vm214_vm1, %v13691_v17  ;;  %11883 = vmatprep.subr.mxu1 %v13691_v17 }
 0xbae   :  { %11884 = vmatpush3.msra.mxu1 %v13691_v17 }
 0xbaf   :  { %11886 = vmatmul.mubr.msk.f32.vlgmr.msra.gmra.mxu1 %vm57_vm0, %v13685_v35  ;;  %11902 = vmatprep.subr.mxu1 %v13712_v50 }
 0xbb0   :  { %11903 = vmatpush3.msra.mxu1 %v13712_v50  ;;  %11910 = vmatprep.mubr.msk.f32.mxu1 %vm214_vm1, %v13666_v46 }
 0xbb1   :  { %11904 = vmatprep.subr.mxu1 %v13721_v23 }
 0xbb2   :  { %11905 = vmatpush3.msra.mxu1 %v13721_v23 }
 0xbb3   :  { %11906 = vmatprep.subr.mxu1 %v13728_v38 }
 0xbb4   :  { %11907 = vmatpush3.msra.mxu1 %v13728_v38 }
 0xbb5   :  { %11908 = vmatprep.subr.mxu1 %v13735_v24 }
 0xbb6   :  { %11909 = vmatpush3.msra.mxu1 %v13735_v24 }
 0xbb7   :  { %11911 = vmatmul.mubr.msk.f32.vlgmr.msra.gmra.mxu1 %vm214_vm1, %v13657_v9 }
 0xbb8   :  { %11913 = vmatprep.mubr.msk.f32.mxu1 %vm214_vm1, %v13691_v17 }
 0xbbb   :  { %11914 = vmatmul.mubr.msk.f32.gmra.mxu1 %vm214_vm1, %v13674_v14 }
 0xbbc   :  { %11927 = vmatprep.mubr.msk.f32.mxu1 %vm57_vm0, %v13696_v22 }
 0xc6b   :  { %v11880_v51 = vpop.f32.mrf.mxu1 }
 0xc6c   :  { %11916 = vmatprep.subr.mxu0 %v11880_v51 }
 0xc6d   :  { %v2755_v3 = vpop.f32.mrf.mxu1 }
 0xc6e   :  { %11896 = vmatprep.mubr.msk.f32.mxu0 %vm214_vm1, %v2755_v3 }
 0xc6f   :  { %v11887_v25 = vpop.f32.mrf.mxu1  ;;  %11897 = vmatmul.mubr.msk.f32.vlgmr.msra.gmra.mxu0 %vm214_vm1, %v11880_v51 }
 0xc70   :  { %11917 = vmatpush3.msra.mxu0 %v11880_v51  ;;  %11923 = vmatprep.subr.mxu1 %v11887_v25 }
 0xc71   :  { %11918 = vmatprep.subr.mxu0 %v2755_v3  ;;  %v2830_v52 = vpop.f32.mrf.mxu1  ;;  %11924 = vmatpush3.msra.mxu1 %v11887_v25 }
 0xc72   :  { %11919 = vmatpush3.msra.mxu0 %v2755_v3  ;;  %11899 = vmatprep.mubr.msk.f32.mxu0 %vm214_vm1, %v2830_v52 }
 0xc73   :  { %11925 = vmatprep.subr.mxu1 %v2830_v52  ;;  %11900 = vmatmul.mubr.msk.f32.gmra.mxu0 %vm214_vm1, %v11887_v25 }
 0xc74   :  { %11926 = vmatpush3.msra.mxu1 %v2830_v52  ;;  %11920 = vmatprep.mubr.msk.f32.mxu0 %vm57_vm0, %v13696_v22 }
 0xc75   :  { %11928 = vmatmul.mubr.msk.f32.vlgmr.msra.gmra.mxu1 %vm57_vm0, %v13685_v35  ;;  %11930 = vmatprep.subr.mxu0 %v13758_v7 }
 0xc76   :  { %11948 = vmatprep.mubr.msk.f32.mxu1 %vm57_vm0, %v13696_v22 }
 0xc77   :  { %11921 = vmatmul.mubr.msk.f32.vlgmr.msra.gmra.mxu0 %vm57_vm0, %v13685_v35  ;;  %v11912_v31 = vpop.f32.mrf.mxu1 }
 0xc78   :  { %11931 = vmatpush3.msra.mxu0 %v13758_v7 }
 0xc79   :  { %11932 = vmatprep.subr.mxu0 %v13769_v39  ;;  %v3010_v32 = vpop.f32.mrf.mxu1 }
 0xc7a   :  { %11933 = vmatpush3.msra.mxu0 %v13769_v39 }
 0xc7b   :  { %11934 = vmatprep.subr.mxu0 %v13776_v4  ;;  %v11915_v33 = vpop.f32.mrf.mxu1 }
 0xc7c   :  { %11935 = vmatpush3.msra.mxu0 %v13776_v4 }
 0xc7d   :  { %11936 = vmatprep.subr.mxu0 %v13783_v40  ;;  %v3020_v1 = vpop.f32.mrf.mxu1 }
 0xc7e   :  { %11937 = vmatpush3.msra.mxu0 %v13783_v40 }
 0xc7f   :  { %11958 = vmatprep.subr.mxu0 %v13790_v30 }
 0xd2f   :  { %v11898_v34 = vpop.f32.mrf.mxu0 }
 0xd30   :  { %v3016_v19 = vadd.f32 %v11912_v31, %v11898_v34 }
 0xd31   :  { %v2917_v36 = vpop.f32.mrf.mxu0 }
 0xd32   :  { %v3011_v15 = vadd.f32 %v3010_v32, %v2917_v36 }
 0xd33   :  { %v11901_v45 = vpop.f32.mrf.mxu0 }
 0xd34   :  { %v3026_v43 = vadd.f32 %v11915_v33, %v11901_v45 }
 0xd35   :  { %v11929_v12 = vpop.f32.mrf.mxu1  ;;  %v2927_v13 = vpop.f32.mrf.mxu0 }
 0xd36   :  { %v3182_v54 = vmul.f32 2.0, %v11929_v12  ;;  %v3021_v21 = vadd.f32 %v3020_v1, %v2927_v13 }
 0xd37   :  { %v3170_v6 = vpop.f32.mrf.mxu1  ;;  %v11922_v8 = vpop.f32.mrf.mxu0 }
 0xd38   :  { %v3180_v10 = vmul.f32 2.0, %v11922_v8  ;;  %v3181_v53 = vmul.f32 2.0, %v3170_v6  ;;  %v3186_v62 = vsub.f32 %v3182_v54, %v13674_v14 }
 0xd39   :  { %v3095_v11 = vpop.f32.mrf.mxu0 }
 0xd3a   :  { %v3179_v56 = vmul.f32 2.0, %v3095_v11  ;;  %v3184_v57 = vsub.f32 %v3180_v10, %v13657_v9  ;;  %v3185_v18 = vsub.f32 %v3181_v53, %v13691_v17 }
 0xd3c   :  { %v3183_v60 = vsub.f32 %v3179_v56, %v13666_v46 }
 0xd3e   :  { %11938 = vmatprep.mubr.msk.f32.mxu0 %vm214_vm1, %v3183_v60 }
 0xd3f   :  { %11939 = vmatmul.mubr.msk.f32.vlgmr.msra.gmra.mxu0 %vm214_vm1, %v3184_v57  ;;  %v13887_v57 = vld [vmem:[%s15486_s5 + $0x8] sm:$0xff] }
 0xd40   :  { %11941 = vmatprep.mubr.msk.f32.mxu0 %vm214_vm1, %v3185_v18  ;;  %11959 = vmatpush3.msra.mxu0 %v13790_v30  ;;  %v13894_v18 = vld [vmem:[%s15486_s5] sm:$0xff] }
 0xd41   :  { %11960 = vmatprep.subr.mxu0 %v13804_v55 }
 0xd42   :  { %11961 = vmatpush3.msra.mxu0 %v13804_v55 }
 0xd43   :  { %11942 = vmatmul.mubr.msk.f32.gmra.mxu0 %vm214_vm1, %v3186_v62  ;;  %11962 = vmatprep.subr.mxu0 %v13812_v59 }
 0xd44   :  { %11963 = vmatpush3.msra.mxu0 %v13812_v59 }
 0xd45   :  { %11964 = vmatprep.subr.mxu0 %v13299_v44 }
 0xd46   :  { %11965 = vmatpush3.msra.mxu0 %v13299_v44  ;;  %v10621_v44 = vld [vmem:[%s15487_s1 + $0x58] sm:$0xff] }
 0xdff   :  { %v11940_v20 = vpop.f32.mrf.mxu0 }
 0xe00   :  { %v3285_v0 = vadd.f32 %v11940_v20, %v3016_v19 }
 0xe01   :  { %v3265_v42 = vpop.f32.mrf.mxu0 }
 0xe02   :  { %v3289_v2 = vadd.f32 %v10619_v58, %v3285_v0  ;;  %v3284_v47 = vadd.f32 %v3265_v42, %v3011_v15  ;;  %v13917_v15 = vld [vmem:[%s15486_s5 + $0x58] sm:$0xff]  ;;  %v13928_v0 = vld [vmem:[%s15486_s5 + $0x50] sm:$0xff]  ;;  %v13942_v42 = vld [vmem:[%s15486_s5 + $0x40] sm:$0xff] }
 0xe03   :  { %v11943_v5 = vpop.f32.mrf.mxu0 }
 0xe04   :  { %v10643_v26 = vmul.f32 -1.442695, %v3289_v2  ;;  %v3288_v63 = vadd.f32 %v10618_v37, %v3284_v47  ;;  %v3287_v28 = vadd.f32 %v11943_v5, %v3026_v43  ;;  %v13935_v37 = vld [vmem:[%s15486_s5 + $0x48] sm:$0xff] }
 0xe05   :  { %v3275_v51 = vpop.f32.mrf.mxu0 }
 0xe06   :  { %12764 = vpow2.f32 %v10643_v26  ;;  %v10642_v3 = vmul.f32 -1.442695, %v3288_v63  ;;  %v3291_v25 = vadd.f32 %v10621_v44, %v3287_v28  ;;  %v3286_v52 = vadd.f32 %v3275_v51, %v3021_v21 }
 0xe08   :  { %12766 = vpow2.f32 %v10642_v3  ;;  %v10645_v31 = vmul.f32 -1.442695, %v3291_v25  ;;  %v3290_v32 = vadd.f32 %v10620_v61, %v3286_v52 }
 0xe0a   :  { %12768 = vpow2.f32 %v10645_v31  ;;  %v10644_v33 = vmul.f32 -1.442695, %v3290_v32 }
 0xe0c   :  { %12770 = vpow2.f32 %v10644_v33 }
 0xe13   :  { %v12765_v34 = vpop.eup %12764 }
 0xe14   :  { %v3305_v36 = vadd.f32 1.0, %v12765_v34 }
 0xe15   :  { %v12767_v1 = vpop.eup %12766 }
 0xe16   :  { %12772 = vrcp.f32 %v3305_v36  ;;  %v3304_v45 = vadd.f32 1.0, %v12767_v1 }
 0xe17   :  { %v12769_v12 = vpop.eup %12768 }
 0xe18   :  { %12774 = vrcp.f32 %v3304_v45  ;;  %v3307_v13 = vadd.f32 1.0, %v12769_v12  ;;  %v13961_v12 = vld [vmem:[%s15485_s4 + $0x28] sm:$0xff] }
 0xe19   :  { %v12771_v6 = vpop.eup %12770 }
 0xe1a   :  { %12776 = vrcp.f32 %v3307_v13  ;;  %v3306_v8 = vadd.f32 1.0, %v12771_v6  ;;  %v10647_v13 = vld [vmem:[%s15488_s2 + $0x48] sm:$0xff] }
 0xe1c   :  { %12778 = vrcp.f32 %v3306_v8 }
 0xe23   :  { %v13830_v10 = vpop.eup %12772 }
 0xe24   :  { %v13834_v11 = vmul.f32 %v13830_v10, %v13657_v9 }
 0xe25   :  { %v13836_v53 = vpop.eup %12774 }
 0xe26   :  { %11944 = vmatprep.subr.mxu1 %v13834_v11  ;;  %v13841_v56 = vmul.f32 %v13836_v53, %v13666_v46 }
 0xe27   :  { %v13843_v60 = vpop.eup %12776  ;;  %11945 = vmatpush3.msra.mxu1 %v13834_v11 }
 0xe28   :  { %11946 = vmatprep.subr.mxu1 %v13841_v56  ;;  %v13849_v54 = vmul.f32 %v13843_v60, %v13674_v14  ;;  %v13871_v14 = vld [vmem:[%s15486_s5 + $0x18] sm:$0xff] }
 0xe29   :  { %v13851_v9 = vpop.eup %12778  ;;  %11947 = vmatpush3.msra.mxu1 %v13841_v56 }
 0xe2a   :  { %11949 = vmatmul.mubr.msk.f32.vlgmr.msra.gmra.mxu1 %vm57_vm0, %v13685_v35  ;;  %11951 = vmatprep.subr.mxu1 %v13849_v54  ;;  %v13859_v46 = vmul.f32 %v13851_v9, %v13691_v17  ;;  %v13880_v17 = vld [vmem:[%s15486_s5 + $0x10] sm:$0xff] }
 0xe2b   :  { %11952 = vmatpush3.msra.mxu1 %v13849_v54  ;;  %11955 = vmatprep.mubr.msk.f32.mxu1 %vm57_vm0, %v13696_v22 }
 0xe2c   :  { %11953 = vmatprep.subr.mxu1 %v13859_v46 }
 0xe2d   :  { %11954 = vmatpush3.msra.mxu1 %v13859_v46 }
 0xe2e   :  { %11956 = vmatmul.mubr.msk.f32.vlgmr.msra.gmra.mxu1 %vm57_vm0, %v13685_v35  ;;  %11972 = vmatprep.subr.mxu1 %v13871_v14 }
 0xe2f   :  { %11973 = vmatpush3.msra.mxu1 %v13871_v14  ;;  %11980 = vmatprep.mubr.msk.f32.mxu1 %vm214_vm1, %v13841_v56 }
 0xe30   :  { %11974 = vmatprep.subr.mxu1 %v13880_v17 }
 0xe31   :  { %11975 = vmatpush3.msra.mxu1 %v13880_v17 }
 0xe32   :  { %11976 = vmatprep.subr.mxu1 %v13887_v57 }
 0xe33   :  { %11977 = vmatpush3.msra.mxu1 %v13887_v57 }
 0xe34   :  { %11978 = vmatprep.subr.mxu1 %v13894_v18 }
 0xe35   :  { %11979 = vmatpush3.msra.mxu1 %v13894_v18 }
 0xe36   :  { %11981 = vmatmul.mubr.msk.f32.vlgmr.msra.gmra.mxu1 %vm214_vm1, %v13834_v11 }
 0xe37   :  { %11983 = vmatprep.mubr.msk.f32.mxu1 %vm214_vm1, %v13859_v46 }
 0xe3a   :  { %11984 = vmatmul.mubr.msk.f32.gmra.mxu1 %vm214_vm1, %v13849_v54 }
 0xe3b   :  { %11997 = vmatprep.mubr.msk.f32.mxu1 %vm57_vm0, %v13696_v22 }
 0xeea   :  { %v11950_v62 = vpop.f32.mrf.mxu1 }
 0xeeb   :  { %11986 = vmatprep.subr.mxu0 %v11950_v62 }
 0xeec   :  { %v3391_v19 = vpop.f32.mrf.mxu1 }
 0xeed   :  { %11966 = vmatprep.mubr.msk.f32.mxu0 %vm214_vm1, %v3391_v19 }
 0xeee   :  { %v11957_v58 = vpop.f32.mrf.mxu1  ;;  %11967 = vmatmul.mubr.msk.f32.vlgmr.msra.gmra.mxu0 %vm214_vm1, %v11950_v62 }
 0xeef   :  { %11987 = vmatpush3.msra.mxu0 %v11950_v62  ;;  %11993 = vmatprep.subr.mxu1 %v11957_v58 }
 0xef0   :  { %11988 = vmatprep.subr.mxu0 %v3391_v19  ;;  %v3466_v20 = vpop.f32.mrf.mxu1  ;;  %11994 = vmatpush3.msra.mxu1 %v11957_v58 }
 0xef1   :  { %11989 = vmatpush3.msra.mxu0 %v3391_v19  ;;  %11969 = vmatprep.mubr.msk.f32.mxu0 %vm214_vm1, %v3466_v20 }
 0xef2   :  { %11995 = vmatprep.subr.mxu1 %v3466_v20  ;;  %11970 = vmatmul.mubr.msk.f32.gmra.mxu0 %vm214_vm1, %v11957_v58  ;;  %v10649_v58 = vld [vmem:[%s15488_s2 + $0x58] sm:$0xff] }
 0xef3   :  { %11996 = vmatpush3.msra.mxu1 %v3466_v20  ;;  %11990 = vmatprep.mubr.msk.f32.mxu0 %vm57_vm0, %v13696_v22 }
 0xef4   :  { %11998 = vmatmul.mubr.msk.f32.vlgmr.msra.gmra.mxu1 %vm57_vm0, %v13685_v35  ;;  %12000 = vmatprep.subr.mxu0 %v13917_v15 }
 0xef5   :  { %12018 = vmatprep.mubr.msk.f32.mxu1 %vm57_vm0, %v13696_v22 }
 0xef6   :  { %11991 = vmatmul.mubr.msk.f32.vlgmr.msra.gmra.mxu0 %vm57_vm0, %v13685_v35  ;;  %v11982_v43 = vpop.f32.mrf.mxu1 }
 0xef7   :  { %12001 = vmatpush3.msra.mxu0 %v13917_v15 }
 0xef8   :  { %12002 = vmatprep.subr.mxu0 %v13928_v0  ;;  %v3650_v2 = vpop.f32.mrf.mxu1 }
 0xef9   :  { %12003 = vmatpush3.msra.mxu0 %v13928_v0 }
 0xefa   :  { %12004 = vmatprep.subr.mxu0 %v13935_v37  ;;  %v11985_v47 = vpop.f32.mrf.mxu1 }
 0xefb   :  { %12005 = vmatpush3.msra.mxu0 %v13935_v37 }
 0xefc   :  { %12006 = vmatprep.subr.mxu0 %v13942_v42  ;;  %v3660_v21 = vpop.f32.mrf.mxu1 }
 0xefd   :  { %12007 = vmatpush3.msra.mxu0 %v13942_v42 }
 0xefe   :  { %12028 = vmatprep.subr.mxu0 %v13597_v27 }
 0xfae   :  { %v11968_v44 = vpop.f32.mrf.mxu0 }
 0xfb0   :  { %v3553_v5 = vpop.f32.mrf.mxu0 }
 0xfb1   :  { %v3651_v8 = vadd.f32 %v3650_v2, %v3553_v5  ;;  %v10648_v2 = vld [vmem:[%s15488_s2 + $0x50] sm:$0xff] }
 0xfb2   :  { %v11971_v26 = vpop.f32.mrf.mxu0 }
 0xfb4   :  { %v11999_v63 = vpop.f32.mrf.mxu1  ;;  %v3563_v28 = vpop.f32.mrf.mxu0 }
 0xfb5   :  { %v3661_v61 = vadd.f32 %v3660_v21, %v3563_v28  ;;  %v3822_v34 = vmul.f32 2.0, %v11999_v63 }
 0xfb6   :  { %v3810_v51 = vpop.f32.mrf.mxu1  ;;  %v11992_v3 = vpop.f32.mrf.mxu0 }
 0xfb7   :  { %v3820_v25 = vmul.f32 2.0, %v11992_v3  ;;  %v3821_v31 = vmul.f32 2.0, %v3810_v51  ;;  %v3826_v45 = vsub.f32 %v3822_v34, %v13849_v54 }
 0xfb8   :  { %v3735_v52 = vpop.f32.mrf.mxu0 }
 0xfb9   :  { %v3819_v32 = vmul.f32 2.0, %v3735_v52  ;;  %v3824_v36 = vsub.f32 %v3820_v25, %v13834_v11  ;;  %v3825_v1 = vsub.f32 %v3821_v31, %v13859_v46  ;;  %v3666_v46 = vadd.f32 %v11985_v47, %v11971_v26 }
 0xfba   :  { %v3941_v25 = vsub.f32 1.0, %v13830_v10 }
 0xfbb   :  { %v3823_v33 = vsub.f32 %v3819_v32, %v13841_v56  ;;  %v10646_v56 = vld [vmem:[%s15488_s2 + $0x40] sm:$0xff]  ;;  %v3940_v32 = vsub.f32 1.0, %v13836_v53 }
 0xfbd   :  { %12008 = vmatprep.mubr.msk.f32.mxu0 %vm214_vm1, %v3823_v33 }
 0xfbe   :  { %12009 = vmatmul.mubr.msk.f32.vlgmr.msra.gmra.mxu0 %vm214_vm1, %v3824_v36  ;;  %v3936_v36 = vmul.f32 %v13836_v53, %v13638_v48  ;;  %v3938_v48 = vmul.f32 %v13851_v9, %v13651_v16 }
 0xfbf   :  { %12011 = vmatprep.mubr.msk.f32.mxu0 %vm214_vm1, %v3825_v1  ;;  %12029 = vmatpush3.msra.mxu0 %v13597_v27  ;;  %v13968_v27 = vld [vmem:[%s15485_s4 + $0x20] sm:$0xff] }
 0xfc0   :  { %12030 = vmatprep.subr.mxu0 %v13604_v29 }
 0xfc1   :  { %12031 = vmatpush3.msra.mxu0 %v13604_v29  ;;  %v3656_v29 = vadd.f32 %v11982_v43, %v11968_v44 }
 0xfc2   :  { %12012 = vmatmul.mubr.msk.f32.gmra.mxu0 %vm214_vm1, %v3826_v45  ;;  %12032 = vmatprep.subr.mxu0 %v13961_v12  ;;  %v3943_v45 = vsub.f32 1.0, %v13843_v60 }
 0xfc3   :  { %12033 = vmatpush3.msra.mxu0 %v13961_v12 }
 0xfc4   :  { %12034 = vmatprep.subr.mxu0 %v13968_v27 }
 0xfc5   :  { %12035 = vmatpush3.msra.mxu0 %v13968_v27 }
0x107e   :  { %v12010_v6 = vpop.f32.mrf.mxu0 }
0x107f   :  { %v3925_v11 = vadd.f32 %v12010_v6, %v3656_v29  ;;  %v3939_v6 = vmul.f32 %v13843_v60, %v13645_v49 }
0x1080   :  { %v3905_v54 = vpop.f32.mrf.mxu0 }
0x1081   :  { %v3929_v62 = vadd.f32 %v10647_v13, %v3925_v11  ;;  %v3924_v19 = vadd.f32 %v3905_v54, %v3651_v8 }
0x1082   :  { %v12013_v20 = vpop.f32.mrf.mxu0 }
0x1083   :  { %12780 = vtanh.f32 %v3929_v62  ;;  %v3928_v43 = vadd.f32 %v10646_v56, %v3924_v19  ;;  %v3927_v44 = vadd.f32 %v12013_v20, %v3666_v46 }
0x1084   :  { %v3915_v5 = vpop.f32.mrf.mxu0 }
0x1085   :  { %12782 = vtanh.f32 %v3928_v43  ;;  %v3931_v21 = vadd.f32 %v10649_v58, %v3927_v44  ;;  %v3926_v63 = vadd.f32 %v3915_v5, %v3661_v61  ;;  %v3937_v61 = vmul.f32 %v13830_v10, %v13633_v41 }
0x1086   :  { %v3942_v41 = vsub.f32 1.0, %v13851_v9 }
0x1087   :  { %12784 = vtanh.f32 %v3931_v21  ;;  %v3930_v47 = vadd.f32 %v10648_v2, %v3926_v63 }
0x1089   :  { %12786 = vtanh.f32 %v3930_v47 }
0x1090   :  { %v12781_v26 = vpop.eup %12780 }
0x1091   :  { %3950 = vrot.lane.b32.xlu0 %v12781_v26, %s12986_s8 }
0x1092   :  { %v12783_v28 = vpop.eup %12782 }
0x1093   :  { %3948 = vrot.lane.b32.xlu1 %v12783_v28, %s12986_s8 }
0x1094   :  { %v12785_v51 = vpop.eup %12784 }
0x1095   :  { %3954 = vrot.lane.b32.xlu0 %v12785_v51, %s12986_s8 }
0x1096   :  { %v12787_v3 = vpop.eup %12786 }
0x1097   :  { %3952 = vrot.lane.b32.xlu1 %v12787_v3, %s12986_s8 }
0x1103   :  { %v3951_v52 = vpop.permute.xlu0 %3950 }
0x1104   :  { %v3961_v31 = vmul.f32 %v3951_v52, %v3941_v25  ;;  %v14113_v25 = vld [vmem:[%s15486_s5 + $0x20] sm:$0xff] }
0x1105   :  { %v3949_v33 = vpop.permute.xlu1 %3948 }
0x1106   :  { %v13992_v34 = vadd.f32 %v3961_v31, %v3937_v61  ;;  %v3960_v1 = vmul.f32 %v3949_v33, %v3940_v32 }
0x1107   :  { %v3955_v29 = vpop.permute.xlu0 %3954 }
0x1108   :  { %v13997_v13 = vadd.f32 %v3960_v1, %v3936_v36  ;;  %v3963_v8 = vmul.f32 %v3955_v29, %v3943_v45  ;;  %3974 = vrot.lane.b32.xlu0 %v13992_v34, %s12987_s24  ;;  %v10677_v45 = vld [vmem:[%s15487_s1 + $0x78] sm:$0xff] }
0x1109   :  { %v3953_v10 = vpop.permute.xlu1 %3952 }
0x110a   :  { %v14004_v11 = vadd.f32 %v3963_v8, %v3939_v6  ;;  %v3962_v53 = vmul.f32 %v3953_v10, %v3942_v41  ;;  %3972 = vrot.lane.b32.xlu1 %v13997_v13, %s12987_s24  ;;  %v10676_v10 = vld [vmem:[%s15487_s1 + $0x70] sm:$0xff] }
0x110c   :  { %v14010_v56 = vadd.f32 %v3962_v53, %v3938_v48  ;;  %3978 = vrot.lane.b32.xlu0 %v14004_v11, %s12987_s24 }
0x110e   :  { %3976 = vrot.lane.b32.xlu1 %v14010_v56, %s12987_s24 }
0x117a   :  { %v14016_v49 = vpop.permute.xlu0 %3974 }
0x117b   :  { %10671 = vst.msk [vmem:[%s15489_s6 + $0x48] sm:$0xff] %vm214_vm1, %v14016_v49  ;;  %12014 = vmatprep.subr.mxu1 %v14016_v49 }
0x117c   :  { %12015 = vmatpush3.msra.mxu1 %v14016_v49  ;;  %v14025_v16 = vpop.permute.xlu1 %3972 }
0x117d   :  { %10670 = vst.msk [vmem:[%s15489_s6 + $0x40] sm:$0xff] %vm214_vm1, %v14025_v16  ;;  %12016 = vmatprep.subr.mxu1 %v14025_v16 }
0x117e   :  { %v14033_v60 = vpop.permute.xlu0 %3978  ;;  %12017 = vmatpush3.msra.mxu1 %v14025_v16 }
0x117f   :  { %10673 = vst.msk [vmem:[%s15489_s6 + $0x58] sm:$0xff] %vm214_vm1, %v14033_v60  ;;  %12019 = vmatmul.mubr.msk.f32.vlgmr.msra.gmra.mxu1 %vm57_vm0, %v13685_v35  ;;  %12021 = vmatprep.subr.mxu1 %v14033_v60 }
0x1180   :  { %12022 = vmatpush3.msra.mxu1 %v14033_v60  ;;  %v14045_v9 = vpop.permute.xlu1 %3976  ;;  %12025 = vmatprep.mubr.msk.f32.mxu1 %vm57_vm0, %v13696_v22 }
0x1181   :  { %10672 = vst.msk [vmem:[%s15489_s6 + $0x50] sm:$0xff] %vm214_vm1, %v14045_v9  ;;  %12023 = vmatprep.subr.mxu1 %v14045_v9 }
0x1182   :  { %12024 = vmatpush3.msra.mxu1 %v14045_v9 }
0x1183   :  { %12026 = vmatmul.mubr.msk.f32.vlgmr.msra.gmra.mxu1 %vm57_vm0, %v13685_v35  ;;  %12042 = vmatprep.subr.mxu1 %v13712_v50 }
0x1184   :  { %12043 = vmatpush3.msra.mxu1 %v13712_v50  ;;  %12050 = vmatprep.mubr.msk.f32.mxu1 %vm214_vm1, %v14025_v16 }
0x1185   :  { %12044 = vmatprep.subr.mxu1 %v13721_v23 }
0x1186   :  { %12045 = vmatpush3.msra.mxu1 %v13721_v23 }
0x1187   :  { %12046 = vmatprep.subr.mxu1 %v13728_v38 }
0x1188   :  { %12047 = vmatpush3.msra.mxu1 %v13728_v38 }
0x1189   :  { %12048 = vmatprep.subr.mxu1 %v13735_v24 }
0x118a   :  { %12049 = vmatpush3.msra.mxu1 %v13735_v24 }
0x118b   :  { %12051 = vmatmul.mubr.msk.f32.vlgmr.msra.gmra.mxu1 %vm214_vm1, %v14016_v49 }
0x118c   :  { %12053 = vmatprep.mubr.msk.f32.mxu1 %vm214_vm1, %v14045_v9 }
0x118f   :  { %12054 = vmatmul.mubr.msk.f32.gmra.mxu1 %vm214_vm1, %v14033_v60 }
0x1190   :  { %12067 = vmatprep.mubr.msk.f32.mxu1 %vm57_vm0, %v13696_v22 }
0x123f   :  { %v12020_v50 = vpop.f32.mrf.mxu1 }
0x1240   :  { %12056 = vmatprep.subr.mxu0 %v12020_v50 }
0x1241   :  { %v4060_v23 = vpop.f32.mrf.mxu1 }
0x1242   :  { %12036 = vmatprep.mubr.msk.f32.mxu0 %vm214_vm1, %v4060_v23 }
0x1243   :  { %v12027_v38 = vpop.f32.mrf.mxu1  ;;  %12037 = vmatmul.mubr.msk.f32.vlgmr.msra.gmra.mxu0 %vm214_vm1, %v12020_v50 }
0x1244   :  { %12057 = vmatpush3.msra.mxu0 %v12020_v50  ;;  %12063 = vmatprep.subr.mxu1 %v12027_v38 }
0x1245   :  { %12058 = vmatprep.subr.mxu0 %v4060_v23  ;;  %v4135_v24 = vpop.f32.mrf.mxu1  ;;  %12064 = vmatpush3.msra.mxu1 %v12027_v38 }
0x1246   :  { %12059 = vmatpush3.msra.mxu0 %v4060_v23  ;;  %12039 = vmatprep.mubr.msk.f32.mxu0 %vm214_vm1, %v4135_v24 }
0x1247   :  { %12065 = vmatprep.subr.mxu1 %v4135_v24  ;;  %12040 = vmatmul.mubr.msk.f32.gmra.mxu0 %vm214_vm1, %v12027_v38 }
0x1248   :  { %12066 = vmatpush3.msra.mxu1 %v4135_v24  ;;  %12060 = vmatprep.mubr.msk.f32.mxu0 %vm57_vm0, %v13696_v22 }
0x1249   :  { %12068 = vmatmul.mubr.msk.f32.vlgmr.msra.gmra.mxu1 %vm57_vm0, %v13685_v35  ;;  %12070 = vmatprep.subr.mxu0 %v13758_v7 }
0x124a   :  { %12088 = vmatprep.mubr.msk.f32.mxu1 %vm57_vm0, %v13696_v22 }
0x124b   :  { %12061 = vmatmul.mubr.msk.f32.vlgmr.msra.gmra.mxu0 %vm57_vm0, %v13685_v35  ;;  %v12052_v54 = vpop.f32.mrf.mxu1 }
0x124c   :  { %12071 = vmatpush3.msra.mxu0 %v13758_v7 }
0x124d   :  { %12072 = vmatprep.subr.mxu0 %v13769_v39  ;;  %v4315_v46 = vpop.f32.mrf.mxu1 }
0x124e   :  { %12073 = vmatpush3.msra.mxu0 %v13769_v39 }
0x124f   :  { %12074 = vmatprep.subr.mxu0 %v13776_v4  ;;  %v12055_v62 = vpop.f32.mrf.mxu1 }
0x1250   :  { %12075 = vmatpush3.msra.mxu0 %v13776_v4 }
0x1251   :  { %12076 = vmatprep.subr.mxu0 %v13783_v40  ;;  %v4325_v7 = vpop.f32.mrf.mxu1 }
0x1252   :  { %12077 = vmatpush3.msra.mxu0 %v13783_v40 }
0x1253   :  { %12098 = vmatprep.subr.mxu0 %v13790_v30 }
0x1303   :  { %v12038_v19 = vpop.f32.mrf.mxu0 }
0x1305   :  { %v4222_v58 = vpop.f32.mrf.mxu0 }
0x1306   :  { %v4316_v61 = vadd.f32 %v4315_v46, %v4222_v58 }
0x1307   :  { %v12041_v20 = vpop.f32.mrf.mxu0 }
0x1308   :  { %v4331_v33 = vadd.f32 %v12055_v62, %v12041_v20 }
0x1309   :  { %v12069_v43 = vpop.f32.mrf.mxu1  ;;  %v4232_v44 = vpop.f32.mrf.mxu0 }
0x130a   :  { %v4326_v39 = vadd.f32 %v4325_v7, %v4232_v44  ;;  %v4487_v26 = vmul.f32 2.0, %v12069_v43 }
0x130b   :  { %v4475_v2 = vpop.f32.mrf.mxu1  ;;  %v12062_v5 = vpop.f32.mrf.mxu0 }
0x130c   :  { %v4485_v21 = vmul.f32 2.0, %v12062_v5  ;;  %v4486_v63 = vmul.f32 2.0, %v4475_v2  ;;  %v4491_v3 = vsub.f32 %v4487_v26, %v14033_v60 }
0x130d   :  { %v4400_v4 = vpop.f32.mrf.mxu0 }
0x130e   :  { %v4484_v47 = vmul.f32 2.0, %v4400_v4  ;;  %v4489_v28 = vsub.f32 %v4485_v21, %v14016_v49  ;;  %v4490_v51 = vsub.f32 %v4486_v63, %v14045_v9 }
0x1310   :  { %v4488_v40 = vsub.f32 %v4484_v47, %v14025_v16 }
0x1312   :  { %12078 = vmatprep.mubr.msk.f32.mxu0 %vm214_vm1, %v4488_v40 }
0x1313   :  { %12079 = vmatmul.mubr.msk.f32.vlgmr.msra.gmra.mxu0 %vm214_vm1, %v4489_v28 }
0x1314   :  { %12081 = vmatprep.mubr.msk.f32.mxu0 %vm214_vm1, %v4490_v51  ;;  %12099 = vmatpush3.msra.mxu0 %v13790_v30  ;;  %v4321_v30 = vadd.f32 %v12052_v54, %v12038_v19 }
0x1315   :  { %12100 = vmatprep.subr.mxu0 %v13804_v55 }
0x1316   :  { %12101 = vmatpush3.msra.mxu0 %v13804_v55  ;;  %v10675_v55 = vld [vmem:[%s15487_s1 + $0x68] sm:$0xff] }
0x1317   :  { %12082 = vmatmul.mubr.msk.f32.gmra.mxu0 %vm214_vm1, %v4491_v3  ;;  %12102 = vmatprep.subr.mxu0 %v13812_v59 }
0x1318   :  { %12103 = vmatpush3.msra.mxu0 %v13812_v59  ;;  %v10674_v59 = vld [vmem:[%s15487_s1 + $0x60] sm:$0xff] }
0x1319   :  { %12104 = vmatprep.subr.mxu0 %v14113_v25 }
0x131a   :  { %12105 = vmatpush3.msra.mxu0 %v14113_v25 }
0x13d3   :  { %v12080_v52 = vpop.f32.mrf.mxu0 }
0x13d4   :  { %v4590_v31 = vadd.f32 %v12080_v52, %v4321_v30 }
0x13d5   :  { %v4570_v32 = vpop.f32.mrf.mxu0 }
0x13d6   :  { %v4594_v36 = vadd.f32 %v10675_v55, %v4590_v31  ;;  %v4589_v1 = vadd.f32 %v4570_v32, %v4316_v61 }
0x13d7   :  { %v12083_v29 = vpop.f32.mrf.mxu0 }
0x13d8   :  { %v10699_v6 = vmul.f32 -1.442695, %v4594_v36  ;;  %v4593_v8 = vadd.f32 %v10674_v59, %v4589_v1  ;;  %v4592_v41 = vadd.f32 %v12083_v29, %v4331_v33  ;;  %v14222_v36 = vld [vmem:[%s15485_s4 + $0x30] sm:$0xff] }
0x13d9   :  { %v4580_v48 = vpop.f32.mrf.mxu0 }
0x13da   :  { %12788 = vpow2.f32 %v10699_v6  ;;  %v10698_v53 = vmul.f32 -1.442695, %v4593_v8  ;;  %v4596_v50 = vadd.f32 %v10677_v45, %v4592_v41  ;;  %v4591_v23 = vadd.f32 %v4580_v48, %v4326_v39  ;;  %v10703_v45 = vld [vmem:[%s15488_s2 + $0x68] sm:$0xff]  ;;  %v10702_v41 = vld [vmem:[%s15488_s2 + $0x60] sm:$0xff] }
0x13dc   :  { %12790 = vpow2.f32 %v10698_v53  ;;  %v10701_v38 = vmul.f32 -1.442695, %v4596_v50  ;;  %v4595_v24 = vadd.f32 %v10676_v10, %v4591_v23 }
0x13de   :  { %12792 = vpow2.f32 %v10701_v38  ;;  %v10700_v54 = vmul.f32 -1.442695, %v4595_v24  ;;  %v10704_v24 = vld [vmem:[%s15488_s2 + $0x70] sm:$0xff] }
0x13e0   :  { %12794 = vpow2.f32 %v10700_v54 }
0x13e7   :  { %v12789_v46 = vpop.eup %12788 }
0x13e8   :  { %v4610_v62 = vadd.f32 1.0, %v12789_v46 }
0x13e9   :  { %v12791_v19 = vpop.eup %12790 }
0x13ea   :  { %12796 = vrcp.f32 %v4610_v62  ;;  %v4609_v58 = vadd.f32 1.0, %v12791_v19 }
0x13eb   :  { %v12793_v7 = vpop.eup %12792 }
0x13ec   :  { %12798 = vrcp.f32 %v4609_v58  ;;  %v4612_v20 = vadd.f32 1.0, %v12793_v7 }
0x13ed   :  { %v12795_v43 = vpop.eup %12794 }
0x13ee   :  { %12800 = vrcp.f32 %v4612_v20  ;;  %v4611_v44 = vadd.f32 1.0, %v12795_v43 }
0x13f0   :  { %12802 = vrcp.f32 %v4611_v44 }
0x13f7   :  { %v14129_v2 = vpop.eup %12796 }
0x13f8   :  { %v14133_v39 = vmul.f32 %v14129_v2, %v14016_v49  ;;  %v5246_v44 = vsub.f32 1.0, %v14129_v2 }
0x13f9   :  { %v14135_v5 = vpop.eup %12798 }
0x13fa   :  { %12084 = vmatprep.subr.mxu1 %v14133_v39  ;;  %v14140_v21 = vmul.f32 %v14135_v5, %v14025_v16 }
0x13fb   :  { %v14142_v4 = vpop.eup %12800  ;;  %12085 = vmatpush3.msra.mxu1 %v14133_v39 }
0x13fc   :  { %12086 = vmatprep.subr.mxu1 %v14140_v21  ;;  %v14148_v63 = vmul.f32 %v14142_v4, %v14033_v60 }
0x13fd   :  { %v14150_v49 = vpop.eup %12802  ;;  %12087 = vmatpush3.msra.mxu1 %v14140_v21 }
0x13fe   :  { %12089 = vmatmul.mubr.msk.f32.vlgmr.msra.gmra.mxu1 %vm57_vm0, %v13685_v35  ;;  %12091 = vmatprep.subr.mxu1 %v14148_v63  ;;  %v14158_v16 = vmul.f32 %v14150_v49, %v14045_v9 }
0x13ff   :  { %12092 = vmatpush3.msra.mxu1 %v14148_v63  ;;  %12095 = vmatprep.mubr.msk.f32.mxu1 %vm57_vm0, %v13696_v22 }
0x1400   :  { %12093 = vmatprep.subr.mxu1 %v14158_v16 }
0x1401   :  { %12094 = vmatpush3.msra.mxu1 %v14158_v16 }
0x1402   :  { %12096 = vmatmul.mubr.msk.f32.vlgmr.msra.gmra.mxu1 %vm57_vm0, %v13685_v35  ;;  %12112 = vmatprep.subr.mxu1 %v13871_v14 }
0x1403   :  { %12113 = vmatpush3.msra.mxu1 %v13871_v14  ;;  %12120 = vmatprep.mubr.msk.f32.mxu1 %vm214_vm1, %v14140_v21 }
0x1404   :  { %12114 = vmatprep.subr.mxu1 %v13880_v17 }
0x1405   :  { %12115 = vmatpush3.msra.mxu1 %v13880_v17 }
0x1406   :  { %12116 = vmatprep.subr.mxu1 %v13887_v57 }
0x1407   :  { %12117 = vmatpush3.msra.mxu1 %v13887_v57 }
0x1408   :  { %12118 = vmatprep.subr.mxu1 %v13894_v18 }
0x1409   :  { %12119 = vmatpush3.msra.mxu1 %v13894_v18 }
0x140a   :  { %12121 = vmatmul.mubr.msk.f32.vlgmr.msra.gmra.mxu1 %vm214_vm1, %v14133_v39 }
0x140b   :  { %12123 = vmatprep.mubr.msk.f32.mxu1 %vm214_vm1, %v14158_v16 }
0x140e   :  { %12124 = vmatmul.mubr.msk.f32.gmra.mxu1 %vm214_vm1, %v14148_v63 }
0x140f   :  { %12137 = vmatprep.mubr.msk.f32.mxu1 %vm57_vm0, %v13696_v22 }
0x14be   :  { %v12090_v14 = vpop.f32.mrf.mxu1 }
0x14bf   :  { %12126 = vmatprep.subr.mxu0 %v12090_v14 }
0x14c0   :  { %v4696_v17 = vpop.f32.mrf.mxu1 }
0x14c1   :  { %12106 = vmatprep.mubr.msk.f32.mxu0 %vm214_vm1, %v4696_v17 }
0x14c2   :  { %v12097_v57 = vpop.f32.mrf.mxu1  ;;  %12107 = vmatmul.mubr.msk.f32.vlgmr.msra.gmra.mxu0 %vm214_vm1, %v12090_v14 }
0x14c3   :  { %12127 = vmatpush3.msra.mxu0 %v12090_v14  ;;  %12133 = vmatprep.subr.mxu1 %v12097_v57 }
0x14c4   :  { %12128 = vmatprep.subr.mxu0 %v4696_v17  ;;  %v4771_v18 = vpop.f32.mrf.mxu1  ;;  %12134 = vmatpush3.msra.mxu1 %v12097_v57 }
0x14c5   :  { %12129 = vmatpush3.msra.mxu0 %v4696_v17  ;;  %12109 = vmatprep.mubr.msk.f32.mxu0 %vm214_vm1, %v4771_v18 }
0x14c6   :  { %12135 = vmatprep.subr.mxu1 %v4771_v18  ;;  %12110 = vmatmul.mubr.msk.f32.gmra.mxu0 %vm214_vm1, %v12097_v57  ;;  %v5241_v57 = vmul.f32 %v14135_v5, %v13997_v13  ;;  %v5243_v13 = vmul.f32 %v14150_v49, %v14010_v56 }
0x14c7   :  { %12136 = vmatpush3.msra.mxu1 %v4771_v18  ;;  %12130 = vmatprep.mubr.msk.f32.mxu0 %vm57_vm0, %v13696_v22 }
0x14c8   :  { %12138 = vmatmul.mubr.msk.f32.vlgmr.msra.gmra.mxu1 %vm57_vm0, %v13685_v35  ;;  %12140 = vmatprep.subr.mxu0 %v13917_v15 }
0x14c9   :  { %12158 = vmatprep.mubr.msk.f32.mxu1 %vm57_vm0, %v13696_v22  ;;  %v14208_v22 = vld [vmem:[%s15485_s4 + $0x38] sm:$0xff] }
0x14ca   :  { %12131 = vmatmul.mubr.msk.f32.vlgmr.msra.gmra.mxu0 %vm57_vm0, %v13685_v35  ;;  %v12122_v35 = vpop.f32.mrf.mxu1 }
0x14cb   :  { %12141 = vmatpush3.msra.mxu0 %v13917_v15 }
0x14cc   :  { %12142 = vmatprep.subr.mxu0 %v13928_v0  ;;  %v4955_v15 = vpop.f32.mrf.mxu1 }
0x14cd   :  { %12143 = vmatpush3.msra.mxu0 %v13928_v0 }
0x14ce   :  { %12144 = vmatprep.subr.mxu0 %v13935_v37  ;;  %v12125_v60 = vpop.f32.mrf.mxu1 }
0x14cf   :  { %12145 = vmatpush3.msra.mxu0 %v13935_v37 }
0x14d0   :  { %12146 = vmatprep.subr.mxu0 %v13942_v42  ;;  %v4965_v47 = vpop.f32.mrf.mxu1 }
0x14d1   :  { %12147 = vmatpush3.msra.mxu0 %v13942_v42 }
0x14d2   :  { %12168 = vmatprep.subr.mxu0 %v14208_v22 }
0x1582   :  { %v12108_v9 = vpop.f32.mrf.mxu0 }
0x1583   :  { %v4961_v1 = vadd.f32 %v12122_v35, %v12108_v9  ;;  %v5248_v35 = vsub.f32 1.0, %v14142_v4  ;;  %v5244_v9 = vmul.f32 %v14142_v4, %v14004_v11 }
0x1584   :  { %v4858_v0 = vpop.f32.mrf.mxu0 }
0x1585   :  { %v4956_v6 = vadd.f32 %v4955_v15, %v4858_v0 }
0x1586   :  { %v12111_v40 = vpop.f32.mrf.mxu0 }
0x1587   :  { %v4971_v48 = vadd.f32 %v12125_v60, %v12111_v40 }
0x1588   :  { %v12139_v26 = vpop.f32.mrf.mxu1  ;;  %v4868_v37 = vpop.f32.mrf.mxu0 }
0x1589   :  { %v4966_v28 = vadd.f32 %v4965_v47, %v4868_v37  ;;  %v5127_v31 = vmul.f32 2.0, %v12139_v26  ;;  %v14314_v37 = vld [vmem:[%s15484_s0] sm:$0xff] }
0x158a   :  { %v5115_v51 = vpop.f32.mrf.mxu1  ;;  %v12132_v3 = vpop.f32.mrf.mxu0 }
0x158b   :  { %v5125_v42 = vmul.f32 2.0, %v12132_v3  ;;  %v5126_v55 = vmul.f32 2.0, %v5115_v51  ;;  %v5131_v33 = vsub.f32 %v5127_v31, %v14148_v63  ;;  %v14339_v51 = vld [vmem:[%s15485_s4 + $0x10] sm:$0xff]  ;;  %v14346_v3 = vld [vmem:[%s15485_s4 + $0x8] sm:$0xff]  ;;  %v14376_v31 = vld [vmem:[%s15485_s4 + $0x58] sm:$0xff] }
0x158c   :  { %v5040_v30 = vpop.f32.mrf.mxu0 }
0x158d   :  { %v5124_v52 = vmul.f32 2.0, %v5040_v30  ;;  %v5129_v59 = vsub.f32 %v5125_v42, %v14133_v39  ;;  %v5130_v32 = vsub.f32 %v5126_v55, %v14158_v16  ;;  %v5245_v16 = vsub.f32 1.0, %v14135_v5  ;;  %v14353_v42 = vld [vmem:[%s15485_s4] sm:$0xff] }
0x158f   :  { %v5128_v61 = vsub.f32 %v5124_v52, %v14140_v21  ;;  %v5242_v21 = vmul.f32 %v14129_v2, %v13992_v34  ;;  %v5247_v34 = vsub.f32 1.0, %v14150_v49  ;;  %v14303_v49 = vld [vmem:[%s15484_s0 + $0x8] sm:$0xff] }
0x1591   :  { %12148 = vmatprep.mubr.msk.f32.mxu0 %vm214_vm1, %v5128_v61 }
0x1592   :  { %12149 = vmatmul.mubr.msk.f32.vlgmr.msra.gmra.mxu0 %vm214_vm1, %v5129_v59  ;;  %v14387_v59 = vld [vmem:[%s15485_s4 + $0x50] sm:$0xff] }
0x1593   :  { %12151 = vmatprep.mubr.msk.f32.mxu0 %vm214_vm1, %v5130_v32  ;;  %12169 = vmatpush3.msra.mxu0 %v14208_v22  ;;  %v14394_v32 = vld [vmem:[%s15485_s4 + $0x48] sm:$0xff] }
0x1594   :  { %12170 = vmatprep.subr.mxu0 %v14222_v36 }
0x1595   :  { %12171 = vmatpush3.msra.mxu0 %v14222_v36 }
0x1596   :  { %12152 = vmatmul.mubr.msk.f32.gmra.mxu0 %vm214_vm1, %v5131_v33  ;;  %12172 = vmatprep.subr.mxu0 %v13961_v12  ;;  %v14401_v33 = vld [vmem:[%s15485_s4 + $0x40] sm:$0xff] }
0x1597   :  { %12173 = vmatpush3.msra.mxu0 %v13961_v12 }
0x1598   :  { %12174 = vmatprep.subr.mxu0 %v13968_v27 }
0x1599   :  { %12175 = vmatpush3.msra.mxu0 %v13968_v27  ;;  %v10705_v27 = vld [vmem:[%s15488_s2 + $0x78] sm:$0xff] }
0x1652   :  { %v12150_v29 = vpop.f32.mrf.mxu0 }
0x1653   :  { %v5230_v8 = vadd.f32 %v12150_v29, %v4961_v1  ;;  %v14408_v1 = vld [vmem:[%s15486_s5 + $0x38] sm:$0xff] }
0x1654   :  { %v5210_v10 = vpop.f32.mrf.mxu0 }
0x1655   :  { %v5234_v53 = vadd.f32 %v10703_v45, %v5230_v8  ;;  %v5229_v12 = vadd.f32 %v5210_v10, %v4956_v6 }
0x1656   :  { %v12153_v50 = vpop.f32.mrf.mxu0 }
0x1657   :  { %12804 = vtanh.f32 %v5234_v53  ;;  %v5233_v23 = vadd.f32 %v10702_v41, %v5229_v12  ;;  %v5232_v38 = vadd.f32 %v12153_v50, %v4971_v48 }
0x1658   :  { %v5220_v54 = vpop.f32.mrf.mxu0 }
0x1659   :  { %12806 = vtanh.f32 %v5233_v23  ;;  %v5236_v46 = vadd.f32 %v10705_v27, %v5232_v38  ;;  %v5231_v62 = vadd.f32 %v5220_v54, %v4966_v28  ;;  %v14330_v28 = vld [vmem:[%s15485_s4 + $0x18] sm:$0xff] }
0x165b   :  { %12808 = vtanh.f32 %v5236_v46  ;;  %v5235_v19 = vadd.f32 %v10704_v24, %v5231_v62 }
0x165d   :  { %12810 = vtanh.f32 %v5235_v19 }
0x1664   :  { %v12805_v58 = vpop.eup %12804 }
0x1665   :  { %5255 = vrot.lane.b32.xlu0 %v12805_v58, %s12986_s8 }
0x1666   :  { %v12807_v7 = vpop.eup %12806 }
0x1667   :  { %5253 = vrot.lane.b32.xlu1 %v12807_v7, %s12986_s8 }
0x1668   :  { %v12809_v20 = vpop.eup %12808 }
0x1669   :  { %5259 = vrot.lane.b32.xlu0 %v12809_v20, %s12986_s8 }
0x166a   :  { %v12811_v43 = vpop.eup %12810 }
0x166b   :  { %5257 = vrot.lane.b32.xlu1 %v12811_v43, %s12986_s8  ;;  %v14422_v43 = vld [vmem:[%s15486_s5 + $0x30] sm:$0xff] }
0x16d7   :  { %v5256_v39 = vpop.permute.xlu0 %5255 }
0x16d8   :  { %v5266_v63 = vmul.f32 %v5256_v39, %v5246_v44  ;;  %v14430_v44 = vld [vmem:[%s15486_s5 + $0x28] sm:$0xff] }
0x16d9   :  { %v5254_v14 = vpop.permute.xlu1 %5253 }
0x16da   :  { %v14251_v17 = vadd.f32 %v5266_v63, %v5242_v21  ;;  %v5265_v18 = vmul.f32 %v5254_v14, %v5245_v16  ;;  %v10731_v21 = vld [vmem:[%s15487_s1 + $0x88] sm:$0xff] }
0x16db   :  { %v5260_v15 = vpop.permute.xlu0 %5259 }
0x16dc   :  { %v14256_v60 = vadd.f32 %v5265_v18, %v5241_v57  ;;  %v5268_v0 = vmul.f32 %v5260_v15, %v5248_v35  ;;  %5279 = vrot.lane.b32.xlu0 %v14251_v17, %s12987_s24  ;;  %v10730_v57 = vld [vmem:[%s15487_s1 + $0x80] sm:$0xff] }
0x16dd   :  { %v5258_v2 = vpop.permute.xlu1 %5257 }
0x16de   :  { %v14263_v47 = vadd.f32 %v5268_v0, %v5244_v9  ;;  %v5267_v5 = vmul.f32 %v5258_v2, %v5247_v34  ;;  %5277 = vrot.lane.b32.xlu1 %v14256_v60, %s12987_s24 }
0x16e0   :  { %v14269_v40 = vadd.f32 %v5267_v5, %v5243_v13  ;;  %5283 = vrot.lane.b32.xlu0 %v14263_v47, %s12987_s24  ;;  %v10732_v5 = vld [vmem:[%s15487_s1 + $0x90] sm:$0xff] }
0x16e2   :  { %5281 = vrot.lane.b32.xlu1 %v14269_v40, %s12987_s24 }
0x174e   :  { %v14275_v11 = vpop.permute.xlu0 %5279 }
0x174f   :  { %10727 = vst.msk [vmem:[%s15489_s6 + $0x68] sm:$0xff] %vm214_vm1, %v14275_v11  ;;  %12154 = vmatprep.subr.mxu1 %v14275_v11 }
0x1750   :  { %12155 = vmatpush3.msra.mxu1 %v14275_v11  ;;  %v14284_v56 = vpop.permute.xlu1 %5277 }
0x1751   :  { %10726 = vst.msk [vmem:[%s15489_s6 + $0x60] sm:$0xff] %vm214_vm1, %v14284_v56  ;;  %12156 = vmatprep.subr.mxu1 %v14284_v56 }
0x1752   :  { %v14292_v4 = vpop.permute.xlu0 %5283  ;;  %12157 = vmatpush3.msra.mxu1 %v14284_v56 }
0x1753   :  { %10729 = vst.msk [vmem:[%s15489_s6 + $0x78] sm:$0xff] %vm214_vm1, %v14292_v4  ;;  %12159 = vmatmul.mubr.msk.f32.vlgmr.msra.gmra.mxu1 %vm57_vm0, %v14303_v49  ;;  %12161 = vmatprep.subr.mxu1 %v14292_v4 }
0x1754   :  { %12162 = vmatpush3.msra.mxu1 %v14292_v4  ;;  %v14309_v26 = vpop.permute.xlu1 %5281  ;;  %12165 = vmatprep.mubr.msk.f32.mxu1 %vm57_vm0, %v14314_v37 }
0x1755   :  { %10728 = vst.msk [vmem:[%s15489_s6 + $0x70] sm:$0xff] %vm214_vm1, %v14309_v26  ;;  %12163 = vmatprep.subr.mxu1 %v14309_v26 }
0x1756   :  { %12164 = vmatpush3.msra.mxu1 %v14309_v26 }
0x1757   :  { %12166 = vmatmul.mubr.msk.f32.vlgmr.msra.gmra.mxu1 %vm57_vm0, %v14303_v49  ;;  %12182 = vmatprep.subr.mxu1 %v14330_v28 }
0x1758   :  { %12183 = vmatpush3.msra.mxu1 %v14330_v28  ;;  %12190 = vmatprep.mubr.msk.f32.mxu1 %vm214_vm1, %v14284_v56 }
0x1759   :  { %12184 = vmatprep.subr.mxu1 %v14339_v51 }
0x175a   :  { %12185 = vmatpush3.msra.mxu1 %v14339_v51 }
0x175b   :  { %12186 = vmatprep.subr.mxu1 %v14346_v3 }
0x175c   :  { %12187 = vmatpush3.msra.mxu1 %v14346_v3 }
0x175d   :  { %12188 = vmatprep.subr.mxu1 %v14353_v42 }
0x175e   :  { %12189 = vmatpush3.msra.mxu1 %v14353_v42 }
0x175f   :  { %12191 = vmatmul.mubr.msk.f32.vlgmr.msra.gmra.mxu1 %vm214_vm1, %v14275_v11 }
0x1760   :  { %12193 = vmatprep.mubr.msk.f32.mxu1 %vm214_vm1, %v14309_v26 }
0x1763   :  { %12194 = vmatmul.mubr.msk.f32.gmra.mxu1 %vm214_vm1, %v14292_v4 }
0x1764   :  { %12207 = vmatprep.mubr.msk.f32.mxu1 %vm57_vm0, %v14314_v37 }
0x1813   :  { %v12160_v30 = vpop.f32.mrf.mxu1 }
0x1814   :  { %12196 = vmatprep.subr.mxu0 %v12160_v30 }
0x1815   :  { %v5365_v55 = vpop.f32.mrf.mxu1 }
0x1816   :  { %12176 = vmatprep.mubr.msk.f32.mxu0 %vm214_vm1, %v5365_v55 }
0x1817   :  { %v12167_v52 = vpop.f32.mrf.mxu1  ;;  %12177 = vmatmul.mubr.msk.f32.vlgmr.msra.gmra.mxu0 %vm214_vm1, %v12160_v30 }
0x1818   :  { %12197 = vmatpush3.msra.mxu0 %v12160_v30  ;;  %12203 = vmatprep.subr.mxu1 %v12167_v52 }
0x1819   :  { %12198 = vmatprep.subr.mxu0 %v5365_v55  ;;  %v5440_v61 = vpop.f32.mrf.mxu1  ;;  %12204 = vmatpush3.msra.mxu1 %v12167_v52 }
0x181a   :  { %12199 = vmatpush3.msra.mxu0 %v5365_v55  ;;  %12179 = vmatprep.mubr.msk.f32.mxu0 %vm214_vm1, %v5440_v61 }
0x181b   :  { %12205 = vmatprep.subr.mxu1 %v5440_v61  ;;  %12180 = vmatmul.mubr.msk.f32.gmra.mxu0 %vm214_vm1, %v12167_v52 }
0x181c   :  { %12206 = vmatpush3.msra.mxu1 %v5440_v61  ;;  %12200 = vmatprep.mubr.msk.f32.mxu0 %vm57_vm0, %v14314_v37 }
0x181d   :  { %12208 = vmatmul.mubr.msk.f32.vlgmr.msra.gmra.mxu1 %vm57_vm0, %v14303_v49  ;;  %12210 = vmatprep.subr.mxu0 %v14376_v31 }
0x181e   :  { %12228 = vmatprep.mubr.msk.f32.mxu1 %vm57_vm0, %v14314_v37 }
0x181f   :  { %12201 = vmatmul.mubr.msk.f32.vlgmr.msra.gmra.mxu0 %vm57_vm0, %v14303_v49  ;;  %v12192_v45 = vpop.f32.mrf.mxu1 }
0x1820   :  { %12211 = vmatpush3.msra.mxu0 %v14376_v31 }
0x1821   :  { %12212 = vmatprep.subr.mxu0 %v14387_v59  ;;  %v5620_v29 = vpop.f32.mrf.mxu1 }
0x1822   :  { %12213 = vmatpush3.msra.mxu0 %v14387_v59 }
0x1823   :  { %12214 = vmatprep.subr.mxu0 %v14394_v32  ;;  %v12195_v6 = vpop.f32.mrf.mxu1 }
0x1824   :  { %12215 = vmatpush3.msra.mxu0 %v14394_v32 }
0x1825   :  { %12216 = vmatprep.subr.mxu0 %v14401_v33  ;;  %v5630_v10 = vpop.f32.mrf.mxu1 }
0x1826   :  { %12217 = vmatpush3.msra.mxu0 %v14401_v33 }
0x1827   :  { %12238 = vmatprep.subr.mxu0 %v14408_v1 }
0x18d7   :  { %v12178_v8 = vpop.f32.mrf.mxu0 }
0x18d8   :  { %v5626_v39 = vadd.f32 %v12192_v45, %v12178_v8 }
0x18d9   :  { %v5527_v41 = vpop.f32.mrf.mxu0 }
0x18da   :  { %v5621_v16 = vadd.f32 %v5620_v29, %v5527_v41 }
0x18db   :  { %v12181_v48 = vpop.f32.mrf.mxu0 }
0x18dc   :  { %v5636_v35 = vadd.f32 %v12195_v6, %v12181_v48 }
0x18dd   :  { %v12209_v53 = vpop.f32.mrf.mxu1  ;;  %v5537_v12 = vpop.f32.mrf.mxu0 }
0x18de   :  { %v5631_v27 = vadd.f32 %v5630_v10, %v5537_v12  ;;  %v5792_v19 = vmul.f32 2.0, %v12209_v53 }
0x18df   :  { %v5780_v50 = vpop.f32.mrf.mxu1  ;;  %v12202_v23 = vpop.f32.mrf.mxu0 }
0x18e0   :  { %v5790_v38 = vmul.f32 2.0, %v12202_v23  ;;  %v5791_v54 = vmul.f32 2.0, %v5780_v50  ;;  %v5796_v20 = vsub.f32 %v5792_v19, %v14292_v4  ;;  %v14505_v19 = vld [vmem:[%s15486_s5 + $0x8] sm:$0xff] }
0x18e1   :  { %v5705_v24 = vpop.f32.mrf.mxu0 }
0x18e2   :  { %v5789_v46 = vmul.f32 2.0, %v5705_v24  ;;  %v5794_v58 = vsub.f32 %v5790_v38, %v14275_v11  ;;  %v5795_v7 = vsub.f32 %v5791_v54, %v14309_v26 }
0x18e4   :  { %v5793_v62 = vsub.f32 %v5789_v46, %v14284_v56 }
0x18e6   :  { %12218 = vmatprep.mubr.msk.f32.mxu0 %vm214_vm1, %v5793_v62 }
0x18e7   :  { %12219 = vmatmul.mubr.msk.f32.vlgmr.msra.gmra.mxu0 %vm214_vm1, %v5794_v58  ;;  %v14512_v58 = vld [vmem:[%s15486_s5] sm:$0xff] }
0x18e8   :  { %12221 = vmatprep.mubr.msk.f32.mxu0 %vm214_vm1, %v5795_v7  ;;  %12239 = vmatpush3.msra.mxu0 %v14408_v1 }
0x18e9   :  { %12240 = vmatprep.subr.mxu0 %v14422_v43 }
0x18ea   :  { %12241 = vmatpush3.msra.mxu0 %v14422_v43 }
0x18eb   :  { %12222 = vmatmul.mubr.msk.f32.gmra.mxu0 %vm214_vm1, %v5796_v20  ;;  %12242 = vmatprep.subr.mxu0 %v14430_v44 }
0x18ec   :  { %12243 = vmatpush3.msra.mxu0 %v14430_v44 }
0x18ed   :  { %12244 = vmatprep.subr.mxu0 %v14113_v25 }
0x18ee   :  { %12245 = vmatpush3.msra.mxu0 %v14113_v25  ;;  %v10733_v25 = vld [vmem:[%s15487_s1 + $0x98] sm:$0xff] }
0x19a7   :  { %v12220_v63 = vpop.f32.mrf.mxu0 }
0x19a8   :  { %v5895_v14 = vadd.f32 %v12220_v63, %v5626_v39  ;;  %v14535_v63 = vld [vmem:[%s15486_s5 + $0x58] sm:$0xff] }
0x19a9   :  { %v5875_v18 = vpop.f32.mrf.mxu0 }
0x19aa   :  { %v5899_v15 = vadd.f32 %v10731_v21, %v5895_v14  ;;  %v5894_v9 = vadd.f32 %v5875_v18, %v5621_v16  ;;  %v14546_v16 = vld [vmem:[%s15486_s5 + $0x50] sm:$0xff]  ;;  %v14553_v14 = vld [vmem:[%s15486_s5 + $0x48] sm:$0xff] }
0x19ab   :  { %v12223_v0 = vpop.f32.mrf.mxu0 }
0x19ac   :  { %v10755_v34 = vmul.f32 -1.442695, %v5899_v15  ;;  %v5898_v2 = vadd.f32 %v10730_v57, %v5894_v9  ;;  %v5897_v13 = vadd.f32 %v12223_v0, %v5636_v35  ;;  %v14560_v57 = vld [vmem:[%s15486_s5 + $0x40] sm:$0xff] }
0x19ad   :  { %v5885_v30 = vpop.f32.mrf.mxu0 }
0x19ae   :  { %12812 = vpow2.f32 %v10755_v34  ;;  %v10754_v55 = vmul.f32 -1.442695, %v5898_v2  ;;  %v5901_v52 = vadd.f32 %v10733_v25, %v5897_v13  ;;  %v5896_v61 = vadd.f32 %v5885_v30, %v5631_v27 }
0x19b0   :  { %12814 = vpow2.f32 %v10754_v55  ;;  %v10757_v45 = vmul.f32 -1.442695, %v5901_v52  ;;  %v5900_v29 = vadd.f32 %v10732_v5, %v5896_v61 }
0x19b2   :  { %12816 = vpow2.f32 %v10757_v45  ;;  %v10756_v6 = vmul.f32 -1.442695, %v5900_v29 }
0x19b4   :  { %12818 = vpow2.f32 %v10756_v6 }
0x19bb   :  { %v12813_v8 = vpop.eup %12812 }
0x19bc   :  { %v5915_v41 = vadd.f32 1.0, %v12813_v8 }
0x19bd   :  { %v12815_v10 = vpop.eup %12814 }
0x19be   :  { %12820 = vrcp.f32 %v5915_v41  ;;  %v5914_v48 = vadd.f32 1.0, %v12815_v10 }
0x19bf   :  { %v12817_v53 = vpop.eup %12816 }
0x19c0   :  { %12822 = vrcp.f32 %v5914_v48  ;;  %v5917_v12 = vadd.f32 1.0, %v12817_v53  ;;  %v14579_v53 = vld [vmem:[%s15485_s4 + $0x28] sm:$0xff] }
0x19c1   :  { %v12819_v50 = vpop.eup %12818 }
0x19c2   :  { %12824 = vrcp.f32 %v5917_v12  ;;  %v5916_v23 = vadd.f32 1.0, %v12819_v50  ;;  %v10759_v12 = vld [vmem:[%s15488_s2 + $0x88] sm:$0xff] }
0x19c4   :  { %12826 = vrcp.f32 %v5916_v23 }
0x19cb   :  { %v14448_v38 = vpop.eup %12820 }
0x19cc   :  { %v14452_v27 = vmul.f32 %v14448_v38, %v14275_v11 }
0x19cd   :  { %v14454_v24 = vpop.eup %12822 }
0x19ce   :  { %12224 = vmatprep.subr.mxu1 %v14452_v27  ;;  %v14459_v54 = vmul.f32 %v14454_v24, %v14284_v56 }
0x19cf   :  { %v14461_v46 = vpop.eup %12824  ;;  %12225 = vmatpush3.msra.mxu1 %v14452_v27 }
0x19d0   :  { %12226 = vmatprep.subr.mxu1 %v14459_v54  ;;  %v14467_v62 = vmul.f32 %v14461_v46, %v14292_v4  ;;  %v14489_v4 = vld [vmem:[%s15486_s5 + $0x18] sm:$0xff] }
0x19d1   :  { %v14469_v11 = vpop.eup %12826  ;;  %12227 = vmatpush3.msra.mxu1 %v14459_v54 }
0x19d2   :  { %12229 = vmatmul.mubr.msk.f32.vlgmr.msra.gmra.mxu1 %vm57_vm0, %v14303_v49  ;;  %12231 = vmatprep.subr.mxu1 %v14467_v62  ;;  %v14477_v56 = vmul.f32 %v14469_v11, %v14309_v26  ;;  %v14498_v26 = vld [vmem:[%s15486_s5 + $0x10] sm:$0xff] }
0x19d3   :  { %12232 = vmatpush3.msra.mxu1 %v14467_v62  ;;  %12235 = vmatprep.mubr.msk.f32.mxu1 %vm57_vm0, %v14314_v37 }
0x19d4   :  { %12233 = vmatprep.subr.mxu1 %v14477_v56 }
0x19d5   :  { %12234 = vmatpush3.msra.mxu1 %v14477_v56 }
0x19d6   :  { %12236 = vmatmul.mubr.msk.f32.vlgmr.msra.gmra.mxu1 %vm57_vm0, %v14303_v49  ;;  %12252 = vmatprep.subr.mxu1 %v14489_v4 }
0x19d7   :  { %12253 = vmatpush3.msra.mxu1 %v14489_v4  ;;  %12260 = vmatprep.mubr.msk.f32.mxu1 %vm214_vm1, %v14459_v54 }
0x19d8   :  { %12254 = vmatprep.subr.mxu1 %v14498_v26 }
0x19d9   :  { %12255 = vmatpush3.msra.mxu1 %v14498_v26 }
0x19da   :  { %12256 = vmatprep.subr.mxu1 %v14505_v19 }
0x19db   :  { %12257 = vmatpush3.msra.mxu1 %v14505_v19 }
0x19dc   :  { %12258 = vmatprep.subr.mxu1 %v14512_v58 }
0x19dd   :  { %12259 = vmatpush3.msra.mxu1 %v14512_v58 }
0x19de   :  { %12261 = vmatmul.mubr.msk.f32.vlgmr.msra.gmra.mxu1 %vm214_vm1, %v14452_v27 }
0x19df   :  { %12263 = vmatprep.mubr.msk.f32.mxu1 %vm214_vm1, %v14477_v56 }
0x19e2   :  { %12264 = vmatmul.mubr.msk.f32.gmra.mxu1 %vm214_vm1, %v14467_v62 }
0x19e3   :  { %12277 = vmatprep.mubr.msk.f32.mxu1 %vm57_vm0, %v14314_v37 }
0x1a92   :  { %v12230_v7 = vpop.f32.mrf.mxu1 }
0x1a93   :  { %12266 = vmatprep.subr.mxu0 %v12230_v7 }
0x1a94   :  { %v6001_v20 = vpop.f32.mrf.mxu1 }
0x1a95   :  { %12246 = vmatprep.mubr.msk.f32.mxu0 %vm214_vm1, %v6001_v20 }
0x1a96   :  { %v12237_v39 = vpop.f32.mrf.mxu1  ;;  %12247 = vmatmul.mubr.msk.f32.vlgmr.msra.gmra.mxu0 %vm214_vm1, %v12230_v7 }
0x1a97   :  { %12267 = vmatpush3.msra.mxu0 %v12230_v7  ;;  %12273 = vmatprep.subr.mxu1 %v12237_v39 }
0x1a98   :  { %12268 = vmatprep.subr.mxu0 %v6001_v20  ;;  %v6076_v21 = vpop.f32.mrf.mxu1  ;;  %12274 = vmatpush3.msra.mxu1 %v12237_v39 }
0x1a99   :  { %12269 = vmatpush3.msra.mxu0 %v6001_v20  ;;  %12249 = vmatprep.mubr.msk.f32.mxu0 %vm214_vm1, %v6076_v21 }
0x1a9a   :  { %12275 = vmatprep.subr.mxu1 %v6076_v21  ;;  %12250 = vmatmul.mubr.msk.f32.gmra.mxu0 %vm214_vm1, %v12237_v39  ;;  %v10761_v39 = vld [vmem:[%s15488_s2 + $0x98] sm:$0xff] }
0x1a9b   :  { %12276 = vmatpush3.msra.mxu1 %v6076_v21  ;;  %12270 = vmatprep.mubr.msk.f32.mxu0 %vm57_vm0, %v14314_v37 }
0x1a9c   :  { %12278 = vmatmul.mubr.msk.f32.vlgmr.msra.gmra.mxu1 %vm57_vm0, %v14303_v49  ;;  %12280 = vmatprep.subr.mxu0 %v14535_v63 }
0x1a9d   :  { %12298 = vmatprep.mubr.msk.f32.mxu1 %vm57_vm0, %v14314_v37 }
0x1a9e   :  { %12271 = vmatmul.mubr.msk.f32.vlgmr.msra.gmra.mxu0 %vm57_vm0, %v14303_v49  ;;  %v12262_v18 = vpop.f32.mrf.mxu1 }
0x1a9f   :  { %12281 = vmatpush3.msra.mxu0 %v14535_v63 }
0x1aa0   :  { %12282 = vmatprep.subr.mxu0 %v14546_v16  ;;  %v6260_v35 = vpop.f32.mrf.mxu1 }
0x1aa1   :  { %12283 = vmatpush3.msra.mxu0 %v14546_v16 }
0x1aa2   :  { %12284 = vmatprep.subr.mxu0 %v14553_v14  ;;  %v12265_v15 = vpop.f32.mrf.mxu1 }
0x1aa3   :  { %12285 = vmatpush3.msra.mxu0 %v14553_v14 }
0x1aa4   :  { %12286 = vmatprep.subr.mxu0 %v14560_v57  ;;  %v6270_v0 = vpop.f32.mrf.mxu1 }
0x1aa5   :  { %12287 = vmatpush3.msra.mxu0 %v14560_v57 }
0x1aa6   :  { %12308 = vmatprep.subr.mxu0 %v14208_v22 }
0x1b56   :  { %v12248_v9 = vpop.f32.mrf.mxu0 }
0x1b58   :  { %v6163_v25 = vpop.f32.mrf.mxu0 }
0x1b59   :  { %v6261_v23 = vadd.f32 %v6260_v35, %v6163_v25  ;;  %v10760_v35 = vld [vmem:[%s15488_s2 + $0x90] sm:$0xff] }
0x1b5a   :  { %v12251_v34 = vpop.f32.mrf.mxu0 }
0x1b5c   :  { %v12279_v2 = vpop.f32.mrf.mxu1  ;;  %v6173_v13 = vpop.f32.mrf.mxu0 }
0x1b5d   :  { %v6271_v5 = vadd.f32 %v6270_v0, %v6173_v13  ;;  %v6432_v8 = vmul.f32 2.0, %v12279_v2 }
0x1b5e   :  { %v6420_v30 = vpop.f32.mrf.mxu1  ;;  %v12272_v55 = vpop.f32.mrf.mxu0 }
0x1b5f   :  { %v6430_v52 = vmul.f32 2.0, %v12272_v55  ;;  %v6431_v45 = vmul.f32 2.0, %v6420_v30  ;;  %v6436_v48 = vsub.f32 %v6432_v8, %v14467_v62 }
0x1b60   :  { %v6345_v61 = vpop.f32.mrf.mxu0 }
0x1b61   :  { %v6429_v29 = vmul.f32 2.0, %v6345_v61  ;;  %v6434_v41 = vsub.f32 %v6430_v52, %v14452_v27  ;;  %v6435_v10 = vsub.f32 %v6431_v45, %v14477_v56  ;;  %v6276_v56 = vadd.f32 %v12265_v15, %v12251_v34 }
0x1b62   :  { %v6551_v52 = vsub.f32 1.0, %v14448_v38 }
0x1b63   :  { %v6433_v6 = vsub.f32 %v6429_v29, %v14459_v54  ;;  %v10758_v54 = vld [vmem:[%s15488_s2 + $0x80] sm:$0xff]  ;;  %v6550_v29 = vsub.f32 1.0, %v14454_v24 }
0x1b65   :  { %12288 = vmatprep.mubr.msk.f32.mxu0 %vm214_vm1, %v6433_v6 }
0x1b66   :  { %12289 = vmatmul.mubr.msk.f32.vlgmr.msra.gmra.mxu0 %vm214_vm1, %v6434_v41  ;;  %v6546_v41 = vmul.f32 %v14454_v24, %v14256_v60  ;;  %v6548_v60 = vmul.f32 %v14469_v11, %v14269_v40 }
0x1b67   :  { %12291 = vmatprep.mubr.msk.f32.mxu0 %vm214_vm1, %v6435_v10  ;;  %12309 = vmatpush3.msra.mxu0 %v14208_v22  ;;  %v14586_v22 = vld [vmem:[%s15485_s4 + $0x20] sm:$0xff] }
0x1b68   :  { %12310 = vmatprep.subr.mxu0 %v14222_v36 }
0x1b69   :  { %12311 = vmatpush3.msra.mxu0 %v14222_v36  ;;  %v6266_v36 = vadd.f32 %v12262_v18, %v12248_v9 }
0x1b6a   :  { %12292 = vmatmul.mubr.msk.f32.gmra.mxu0 %vm214_vm1, %v6436_v48  ;;  %12312 = vmatprep.subr.mxu0 %v14579_v53  ;;  %v6553_v48 = vsub.f32 1.0, %v14461_v46 }
0x1b6b   :  { %12313 = vmatpush3.msra.mxu0 %v14579_v53 }
0x1b6c   :  { %12314 = vmatprep.subr.mxu0 %v14586_v22 }
0x1b6d   :  { %12315 = vmatpush3.msra.mxu0 %v14586_v22 }
0x1c26   :  { %v12290_v50 = vpop.f32.mrf.mxu0 }
0x1c27   :  { %v6535_v27 = vadd.f32 %v12290_v50, %v6266_v36  ;;  %v6549_v50 = vmul.f32 %v14461_v46, %v14263_v47 }
0x1c28   :  { %v6515_v62 = vpop.f32.mrf.mxu0 }
0x1c29   :  { %v6539_v7 = vadd.f32 %v10759_v12, %v6535_v27  ;;  %v6534_v20 = vadd.f32 %v6515_v62, %v6261_v23 }
0x1c2a   :  { %v12293_v21 = vpop.f32.mrf.mxu0 }
0x1c2b   :  { %12828 = vtanh.f32 %v6539_v7  ;;  %v6538_v18 = vadd.f32 %v10758_v54, %v6534_v20  ;;  %v6537_v9 = vadd.f32 %v12293_v21, %v6276_v56 }
0x1c2c   :  { %v6525_v25 = vpop.f32.mrf.mxu0 }
0x1c2d   :  { %12830 = vtanh.f32 %v6538_v18  ;;  %v6541_v0 = vadd.f32 %v10761_v39, %v6537_v9  ;;  %v6536_v2 = vadd.f32 %v6525_v25, %v6271_v5  ;;  %v6547_v5 = vmul.f32 %v14448_v38, %v14251_v17 }
0x1c2e   :  { %v6552_v17 = vsub.f32 1.0, %v14469_v11 }
0x1c2f   :  { %12832 = vtanh.f32 %v6541_v0  ;;  %v6540_v15 = vadd.f32 %v10760_v35, %v6536_v2 }
0x1c31   :  { %12834 = vtanh.f32 %v6540_v15 }
0x1c38   :  { %v12829_v34 = vpop.eup %12828 }
0x1c39   :  { %6560 = vrot.lane.b32.xlu0 %v12829_v34, %s12986_s8 }
0x1c3a   :  { %v12831_v13 = vpop.eup %12830 }
0x1c3b   :  { %6558 = vrot.lane.b32.xlu1 %v12831_v13, %s12986_s8 }
0x1c3c   :  { %v12833_v30 = vpop.eup %12832 }
0x1c3d   :  { %6564 = vrot.lane.b32.xlu0 %v12833_v30, %s12986_s8 }
0x1c3e   :  { %v12835_v55 = vpop.eup %12834 }
0x1c3f   :  { %6562 = vrot.lane.b32.xlu1 %v12835_v55, %s12986_s8 }
0x1cab   :  { %v6561_v61 = vpop.permute.xlu0 %6560 }
0x1cac   :  { %v6571_v45 = vmul.f32 %v6561_v61, %v6551_v52  ;;  %v14731_v52 = vld [vmem:[%s15486_s5 + $0x20] sm:$0xff] }
0x1cad   :  { %v6559_v6 = vpop.permute.xlu1 %6558 }
0x1cae   :  { %v14610_v8 = vadd.f32 %v6571_v45, %v6547_v5  ;;  %v6570_v10 = vmul.f32 %v6559_v6, %v6550_v29 }
0x1caf   :  { %v6565_v36 = vpop.permute.xlu0 %6564 }
0x1cb0   :  { %v14615_v12 = vadd.f32 %v6570_v10, %v6546_v41  ;;  %v6573_v23 = vmul.f32 %v6565_v36, %v6553_v48  ;;  %6584 = vrot.lane.b32.xlu0 %v14610_v8, %s12987_s24  ;;  %v10789_v48 = vld [vmem:[%s15487_s1 + $0xb8] sm:$0xff] }
0x1cb1   :  { %v6563_v38 = vpop.permute.xlu1 %6562 }
0x1cb2   :  { %v14622_v27 = vadd.f32 %v6573_v23, %v6549_v50  ;;  %v6572_v24 = vmul.f32 %v6563_v38, %v6552_v17  ;;  %6582 = vrot.lane.b32.xlu1 %v14615_v12, %s12987_s24  ;;  %v10788_v38 = vld [vmem:[%s15487_s1 + $0xb0] sm:$0xff] }
0x1cb4   :  { %v14628_v54 = vadd.f32 %v6572_v24, %v6548_v60  ;;  %6588 = vrot.lane.b32.xlu0 %v14622_v27, %s12987_s24 }
0x1cb6   :  { %6586 = vrot.lane.b32.xlu1 %v14628_v54, %s12987_s24 }
0x1d22   :  { %v14634_v47 = vpop.permute.xlu0 %6584 }
0x1d23   :  { %10783 = vst.msk [vmem:[%s15489_s6 + $0x88] sm:$0xff] %vm214_vm1, %v14634_v47  ;;  %12294 = vmatprep.subr.mxu1 %v14634_v47 }
0x1d24   :  { %12295 = vmatpush3.msra.mxu1 %v14634_v47  ;;  %v14643_v40 = vpop.permute.xlu1 %6582 }
0x1d25   :  { %10782 = vst.msk [vmem:[%s15489_s6 + $0x80] sm:$0xff] %vm214_vm1, %v14643_v40  ;;  %12296 = vmatprep.subr.mxu1 %v14643_v40 }
0x1d26   :  { %v14651_v46 = vpop.permute.xlu0 %6588  ;;  %12297 = vmatpush3.msra.mxu1 %v14643_v40 }
0x1d27   :  { %10785 = vst.msk [vmem:[%s15489_s6 + $0x98] sm:$0xff] %vm214_vm1, %v14651_v46  ;;  %12299 = vmatmul.mubr.msk.f32.vlgmr.msra.gmra.mxu1 %vm57_vm0, %v14303_v49  ;;  %12301 = vmatprep.subr.mxu1 %v14651_v46 }
0x1d28   :  { %12302 = vmatpush3.msra.mxu1 %v14651_v46  ;;  %v14663_v11 = vpop.permute.xlu1 %6586  ;;  %12305 = vmatprep.mubr.msk.f32.mxu1 %vm57_vm0, %v14314_v37 }
0x1d29   :  { %10784 = vst.msk [vmem:[%s15489_s6 + $0x90] sm:$0xff] %vm214_vm1, %v14663_v11  ;;  %12303 = vmatprep.subr.mxu1 %v14663_v11 }
0x1d2a   :  { %12304 = vmatpush3.msra.mxu1 %v14663_v11 }
0x1d2b   :  { %12306 = vmatmul.mubr.msk.f32.vlgmr.msra.gmra.mxu1 %vm57_vm0, %v14303_v49  ;;  %12322 = vmatprep.subr.mxu1 %v14330_v28 }
0x1d2c   :  { %12323 = vmatpush3.msra.mxu1 %v14330_v28  ;;  %12330 = vmatprep.mubr.msk.f32.mxu1 %vm214_vm1, %v14643_v40 }
0x1d2d   :  { %12324 = vmatprep.subr.mxu1 %v14339_v51 }
0x1d2e   :  { %12325 = vmatpush3.msra.mxu1 %v14339_v51 }
0x1d2f   :  { %12326 = vmatprep.subr.mxu1 %v14346_v3 }
0x1d30   :  { %12327 = vmatpush3.msra.mxu1 %v14346_v3 }
0x1d31   :  { %12328 = vmatprep.subr.mxu1 %v14353_v42 }
0x1d32   :  { %12329 = vmatpush3.msra.mxu1 %v14353_v42 }
0x1d33   :  { %12331 = vmatmul.mubr.msk.f32.vlgmr.msra.gmra.mxu1 %vm214_vm1, %v14634_v47 }
0x1d34   :  { %12333 = vmatprep.mubr.msk.f32.mxu1 %vm214_vm1, %v14663_v11 }
0x1d37   :  { %12334 = vmatmul.mubr.msk.f32.gmra.mxu1 %vm214_vm1, %v14651_v46 }
0x1d38   :  { %12347 = vmatprep.mubr.msk.f32.mxu1 %vm57_vm0, %v14314_v37 }
0x1de7   :  { %v12300_v28 = vpop.f32.mrf.mxu1 }
0x1de8   :  { %12336 = vmatprep.subr.mxu0 %v12300_v28 }
0x1de9   :  { %v6670_v51 = vpop.f32.mrf.mxu1 }
0x1dea   :  { %12316 = vmatprep.mubr.msk.f32.mxu0 %vm214_vm1, %v6670_v51 }
0x1deb   :  { %v12307_v3 = vpop.f32.mrf.mxu1  ;;  %12317 = vmatmul.mubr.msk.f32.vlgmr.msra.gmra.mxu0 %vm214_vm1, %v12300_v28 }
0x1dec   :  { %12337 = vmatpush3.msra.mxu0 %v12300_v28  ;;  %12343 = vmatprep.subr.mxu1 %v12307_v3 }
0x1ded   :  { %12338 = vmatprep.subr.mxu0 %v6670_v51  ;;  %v6745_v42 = vpop.f32.mrf.mxu1  ;;  %12344 = vmatpush3.msra.mxu1 %v12307_v3 }
0x1dee   :  { %12339 = vmatpush3.msra.mxu0 %v6670_v51  ;;  %12319 = vmatprep.mubr.msk.f32.mxu0 %vm214_vm1, %v6745_v42 }
0x1def   :  { %12345 = vmatprep.subr.mxu1 %v6745_v42  ;;  %12320 = vmatmul.mubr.msk.f32.gmra.mxu0 %vm214_vm1, %v12307_v3 }
0x1df0   :  { %12346 = vmatpush3.msra.mxu1 %v6745_v42  ;;  %12340 = vmatprep.mubr.msk.f32.mxu0 %vm57_vm0, %v14314_v37 }
0x1df1   :  { %12348 = vmatmul.mubr.msk.f32.vlgmr.msra.gmra.mxu1 %vm57_vm0, %v14303_v49  ;;  %12350 = vmatprep.subr.mxu0 %v14376_v31 }
0x1df2   :  { %12368 = vmatprep.mubr.msk.f32.mxu1 %vm57_vm0, %v14314_v37 }
0x1df3   :  { %12341 = vmatmul.mubr.msk.f32.vlgmr.msra.gmra.mxu0 %vm57_vm0, %v14303_v49  ;;  %v12332_v62 = vpop.f32.mrf.mxu1 }
0x1df4   :  { %12351 = vmatpush3.msra.mxu0 %v14376_v31 }
0x1df5   :  { %12352 = vmatprep.subr.mxu0 %v14387_v59  ;;  %v6925_v56 = vpop.f32.mrf.mxu1 }
0x1df6   :  { %12353 = vmatpush3.msra.mxu0 %v14387_v59 }
0x1df7   :  { %12354 = vmatprep.subr.mxu0 %v14394_v32  ;;  %v12335_v7 = vpop.f32.mrf.mxu1 }
0x1df8   :  { %12355 = vmatpush3.msra.mxu0 %v14394_v32 }
0x1df9   :  { %12356 = vmatprep.subr.mxu0 %v14401_v33  ;;  %v6935_v31 = vpop.f32.mrf.mxu1 }
0x1dfa   :  { %12357 = vmatpush3.msra.mxu0 %v14401_v33 }
0x1dfb   :  { %12378 = vmatprep.subr.mxu0 %v14408_v1 }
0x1eab   :  { %v12318_v20 = vpop.f32.mrf.mxu0 }
0x1ead   :  { %v6832_v39 = vpop.f32.mrf.mxu0 }
0x1eae   :  { %v6926_v5 = vadd.f32 %v6925_v56, %v6832_v39 }
0x1eaf   :  { %v12321_v21 = vpop.f32.mrf.mxu0 }
0x1eb0   :  { %v6941_v6 = vadd.f32 %v12335_v7, %v12321_v21 }
0x1eb1   :  { %v12349_v18 = vpop.f32.mrf.mxu1  ;;  %v6842_v9 = vpop.f32.mrf.mxu0 }
0x1eb2   :  { %v6936_v59 = vadd.f32 %v6935_v31, %v6842_v9  ;;  %v7097_v34 = vmul.f32 2.0, %v12349_v18 }
0x1eb3   :  { %v7085_v35 = vpop.f32.mrf.mxu1  ;;  %v12342_v25 = vpop.f32.mrf.mxu0 }
0x1eb4   :  { %v7095_v0 = vmul.f32 2.0, %v12342_v25  ;;  %v7096_v2 = vmul.f32 2.0, %v7085_v35  ;;  %v7101_v55 = vsub.f32 %v7097_v34, %v14651_v46 }
0x1eb5   :  { %v7010_v32 = vpop.f32.mrf.mxu0 }
0x1eb6   :  { %v7094_v15 = vmul.f32 2.0, %v7010_v32  ;;  %v7099_v13 = vsub.f32 %v7095_v0, %v14634_v47  ;;  %v7100_v30 = vsub.f32 %v7096_v2, %v14663_v11 }
0x1eb8   :  { %v7098_v33 = vsub.f32 %v7094_v15, %v14643_v40 }
0x1eba   :  { %12358 = vmatprep.mubr.msk.f32.mxu0 %vm214_vm1, %v7098_v33 }
0x1ebb   :  { %12359 = vmatmul.mubr.msk.f32.vlgmr.msra.gmra.mxu0 %vm214_vm1, %v7099_v13 }
0x1ebc   :  { %12361 = vmatprep.mubr.msk.f32.mxu0 %vm214_vm1, %v7100_v30  ;;  %12379 = vmatpush3.msra.mxu0 %v14408_v1  ;;  %v6931_v1 = vadd.f32 %v12332_v62, %v12318_v20 }
0x1ebd   :  { %12380 = vmatprep.subr.mxu0 %v14422_v43 }
0x1ebe   :  { %12381 = vmatpush3.msra.mxu0 %v14422_v43  ;;  %v10787_v43 = vld [vmem:[%s15487_s1 + $0xa8] sm:$0xff] }
0x1ebf   :  { %12362 = vmatmul.mubr.msk.f32.gmra.mxu0 %vm214_vm1, %v7101_v55  ;;  %12382 = vmatprep.subr.mxu0 %v14430_v44 }
0x1ec0   :  { %12383 = vmatpush3.msra.mxu0 %v14430_v44  ;;  %v10786_v44 = vld [vmem:[%s15487_s1 + $0xa0] sm:$0xff] }
0x1ec1   :  { %12384 = vmatprep.subr.mxu0 %v14731_v52 }
0x1ec2   :  { %12385 = vmatpush3.msra.mxu0 %v14731_v52 }
0x1f7b   :  { %v12360_v61 = vpop.f32.mrf.mxu0 }
0x1f7c   :  { %v7200_v45 = vadd.f32 %v12360_v61, %v6931_v1 }
0x1f7d   :  { %v7180_v29 = vpop.f32.mrf.mxu0 }
0x1f7e   :  { %v7204_v41 = vadd.f32 %v10787_v43, %v7200_v45  ;;  %v7199_v10 = vadd.f32 %v7180_v29, %v6926_v5 }
0x1f7f   :  { %v12363_v36 = vpop.f32.mrf.mxu0 }
0x1f80   :  { %v10811_v50 = vmul.f32 -1.442695, %v7204_v41  ;;  %v7203_v23 = vadd.f32 %v10786_v44, %v7199_v10  ;;  %v7202_v17 = vadd.f32 %v12363_v36, %v6941_v6  ;;  %v14840_v41 = vld [vmem:[%s15485_s4 + $0x30] sm:$0xff] }
0x1f81   :  { %v7190_v60 = vpop.f32.mrf.mxu0 }
0x1f82   :  { %12836 = vpow2.f32 %v10811_v50  ;;  %v10810_v24 = vmul.f32 -1.442695, %v7203_v23  ;;  %v7206_v28 = vadd.f32 %v10789_v48, %v7202_v17  ;;  %v7201_v51 = vadd.f32 %v7190_v60, %v6936_v59  ;;  %v10815_v48 = vld [vmem:[%s15488_s2 + $0xa8] sm:$0xff]  ;;  %v10814_v17 = vld [vmem:[%s15488_s2 + $0xa0] sm:$0xff] }
0x1f84   :  { %12838 = vpow2.f32 %v10810_v24  ;;  %v10813_v3 = vmul.f32 -1.442695, %v7206_v28  ;;  %v7205_v42 = vadd.f32 %v10788_v38, %v7201_v51 }
0x1f86   :  { %12840 = vpow2.f32 %v10813_v3  ;;  %v10812_v62 = vmul.f32 -1.442695, %v7205_v42  ;;  %v10816_v42 = vld [vmem:[%s15488_s2 + $0xb0] sm:$0xff] }
0x1f88   :  { %12842 = vpow2.f32 %v10812_v62 }
0x1f8f   :  { %v12837_v56 = vpop.eup %12836 }
0x1f90   :  { %v7220_v7 = vadd.f32 1.0, %v12837_v56 }
0x1f91   :  { %v12839_v20 = vpop.eup %12838 }
0x1f92   :  { %12844 = vrcp.f32 %v7220_v7  ;;  %v7219_v39 = vadd.f32 1.0, %v12839_v20 }
0x1f93   :  { %v12841_v31 = vpop.eup %12840 }
0x1f94   :  { %12846 = vrcp.f32 %v7219_v39  ;;  %v7222_v21 = vadd.f32 1.0, %v12841_v31 }
0x1f95   :  { %v12843_v18 = vpop.eup %12842 }
0x1f96   :  { %12848 = vrcp.f32 %v7222_v21  ;;  %v7221_v9 = vadd.f32 1.0, %v12843_v18 }
0x1f98   :  { %12850 = vrcp.f32 %v7221_v9 }
0x1f9f   :  { %v14747_v35 = vpop.eup %12844 }
0x1fa0   :  { %v14751_v59 = vmul.f32 %v14747_v35, %v14634_v47  ;;  %v7856_v9 = vsub.f32 1.0, %v14747_v35 }
0x1fa1   :  { %v14753_v25 = vpop.eup %12846 }
0x1fa2   :  { %12364 = vmatprep.subr.mxu1 %v14751_v59  ;;  %v14758_v0 = vmul.f32 %v14753_v25, %v14643_v40 }
0x1fa3   :  { %v14760_v32 = vpop.eup %12848  ;;  %12365 = vmatpush3.msra.mxu1 %v14751_v59 }
0x1fa4   :  { %12366 = vmatprep.subr.mxu1 %v14758_v0  ;;  %v14766_v2 = vmul.f32 %v14760_v32, %v14651_v46 }
0x1fa5   :  { %v14768_v47 = vpop.eup %12850  ;;  %12367 = vmatpush3.msra.mxu1 %v14758_v0 }
0x1fa6   :  { %12369 = vmatmul.mubr.msk.f32.vlgmr.msra.gmra.mxu1 %vm57_vm0, %v14303_v49  ;;  %12371 = vmatprep.subr.mxu1 %v14766_v2  ;;  %v14776_v40 = vmul.f32 %v14768_v47, %v14663_v11 }
0x1fa7   :  { %12372 = vmatpush3.msra.mxu1 %v14766_v2  ;;  %12375 = vmatprep.mubr.msk.f32.mxu1 %vm57_vm0, %v14314_v37 }
0x1fa8   :  { %12373 = vmatprep.subr.mxu1 %v14776_v40 }
0x1fa9   :  { %12374 = vmatpush3.msra.mxu1 %v14776_v40 }
0x1faa   :  { %12376 = vmatmul.mubr.msk.f32.vlgmr.msra.gmra.mxu1 %vm57_vm0, %v14303_v49  ;;  %12392 = vmatprep.subr.mxu1 %v14489_v4 }
0x1fab   :  { %12393 = vmatpush3.msra.mxu1 %v14489_v4  ;;  %12400 = vmatprep.mubr.msk.f32.mxu1 %vm214_vm1, %v14758_v0 }
0x1fac   :  { %12394 = vmatprep.subr.mxu1 %v14498_v26 }
0x1fad   :  { %12395 = vmatpush3.msra.mxu1 %v14498_v26 }
0x1fae   :  { %12396 = vmatprep.subr.mxu1 %v14505_v19 }
0x1faf   :  { %12397 = vmatpush3.msra.mxu1 %v14505_v19 }
0x1fb0   :  { %12398 = vmatprep.subr.mxu1 %v14512_v58 }
0x1fb1   :  { %12399 = vmatpush3.msra.mxu1 %v14512_v58 }
0x1fb2   :  { %12401 = vmatmul.mubr.msk.f32.vlgmr.msra.gmra.mxu1 %vm214_vm1, %v14751_v59 }
0x1fb3   :  { %12403 = vmatprep.mubr.msk.f32.mxu1 %vm214_vm1, %v14776_v40 }
0x1fb6   :  { %12404 = vmatmul.mubr.msk.f32.gmra.mxu1 %vm214_vm1, %v14766_v2 }
0x1fb7   :  { %12417 = vmatprep.mubr.msk.f32.mxu1 %vm57_vm0, %v14314_v37 }
0x2066   :  { %v12370_v4 = vpop.f32.mrf.mxu1 }
0x2067   :  { %12406 = vmatprep.subr.mxu0 %v12370_v4 }
0x2068   :  { %v7306_v26 = vpop.f32.mrf.mxu1 }
0x2069   :  { %12386 = vmatprep.mubr.msk.f32.mxu0 %vm214_vm1, %v7306_v26 }
0x206a   :  { %v12377_v19 = vpop.f32.mrf.mxu1  ;;  %12387 = vmatmul.mubr.msk.f32.vlgmr.msra.gmra.mxu0 %vm214_vm1, %v12370_v4 }
0x206b   :  { %12407 = vmatpush3.msra.mxu0 %v12370_v4  ;;  %12413 = vmatprep.subr.mxu1 %v12377_v19 }
0x206c   :  { %12408 = vmatprep.subr.mxu0 %v7306_v26  ;;  %v7381_v58 = vpop.f32.mrf.mxu1  ;;  %12414 = vmatpush3.msra.mxu1 %v12377_v19 }
0x206d   :  { %12409 = vmatpush3.msra.mxu0 %v7306_v26  ;;  %12389 = vmatprep.mubr.msk.f32.mxu0 %vm214_vm1, %v7381_v58 }
0x206e   :  { %12415 = vmatprep.subr.mxu1 %v7381_v58  ;;  %12390 = vmatmul.mubr.msk.f32.gmra.mxu0 %vm214_vm1, %v12377_v19  ;;  %v7851_v19 = vmul.f32 %v14753_v25, %v14615_v12  ;;  %v7853_v12 = vmul.f32 %v14768_v47, %v14628_v54 }
0x206f   :  { %12416 = vmatpush3.msra.mxu1 %v7381_v58  ;;  %12410 = vmatprep.mubr.msk.f32.mxu0 %vm57_vm0, %v14314_v37 }
0x2070   :  { %12418 = vmatmul.mubr.msk.f32.vlgmr.msra.gmra.mxu1 %vm57_vm0, %v14303_v49  ;;  %12420 = vmatprep.subr.mxu0 %v14535_v63 }
0x2071   :  { %12438 = vmatprep.mubr.msk.f32.mxu1 %vm57_vm0, %v14314_v37  ;;  %v14826_v37 = vld [vmem:[%s15485_s4 + $0x38] sm:$0xff] }
0x2072   :  { %12411 = vmatmul.mubr.msk.f32.vlgmr.msra.gmra.mxu0 %vm57_vm0, %v14303_v49  ;;  %v12402_v49 = vpop.f32.mrf.mxu1 }
0x2073   :  { %12421 = vmatpush3.msra.mxu0 %v14535_v63 }
0x2074   :  { %12422 = vmatprep.subr.mxu0 %v14546_v16  ;;  %v7565_v63 = vpop.f32.mrf.mxu1 }
0x2075   :  { %12423 = vmatpush3.msra.mxu0 %v14546_v16 }
0x2076   :  { %12424 = vmatprep.subr.mxu0 %v14553_v14  ;;  %v12405_v46 = vpop.f32.mrf.mxu1 }
0x2077   :  { %12425 = vmatpush3.msra.mxu0 %v14553_v14 }
0x2078   :  { %12426 = vmatprep.subr.mxu0 %v14560_v57  ;;  %v7575_v15 = vpop.f32.mrf.mxu1 }
0x2079   :  { %12427 = vmatpush3.msra.mxu0 %v14560_v57 }
0x207a   :  { %12448 = vmatprep.subr.mxu0 %v14826_v37 }
0x212a   :  { %v12388_v11 = vpop.f32.mrf.mxu0 }
0x212b   :  { %v7571_v10 = vadd.f32 %v12402_v49, %v12388_v11  ;;  %v7858_v49 = vsub.f32 1.0, %v14760_v32  ;;  %v7854_v11 = vmul.f32 %v14760_v32, %v14622_v27 }
0x212c   :  { %v7468_v16 = vpop.f32.mrf.mxu0 }
0x212d   :  { %v7566_v50 = vadd.f32 %v7565_v63, %v7468_v16 }
0x212e   :  { %v12391_v33 = vpop.f32.mrf.mxu0 }
0x212f   :  { %v7581_v60 = vadd.f32 %v12405_v46, %v12391_v33 }
0x2130   :  { %v12419_v34 = vpop.f32.mrf.mxu1  ;;  %v7478_v14 = vpop.f32.mrf.mxu0 }
0x2131   :  { %v7576_v13 = vadd.f32 %v7575_v15, %v7478_v14  ;;  %v7737_v45 = vmul.f32 2.0, %v12419_v34  ;;  %v14932_v14 = vld [vmem:[%s15484_s0] sm:$0xff] }
0x2132   :  { %v7725_v30 = vpop.f32.mrf.mxu1  ;;  %v12412_v55 = vpop.f32.mrf.mxu0 }
0x2133   :  { %v7735_v57 = vmul.f32 2.0, %v12412_v55  ;;  %v7736_v43 = vmul.f32 2.0, %v7725_v30  ;;  %v7741_v6 = vsub.f32 %v7737_v45, %v14766_v2  ;;  %v14957_v30 = vld [vmem:[%s15485_s4 + $0x10] sm:$0xff]  ;;  %v14964_v55 = vld [vmem:[%s15485_s4 + $0x8] sm:$0xff]  ;;  %v14994_v45 = vld [vmem:[%s15485_s4 + $0x58] sm:$0xff] }
0x2134   :  { %v7650_v1 = vpop.f32.mrf.mxu0 }
0x2135   :  { %v7734_v61 = vmul.f32 2.0, %v7650_v1  ;;  %v7739_v44 = vsub.f32 %v7735_v57, %v14751_v59  ;;  %v7740_v29 = vsub.f32 %v7736_v43, %v14776_v40  ;;  %v7855_v40 = vsub.f32 1.0, %v14753_v25  ;;  %v14971_v57 = vld [vmem:[%s15485_s4] sm:$0xff] }
0x2137   :  { %v7738_v5 = vsub.f32 %v7734_v61, %v14758_v0  ;;  %v7852_v0 = vmul.f32 %v14747_v35, %v14610_v8  ;;  %v7857_v8 = vsub.f32 1.0, %v14768_v47  ;;  %v14921_v47 = vld [vmem:[%s15484_s0 + $0x8] sm:$0xff] }
0x2139   :  { %12428 = vmatprep.mubr.msk.f32.mxu0 %vm214_vm1, %v7738_v5 }
0x213a   :  { %12429 = vmatmul.mubr.msk.f32.vlgmr.msra.gmra.mxu0 %vm214_vm1, %v7739_v44  ;;  %v15005_v44 = vld [vmem:[%s15485_s4 + $0x50] sm:$0xff] }
0x213b   :  { %12431 = vmatprep.mubr.msk.f32.mxu0 %vm214_vm1, %v7740_v29  ;;  %12449 = vmatpush3.msra.mxu0 %v14826_v37  ;;  %v15012_v29 = vld [vmem:[%s15485_s4 + $0x48] sm:$0xff] }
0x213c   :  { %12450 = vmatprep.subr.mxu0 %v14840_v41 }
0x213d   :  { %12451 = vmatpush3.msra.mxu0 %v14840_v41 }
0x213e   :  { %12432 = vmatmul.mubr.msk.f32.gmra.mxu0 %vm214_vm1, %v7741_v6  ;;  %12452 = vmatprep.subr.mxu0 %v14579_v53  ;;  %v15019_v6 = vld [vmem:[%s15485_s4 + $0x40] sm:$0xff] }
0x213f   :  { %12453 = vmatpush3.msra.mxu0 %v14579_v53 }
0x2140   :  { %12454 = vmatprep.subr.mxu0 %v14586_v22 }
0x2141   :  { %12455 = vmatpush3.msra.mxu0 %v14586_v22  ;;  %v10817_v22 = vld [vmem:[%s15488_s2 + $0xb8] sm:$0xff] }
0x21fa   :  { %v12430_v36 = vpop.f32.mrf.mxu0 }
0x21fb   :  { %v7840_v23 = vadd.f32 %v12430_v36, %v7571_v10  ;;  %v15026_v10 = vld [vmem:[%s15486_s5 + $0x38] sm:$0xff] }
0x21fc   :  { %v7820_v38 = vpop.f32.mrf.mxu0 }
0x21fd   :  { %v7844_v24 = vadd.f32 %v10815_v48, %v7840_v23  ;;  %v7839_v53 = vadd.f32 %v7820_v38, %v7566_v50 }
0x21fe   :  { %v12433_v28 = vpop.f32.mrf.mxu0 }
0x21ff   :  { %12852 = vtanh.f32 %v7844_v24  ;;  %v7843_v51 = vadd.f32 %v10814_v17, %v7839_v53  ;;  %v7842_v3 = vadd.f32 %v12433_v28, %v7581_v60 }
0x2200   :  { %v7830_v62 = vpop.f32.mrf.mxu0 }
0x2201   :  { %12854 = vtanh.f32 %v7843_v51  ;;  %v7846_v56 = vadd.f32 %v10817_v22, %v7842_v3  ;;  %v7841_v7 = vadd.f32 %v7830_v62, %v7576_v13  ;;  %v14948_v13 = vld [vmem:[%s15485_s4 + $0x18] sm:$0xff] }
0x2203   :  { %12856 = vtanh.f32 %v7846_v56  ;;  %v7845_v20 = vadd.f32 %v10816_v42, %v7841_v7 }
0x2205   :  { %12858 = vtanh.f32 %v7845_v20 }
0x220c   :  { %v12853_v39 = vpop.eup %12852 }
0x220d   :  { %7865 = vrot.lane.b32.xlu0 %v12853_v39, %s12986_s8 }
0x220e   :  { %v12855_v31 = vpop.eup %12854 }
0x220f   :  { %7863 = vrot.lane.b32.xlu1 %v12855_v31, %s12986_s8 }
0x2210   :  { %v12857_v21 = vpop.eup %12856 }
0x2211   :  { %7869 = vrot.lane.b32.xlu0 %v12857_v21, %s12986_s8 }
0x2212   :  { %v12859_v18 = vpop.eup %12858 }
0x2213   :  { %7867 = vrot.lane.b32.xlu1 %v12859_v18, %s12986_s8  ;;  %v15040_v18 = vld [vmem:[%s15486_s5 + $0x30] sm:$0xff] }
0x227f   :  { %v7866_v59 = vpop.permute.xlu0 %7865 }
0x2280   :  { %v7876_v2 = vmul.f32 %v7866_v59, %v7856_v9  ;;  %v15048_v9 = vld [vmem:[%s15486_s5 + $0x28] sm:$0xff] }
0x2281   :  { %v7864_v4 = vpop.permute.xlu1 %7863 }
0x2282   :  { %v14869_v26 = vadd.f32 %v7876_v2, %v7852_v0  ;;  %v7875_v58 = vmul.f32 %v7864_v4, %v7855_v40  ;;  %v10843_v0 = vld [vmem:[%s15487_s1 + $0xc8] sm:$0xff] }
0x2283   :  { %v7870_v63 = vpop.permute.xlu0 %7869 }
0x2284   :  { %v14874_v46 = vadd.f32 %v7875_v58, %v7851_v19  ;;  %v7878_v16 = vmul.f32 %v7870_v63, %v7858_v49  ;;  %7889 = vrot.lane.b32.xlu0 %v14869_v26, %s12987_s24  ;;  %v10842_v19 = vld [vmem:[%s15487_s1 + $0xc0] sm:$0xff] }
0x2285   :  { %v7868_v35 = vpop.permute.xlu1 %7867 }
0x2286   :  { %v14881_v15 = vadd.f32 %v7878_v16, %v7854_v11  ;;  %v7877_v25 = vmul.f32 %v7868_v35, %v7857_v8  ;;  %7887 = vrot.lane.b32.xlu1 %v14874_v46, %s12987_s24 }
0x2288   :  { %v14887_v33 = vadd.f32 %v7877_v25, %v7853_v12  ;;  %7893 = vrot.lane.b32.xlu0 %v14881_v15, %s12987_s24  ;;  %v10844_v25 = vld [vmem:[%s15487_s1 + $0xd0] sm:$0xff] }
0x228a   :  { %7891 = vrot.lane.b32.xlu1 %v14887_v33, %s12987_s24 }
0x22f6   :  { %v14893_v27 = vpop.permute.xlu0 %7889 }
0x22f7   :  { %10839 = vst.msk [vmem:[%s15489_s6 + $0xa8] sm:$0xff] %vm214_vm1, %v14893_v27  ;;  %12434 = vmatprep.subr.mxu1 %v14893_v27 }
0x22f8   :  { %12435 = vmatpush3.msra.mxu1 %v14893_v27  ;;  %v14902_v54 = vpop.permute.xlu1 %7887 }
0x22f9   :  { %10838 = vst.msk [vmem:[%s15489_s6 + $0xa0] sm:$0xff] %vm214_vm1, %v14902_v54  ;;  %12436 = vmatprep.subr.mxu1 %v14902_v54 }
0x22fa   :  { %v14910_v32 = vpop.permute.xlu0 %7893  ;;  %12437 = vmatpush3.msra.mxu1 %v14902_v54 }
0x22fb   :  { %10841 = vst.msk [vmem:[%s15489_s6 + $0xb8] sm:$0xff] %vm214_vm1, %v14910_v32  ;;  %12439 = vmatmul.mubr.msk.f32.vlgmr.msra.gmra.mxu1 %vm57_vm0, %v14921_v47  ;;  %12441 = vmatprep.subr.mxu1 %v14910_v32 }
0x22fc   :  { %12442 = vmatpush3.msra.mxu1 %v14910_v32  ;;  %v14927_v34 = vpop.permute.xlu1 %7891  ;;  %12445 = vmatprep.mubr.msk.f32.mxu1 %vm57_vm0, %v14932_v14 }
0x22fd   :  { %10840 = vst.msk [vmem:[%s15489_s6 + $0xb0] sm:$0xff] %vm214_vm1, %v14927_v34  ;;  %12443 = vmatprep.subr.mxu1 %v14927_v34 }
0x22fe   :  { %12444 = vmatpush3.msra.mxu1 %v14927_v34 }
0x22ff   :  { %12446 = vmatmul.mubr.msk.f32.vlgmr.msra.gmra.mxu1 %vm57_vm0, %v14921_v47  ;;  %12462 = vmatprep.subr.mxu1 %v14948_v13 }
0x2300   :  { %12463 = vmatpush3.msra.mxu1 %v14948_v13  ;;  %12470 = vmatprep.mubr.msk.f32.mxu1 %vm214_vm1, %v14902_v54 }
0x2301   :  { %12464 = vmatprep.subr.mxu1 %v14957_v30 }
0x2302   :  { %12465 = vmatpush3.msra.mxu1 %v14957_v30 }
0x2303   :  { %12466 = vmatprep.subr.mxu1 %v14964_v55 }
0x2304   :  { %12467 = vmatpush3.msra.mxu1 %v14964_v55 }
0x2305   :  { %12468 = vmatprep.subr.mxu1 %v14971_v57 }
0x2306   :  { %12469 = vmatpush3.msra.mxu1 %v14971_v57 }
0x2307   :  { %12471 = vmatmul.mubr.msk.f32.vlgmr.msra.gmra.mxu1 %vm214_vm1, %v14893_v27 }
0x2308   :  { %12473 = vmatprep.mubr.msk.f32.mxu1 %vm214_vm1, %v14927_v34 }
0x230b   :  { %12474 = vmatmul.mubr.msk.f32.gmra.mxu1 %vm214_vm1, %v14910_v32 }
0x230c   :  { %12487 = vmatprep.mubr.msk.f32.mxu1 %vm57_vm0, %v14932_v14 }
0x23bb   :  { %v12440_v1 = vpop.f32.mrf.mxu1 }
0x23bc   :  { %12476 = vmatprep.subr.mxu0 %v12440_v1 }
0x23bd   :  { %v7975_v43 = vpop.f32.mrf.mxu1 }
0x23be   :  { %12456 = vmatprep.mubr.msk.f32.mxu0 %vm214_vm1, %v7975_v43 }
0x23bf   :  { %v12447_v61 = vpop.f32.mrf.mxu1  ;;  %12457 = vmatmul.mubr.msk.f32.vlgmr.msra.gmra.mxu0 %vm214_vm1, %v12440_v1 }
0x23c0   :  { %12477 = vmatpush3.msra.mxu0 %v12440_v1  ;;  %12483 = vmatprep.subr.mxu1 %v12447_v61 }
0x23c1   :  { %12478 = vmatprep.subr.mxu0 %v7975_v43  ;;  %v8050_v5 = vpop.f32.mrf.mxu1  ;;  %12484 = vmatpush3.msra.mxu1 %v12447_v61 }
0x23c2   :  { %12479 = vmatpush3.msra.mxu0 %v7975_v43  ;;  %12459 = vmatprep.mubr.msk.f32.mxu0 %vm214_vm1, %v8050_v5 }
0x23c3   :  { %12485 = vmatprep.subr.mxu1 %v8050_v5  ;;  %12460 = vmatmul.mubr.msk.f32.gmra.mxu0 %vm214_vm1, %v12447_v61 }
0x23c4   :  { %12486 = vmatpush3.msra.mxu1 %v8050_v5  ;;  %12480 = vmatprep.mubr.msk.f32.mxu0 %vm57_vm0, %v14932_v14 }
0x23c5   :  { %12488 = vmatmul.mubr.msk.f32.vlgmr.msra.gmra.mxu1 %vm57_vm0, %v14921_v47  ;;  %12490 = vmatprep.subr.mxu0 %v14994_v45 }
0x23c6   :  { %12508 = vmatprep.mubr.msk.f32.mxu1 %vm57_vm0, %v14932_v14 }
0x23c7   :  { %12481 = vmatmul.mubr.msk.f32.vlgmr.msra.gmra.mxu0 %vm57_vm0, %v14921_v47  ;;  %v12472_v48 = vpop.f32.mrf.mxu1 }
0x23c8   :  { %12491 = vmatpush3.msra.mxu0 %v14994_v45 }
0x23c9   :  { %12492 = vmatprep.subr.mxu0 %v15005_v44  ;;  %v8230_v36 = vpop.f32.mrf.mxu1 }
0x23ca   :  { %12493 = vmatpush3.msra.mxu0 %v15005_v44 }
0x23cb   :  { %12494 = vmatprep.subr.mxu0 %v15012_v29  ;;  %v12475_v50 = vpop.f32.mrf.mxu1 }
0x23cc   :  { %12495 = vmatpush3.msra.mxu0 %v15012_v29 }
0x23cd   :  { %12496 = vmatprep.subr.mxu0 %v15019_v6  ;;  %v8240_v38 = vpop.f32.mrf.mxu1 }
0x23ce   :  { %12497 = vmatpush3.msra.mxu0 %v15019_v6 }
0x23cf   :  { %12518 = vmatprep.subr.mxu0 %v15026_v10 }
0x247f   :  { %v12458_v23 = vpop.f32.mrf.mxu0 }
0x2480   :  { %v8236_v59 = vadd.f32 %v12472_v48, %v12458_v23 }
0x2481   :  { %v8137_v17 = vpop.f32.mrf.mxu0 }
0x2482   :  { %v8231_v40 = vadd.f32 %v8230_v36, %v8137_v17 }
0x2483   :  { %v12461_v60 = vpop.f32.mrf.mxu0 }
0x2484   :  { %v8246_v49 = vadd.f32 %v12475_v50, %v12461_v60 }
0x2485   :  { %v12489_v24 = vpop.f32.mrf.mxu1  ;;  %v8147_v53 = vpop.f32.mrf.mxu0 }
0x2486   :  { %v8241_v22 = vadd.f32 %v8240_v38, %v8147_v53  ;;  %v8402_v20 = vmul.f32 2.0, %v12489_v24 }
0x2487   :  { %v8390_v28 = vpop.f32.mrf.mxu1  ;;  %v12482_v51 = vpop.f32.mrf.mxu0 }
0x2488   :  { %v8400_v3 = vmul.f32 2.0, %v12482_v51  ;;  %v8401_v62 = vmul.f32 2.0, %v8390_v28  ;;  %v8406_v21 = vsub.f32 %v8402_v20, %v14910_v32  ;;  %v15123_v20 = vld [vmem:[%s15486_s5 + $0x8] sm:$0xff] }
0x2489   :  { %v8315_v42 = vpop.f32.mrf.mxu0 }
0x248a   :  { %v8399_v56 = vmul.f32 2.0, %v8315_v42  ;;  %v8404_v39 = vsub.f32 %v8400_v3, %v14893_v27  ;;  %v8405_v31 = vsub.f32 %v8401_v62, %v14927_v34 }
0x248c   :  { %v8403_v7 = vsub.f32 %v8399_v56, %v14902_v54 }
0x248e   :  { %12498 = vmatprep.mubr.msk.f32.mxu0 %vm214_vm1, %v8403_v7 }
0x248f   :  { %12499 = vmatmul.mubr.msk.f32.vlgmr.msra.gmra.mxu0 %vm214_vm1, %v8404_v39  ;;  %v15130_v39 = vld [vmem:[%s15486_s5] sm:$0xff] }
0x2490   :  { %12501 = vmatprep.mubr.msk.f32.mxu0 %vm214_vm1, %v8405_v31  ;;  %12519 = vmatpush3.msra.mxu0 %v15026_v10 }
0x2491   :  { %12520 = vmatprep.subr.mxu0 %v15040_v18 }
0x2492   :  { %12521 = vmatpush3.msra.mxu0 %v15040_v18 }
0x2493   :  { %12502 = vmatmul.mubr.msk.f32.gmra.mxu0 %vm214_vm1, %v8406_v21  ;;  %12522 = vmatprep.subr.mxu0 %v15048_v9 }
0x2494   :  { %12523 = vmatpush3.msra.mxu0 %v15048_v9 }
0x2495   :  { %12524 = vmatprep.subr.mxu0 %v14731_v52 }
0x2496   :  { %12525 = vmatpush3.msra.mxu0 %v14731_v52  ;;  %v10845_v52 = vld [vmem:[%s15487_s1 + $0xd8] sm:$0xff] }
0x254f   :  { %v12500_v2 = vpop.f32.mrf.mxu0 }
0x2550   :  { %v8505_v4 = vadd.f32 %v12500_v2, %v8236_v59  ;;  %v15153_v2 = vld [vmem:[%s15486_s5 + $0x58] sm:$0xff] }
0x2551   :  { %v8485_v58 = vpop.f32.mrf.mxu0 }
0x2552   :  { %v8509_v63 = vadd.f32 %v10843_v0, %v8505_v4  ;;  %v8504_v11 = vadd.f32 %v8485_v58, %v8231_v40  ;;  %v15164_v40 = vld [vmem:[%s15486_s5 + $0x50] sm:$0xff]  ;;  %v15171_v4 = vld [vmem:[%s15486_s5 + $0x48] sm:$0xff] }
0x2553   :  { %v12503_v16 = vpop.f32.mrf.mxu0 }
0x2554   :  { %v10867_v8 = vmul.f32 -1.442695, %v8509_v63  ;;  %v8508_v35 = vadd.f32 %v10842_v19, %v8504_v11  ;;  %v8507_v12 = vadd.f32 %v12503_v16, %v8246_v49  ;;  %v15178_v19 = vld [vmem:[%s15486_s5 + $0x40] sm:$0xff] }
0x2555   :  { %v8495_v1 = vpop.f32.mrf.mxu0 }
0x2556   :  { %12860 = vpow2.f32 %v10867_v8  ;;  %v10866_v43 = vmul.f32 -1.442695, %v8508_v35  ;;  %v8511_v61 = vadd.f32 %v10845_v52, %v8507_v12  ;;  %v8506_v5 = vadd.f32 %v8495_v1, %v8241_v22 }
0x2558   :  { %12862 = vpow2.f32 %v10866_v43  ;;  %v10869_v48 = vmul.f32 -1.442695, %v8511_v61  ;;  %v8510_v36 = vadd.f32 %v10844_v25, %v8506_v5 }
0x255a   :  { %12864 = vpow2.f32 %v10869_v48  ;;  %v10868_v50 = vmul.f32 -1.442695, %v8510_v36 }
0x255c   :  { %12866 = vpow2.f32 %v10868_v50 }
0x2563   :  { %v12861_v23 = vpop.eup %12860 }
0x2564   :  { %v8525_v17 = vadd.f32 1.0, %v12861_v23 }
0x2565   :  { %v12863_v38 = vpop.eup %12862 }
0x2566   :  { %12868 = vrcp.f32 %v8525_v17  ;;  %v8524_v60 = vadd.f32 1.0, %v12863_v38 }
0x2567   :  { %v12865_v24 = vpop.eup %12864 }
0x2568   :  { %12870 = vrcp.f32 %v8524_v60  ;;  %v8527_v53 = vadd.f32 1.0, %v12865_v24  ;;  %v12983_v24 = vld [vmem:[%s15485_s4 + $0x28] sm:$0xff] }
0x2569   :  { %v12867_v28 = vpop.eup %12866 }
0x256a   :  { %12872 = vrcp.f32 %v8527_v53  ;;  %v8526_v51 = vadd.f32 1.0, %v12867_v28  ;;  %v12984_v53 = vld [vmem:[%s15485_s4 + $0x20] sm:$0xff]  ;;  %v10871_v28 = vld [vmem:[%s15488_s2 + $0xc8] sm:$0xff] }
0x256c   :  { %12874 = vrcp.f32 %v8526_v51 }
0x2573   :  { %v15066_v3 = vpop.eup %12868 }
0x2574   :  { %v15070_v22 = vmul.f32 %v15066_v3, %v14893_v27 }
0x2575   :  { %v15072_v42 = vpop.eup %12870 }
0x2576   :  { %12504 = vmatprep.subr.mxu1 %v15070_v22  ;;  %v15077_v62 = vmul.f32 %v15072_v42, %v14902_v54 }
0x2577   :  { %v15079_v56 = vpop.eup %12872  ;;  %12505 = vmatpush3.msra.mxu1 %v15070_v22 }
0x2578   :  { %12506 = vmatprep.subr.mxu1 %v15077_v62  ;;  %v15085_v7 = vmul.f32 %v15079_v56, %v14910_v32  ;;  %v15107_v32 = vld [vmem:[%s15486_s5 + $0x18] sm:$0xff] }
0x2579   :  { %v15087_v27 = vpop.eup %12874  ;;  %12507 = vmatpush3.msra.mxu1 %v15077_v62 }
0x257a   :  { %12509 = vmatmul.mubr.msk.f32.vlgmr.msra.gmra.mxu1 %vm57_vm0, %v14921_v47  ;;  %12511 = vmatprep.subr.mxu1 %v15085_v7  ;;  %v15095_v54 = vmul.f32 %v15087_v27, %v14927_v34  ;;  %v15116_v34 = vld [vmem:[%s15486_s5 + $0x10] sm:$0xff] }
0x257b   :  { %12512 = vmatpush3.msra.mxu1 %v15085_v7  ;;  %12515 = vmatprep.mubr.msk.f32.mxu1 %vm57_vm0, %v14932_v14 }
0x257c   :  { %12513 = vmatprep.subr.mxu1 %v15095_v54 }
0x257d   :  { %12514 = vmatpush3.msra.mxu1 %v15095_v54 }
0x257e   :  { %12516 = vmatmul.mubr.msk.f32.vlgmr.msra.gmra.mxu1 %vm57_vm0, %v14921_v47  ;;  %12532 = vmatprep.subr.mxu1 %v15107_v32 }
0x257f   :  { %12533 = vmatpush3.msra.mxu1 %v15107_v32  ;;  %12540 = vmatprep.mubr.msk.f32.mxu1 %vm214_vm1, %v15077_v62 }
0x2580   :  { %12534 = vmatprep.subr.mxu1 %v15116_v34 }
0x2581   :  { %12535 = vmatpush3.msra.mxu1 %v15116_v34 }
0x2582   :  { %12536 = vmatprep.subr.mxu1 %v15123_v20 }
0x2583   :  { %12537 = vmatpush3.msra.mxu1 %v15123_v20 }
0x2584   :  { %12538 = vmatprep.subr.mxu1 %v15130_v39 }
0x2585   :  { %12539 = vmatpush3.msra.mxu1 %v15130_v39 }
0x2586   :  { %12541 = vmatmul.mubr.msk.f32.vlgmr.msra.gmra.mxu1 %vm214_vm1, %v15070_v22 }
0x2587   :  { %12543 = vmatprep.mubr.msk.f32.mxu1 %vm214_vm1, %v15095_v54 }
0x258a   :  { %12544 = vmatmul.mubr.msk.f32.gmra.mxu1 %vm214_vm1, %v15085_v7 }
0x258b   :  { %12557 = vmatprep.mubr.msk.f32.mxu1 %vm57_vm0, %v14932_v14 }
0x263a   :  { %v12510_v31 = vpop.f32.mrf.mxu1 }
0x263b   :  { %12546 = vmatprep.subr.mxu0 %v12510_v31 }
0x263c   :  { %v8611_v21 = vpop.f32.mrf.mxu1 }
0x263d   :  { %12526 = vmatprep.mubr.msk.f32.mxu0 %vm214_vm1, %v8611_v21 }
0x263e   :  { %v12517_v59 = vpop.f32.mrf.mxu1  ;;  %12527 = vmatmul.mubr.msk.f32.vlgmr.msra.gmra.mxu0 %vm214_vm1, %v12510_v31 }
0x263f   :  { %12547 = vmatpush3.msra.mxu0 %v12510_v31  ;;  %12553 = vmatprep.subr.mxu1 %v12517_v59 }
0x2640   :  { %12548 = vmatprep.subr.mxu0 %v8611_v21  ;;  %v8686_v0 = vpop.f32.mrf.mxu1  ;;  %12554 = vmatpush3.msra.mxu1 %v12517_v59 }
0x2641   :  { %12549 = vmatpush3.msra.mxu0 %v8611_v21  ;;  %12529 = vmatprep.mubr.msk.f32.mxu0 %vm214_vm1, %v8686_v0 }
0x2642   :  { %12555 = vmatprep.subr.mxu1 %v8686_v0  ;;  %12530 = vmatmul.mubr.msk.f32.gmra.mxu0 %vm214_vm1, %v12517_v59  ;;  %v10873_v59 = vld [vmem:[%s15488_s2 + $0xd8] sm:$0xff] }
0x2643   :  { %12556 = vmatpush3.msra.mxu1 %v8686_v0  ;;  %12550 = vmatprep.mubr.msk.f32.mxu0 %vm57_vm0, %v14932_v14 }
0x2644   :  { %12558 = vmatmul.mubr.msk.f32.vlgmr.msra.gmra.mxu1 %vm57_vm0, %v14921_v47  ;;  %12560 = vmatprep.subr.mxu0 %v15153_v2 }
0x2645   :  { %12578 = vmatprep.mubr.msk.f32.mxu1 %vm57_vm0, %v14932_v14 }
0x2646   :  { %12551 = vmatmul.mubr.msk.f32.vlgmr.msra.gmra.mxu0 %vm57_vm0, %v14921_v47  ;;  %v12542_v58 = vpop.f32.mrf.mxu1 }
0x2647   :  { %12561 = vmatpush3.msra.mxu0 %v15153_v2 }
0x2648   :  { %12562 = vmatprep.subr.mxu0 %v15164_v40  ;;  %v8870_v49 = vpop.f32.mrf.mxu1 }
0x2649   :  { %12563 = vmatpush3.msra.mxu0 %v15164_v40 }
0x264a   :  { %12564 = vmatprep.subr.mxu0 %v15171_v4  ;;  %v12545_v63 = vpop.f32.mrf.mxu1 }
0x264b   :  { %12565 = vmatpush3.msra.mxu0 %v15171_v4 }
0x264c   :  { %12566 = vmatprep.subr.mxu0 %v15178_v19  ;;  %v8880_v16 = vpop.f32.mrf.mxu1 }
0x264d   :  { %12567 = vmatpush3.msra.mxu0 %v15178_v19 }
0x264e   :  { %12588 = vmatprep.subr.mxu0 %v14826_v37 }
0x26fe   :  { %v12528_v11 = vpop.f32.mrf.mxu0 }
0x2700   :  { %v8773_v52 = vpop.f32.mrf.mxu0 }
0x2701   :  { %v8871_v51 = vadd.f32 %v8870_v49, %v8773_v52  ;;  %v10872_v49 = vld [vmem:[%s15488_s2 + $0xd0] sm:$0xff] }
0x2702   :  { %v12531_v8 = vpop.f32.mrf.mxu0 }
0x2704   :  { %v12559_v35 = vpop.f32.mrf.mxu1  ;;  %v8783_v12 = vpop.f32.mrf.mxu0 }
0x2705   :  { %v8881_v25 = vadd.f32 %v8880_v16, %v8783_v12  ;;  %v9042_v23 = vmul.f32 2.0, %v12559_v35 }
0x2706   :  { %v9030_v1 = vpop.f32.mrf.mxu1  ;;  %v12552_v43 = vpop.f32.mrf.mxu0 }
0x2707   :  { %v9040_v61 = vmul.f32 2.0, %v12552_v43  ;;  %v9041_v48 = vmul.f32 2.0, %v9030_v1  ;;  %v9046_v60 = vsub.f32 %v9042_v23, %v15085_v7 }
0x2708   :  { %v8955_v5 = vpop.f32.mrf.mxu0 }
0x2709   :  { %v9039_v36 = vmul.f32 2.0, %v8955_v5  ;;  %v9044_v17 = vsub.f32 %v9040_v61, %v15070_v22  ;;  %v9045_v38 = vsub.f32 %v9041_v48, %v15095_v54  ;;  %v8886_v54 = vadd.f32 %v12545_v63, %v12531_v8 }
0x270a   :  { %v9161_v61 = vsub.f32 1.0, %v15066_v3 }
0x270b   :  { %v9043_v50 = vsub.f32 %v9039_v36, %v15077_v62  ;;  %v10870_v62 = vld [vmem:[%s15488_s2 + $0xc0] sm:$0xff]  ;;  %v9160_v36 = vsub.f32 1.0, %v15072_v42 }
0x270d   :  { %12568 = vmatprep.mubr.msk.f32.mxu0 %vm214_vm1, %v9043_v50 }
0x270e   :  { %12569 = vmatmul.mubr.msk.f32.vlgmr.msra.gmra.mxu0 %vm214_vm1, %v9044_v17  ;;  %v9156_v17 = vmul.f32 %v15072_v42, %v14874_v46  ;;  %v9158_v46 = vmul.f32 %v15087_v27, %v14887_v33 }
0x270f   :  { %12571 = vmatprep.mubr.msk.f32.mxu0 %vm214_vm1, %v9045_v38  ;;  %12589 = vmatpush3.msra.mxu0 %v14826_v37  ;;  %v8876_v37 = vadd.f32 %v12542_v58, %v12528_v11 }
0x2710   :  { %12590 = vmatprep.subr.mxu0 %v14840_v41 }
0x2711   :  { %12591 = vmatpush3.msra.mxu0 %v14840_v41 }
0x2712   :  { %12572 = vmatmul.mubr.msk.f32.gmra.mxu0 %vm214_vm1, %v9046_v60  ;;  %12592 = vmatprep.subr.mxu0 %v12983_v24  ;;  %v9163_v60 = vsub.f32 1.0, %v15079_v56 }
0x2713   :  { %12593 = vmatpush3.msra.mxu0 %v12983_v24 }
0x2714   :  { %12594 = vmatprep.subr.mxu0 %v12984_v53 }
0x2715   :  { %12595 = vmatpush3.msra.mxu0 %v12984_v53 }
0x27ce   :  { %v12570_v41 = vpop.f32.mrf.mxu0 }
0x27cf   :  { %v9145_v22 = vadd.f32 %v12570_v41, %v8876_v37  ;;  %v9159_v37 = vmul.f32 %v15079_v56, %v14881_v15 }
0x27d0   :  { %v9125_v7 = vpop.f32.mrf.mxu0 }
0x27d1   :  { %v9149_v31 = vadd.f32 %v10871_v28, %v9145_v22  ;;  %v9144_v21 = vadd.f32 %v9125_v7, %v8871_v51 }
0x27d2   :  { %v12573_v0 = vpop.f32.mrf.mxu0 }
0x27d3   :  { %12876 = vtanh.f32 %v9149_v31  ;;  %v9148_v58 = vadd.f32 %v10870_v62, %v9144_v21  ;;  %v9147_v11 = vadd.f32 %v12573_v0, %v8886_v54 }
0x27d4   :  { %v9135_v52 = vpop.f32.mrf.mxu0 }
0x27d5   :  { %12878 = vtanh.f32 %v9148_v58  ;;  %v9151_v16 = vadd.f32 %v10873_v59, %v9147_v11  ;;  %v9146_v35 = vadd.f32 %v9135_v52, %v8881_v25  ;;  %v9157_v25 = vmul.f32 %v15066_v3, %v14869_v26 }
0x27d6   :  { %v9162_v26 = vsub.f32 1.0, %v15087_v27 }
0x27d7   :  { %12880 = vtanh.f32 %v9151_v16  ;;  %v9150_v63 = vadd.f32 %v10872_v49, %v9146_v35 }
0x27d9   :  { %12882 = vtanh.f32 %v9150_v63 }
0x27e0   :  { %v12877_v8 = vpop.eup %12876 }
0x27e1   :  { %9170 = vrot.lane.b32.xlu0 %v12877_v8, %s12986_s8 }
0x27e2   :  { %v12879_v12 = vpop.eup %12878 }
0x27e3   :  { %9168 = vrot.lane.b32.xlu1 %v12879_v12, %s12986_s8 }
0x27e4   :  { %v12881_v1 = vpop.eup %12880 }
0x27e5   :  { %9174 = vrot.lane.b32.xlu0 %v12881_v1, %s12986_s8  ;;  %v12985_v1 = vld [vmem:[%s15486_s5 + $0x20] sm:$0xff] }
0x27e6   :  { %v12883_v43 = vpop.eup %12882 }
0x27e7   :  { %9172 = vrot.lane.b32.xlu1 %v12883_v43, %s12986_s8 }
0x2853   :  { %v9171_v5 = vpop.permute.xlu0 %9170 }
0x2854   :  { %v9181_v48 = vmul.f32 %v9171_v5, %v9161_v61 }
0x2855   :  { %v9169_v50 = vpop.permute.xlu1 %9168 }
0x2856   :  { %v15220_v23 = vadd.f32 %v9181_v48, %v9157_v25  ;;  %v9180_v38 = vmul.f32 %v9169_v50, %v9160_v36  ;;  %v10898_v25 = vld [vmem:[%s15487_s1 + $0xe0] sm:$0xff] }
0x2857   :  { %v9175_v24 = vpop.permute.xlu0 %9174 }
0x2858   :  { %v15225_v53 = vadd.f32 %v9180_v38, %v9156_v17  ;;  %v9183_v28 = vmul.f32 %v9175_v24, %v9163_v60  ;;  %9194 = vrot.lane.b32.xlu0 %v15220_v23, %s12987_s24  ;;  %v10901_v17 = vld [vmem:[%s15487_s1 + $0xf8] sm:$0xff] }
0x2859   :  { %v9173_v3 = vpop.permute.xlu1 %9172 }
0x285a   :  { %v15232_v41 = vadd.f32 %v9183_v28, %v9159_v37  ;;  %v9182_v42 = vmul.f32 %v9173_v3, %v9162_v26  ;;  %9192 = vrot.lane.b32.xlu1 %v15225_v53, %s12987_s24  ;;  %v10900_v28 = vld [vmem:[%s15487_s1 + $0xf0] sm:$0xff] }
0x285c   :  { %v15238_v51 = vadd.f32 %v9182_v42, %v9158_v46  ;;  %9198 = vrot.lane.b32.xlu0 %v15232_v41, %s12987_s24 }
0x285e   :  { %9196 = vrot.lane.b32.xlu1 %v15238_v51, %s12987_s24 }
0x28ca   :  { %v15244_v15 = vpop.permute.xlu0 %9194 }
0x28cb   :  { %10895 = vst.msk [vmem:[%s15489_s6 + $0xc8] sm:$0xff] %vm214_vm1, %v15244_v15  ;;  %12574 = vmatprep.subr.mxu1 %v15244_v15 }
0x28cc   :  { %12575 = vmatpush3.msra.mxu1 %v15244_v15  ;;  %v15253_v33 = vpop.permute.xlu1 %9192 }
0x28cd   :  { %10894 = vst.msk [vmem:[%s15489_s6 + $0xc0] sm:$0xff] %vm214_vm1, %v15253_v33  ;;  %12576 = vmatprep.subr.mxu1 %v15253_v33 }
0x28ce   :  { %v15261_v56 = vpop.permute.xlu0 %9198  ;;  %12577 = vmatpush3.msra.mxu1 %v15253_v33 }
0x28cf   :  { %10897 = vst.msk [vmem:[%s15489_s6 + $0xd8] sm:$0xff] %vm214_vm1, %v15261_v56  ;;  %12579 = vmatmul.mubr.msk.f32.vlgmr.msra.gmra.mxu1 %vm57_vm0, %v14921_v47  ;;  %12581 = vmatprep.subr.mxu1 %v15261_v56 }
0x28d0   :  { %12582 = vmatpush3.msra.mxu1 %v15261_v56  ;;  %v15273_v27 = vpop.permute.xlu1 %9196  ;;  %12585 = vmatprep.mubr.msk.f32.mxu1 %vm57_vm0, %v14932_v14 }
0x28d1   :  { %10896 = vst.msk [vmem:[%s15489_s6 + $0xd0] sm:$0xff] %vm214_vm1, %v15273_v27  ;;  %12583 = vmatprep.subr.mxu1 %v15273_v27 }
0x28d2   :  { %12584 = vmatpush3.msra.mxu1 %v15273_v27 }
0x28d3   :  { %12586 = vmatmul.mubr.msk.f32.vlgmr.msra.gmra.mxu1 %vm57_vm0, %v14921_v47  ;;  %12602 = vmatprep.subr.mxu1 %v14948_v13 }
0x28d4   :  { %12603 = vmatpush3.msra.mxu1 %v14948_v13  ;;  %12610 = vmatprep.mubr.msk.f32.mxu1 %vm214_vm1, %v15253_v33 }
0x28d5   :  { %12604 = vmatprep.subr.mxu1 %v14957_v30 }
0x28d6   :  { %12605 = vmatpush3.msra.mxu1 %v14957_v30 }
0x28d7   :  { %12606 = vmatprep.subr.mxu1 %v14964_v55 }
0x28d8   :  { %12607 = vmatpush3.msra.mxu1 %v14964_v55 }
0x28d9   :  { %12608 = vmatprep.subr.mxu1 %v14971_v57 }
0x28da   :  { %12609 = vmatpush3.msra.mxu1 %v14971_v57 }
0x28db   :  { %12611 = vmatmul.mubr.msk.f32.vlgmr.msra.gmra.mxu1 %vm214_vm1, %v15244_v15 }
0x28dc   :  { %12613 = vmatprep.mubr.msk.f32.mxu1 %vm214_vm1, %v15273_v27 }
0x28df   :  { %12614 = vmatmul.mubr.msk.f32.gmra.mxu1 %vm214_vm1, %v15261_v56 }
0x28e0   :  { %12627 = vmatprep.mubr.msk.f32.mxu1 %vm57_vm0, %v14932_v14 }
0x298f   :  { %v12580_v13 = vpop.f32.mrf.mxu1 }
0x2990   :  { %12616 = vmatprep.subr.mxu0 %v12580_v13 }
0x2991   :  { %v9280_v30 = vpop.f32.mrf.mxu1 }
0x2992   :  { %12596 = vmatprep.mubr.msk.f32.mxu0 %vm214_vm1, %v9280_v30 }
0x2993   :  { %v12587_v55 = vpop.f32.mrf.mxu1  ;;  %12597 = vmatmul.mubr.msk.f32.vlgmr.msra.gmra.mxu0 %vm214_vm1, %v12580_v13 }
0x2994   :  { %12617 = vmatpush3.msra.mxu0 %v12580_v13  ;;  %12623 = vmatprep.subr.mxu1 %v12587_v55 }
0x2995   :  { %12618 = vmatprep.subr.mxu0 %v9280_v30  ;;  %v9355_v57 = vpop.f32.mrf.mxu1  ;;  %12624 = vmatpush3.msra.mxu1 %v12587_v55 }
0x2996   :  { %12619 = vmatpush3.msra.mxu0 %v9280_v30  ;;  %12599 = vmatprep.mubr.msk.f32.mxu0 %vm214_vm1, %v9355_v57 }
0x2997   :  { %12625 = vmatprep.subr.mxu1 %v9355_v57  ;;  %12600 = vmatmul.mubr.msk.f32.gmra.mxu0 %vm214_vm1, %v12587_v55 }
0x2998   :  { %12626 = vmatpush3.msra.mxu1 %v9355_v57  ;;  %12620 = vmatprep.mubr.msk.f32.mxu0 %vm57_vm0, %v14932_v14 }
0x2999   :  { %12628 = vmatmul.mubr.msk.f32.vlgmr.msra.gmra.mxu1 %vm57_vm0, %v14921_v47  ;;  %12630 = vmatprep.subr.mxu0 %v14994_v45 }
0x299a   :  { %12648 = vmatprep.mubr.msk.f32.mxu1 %vm57_vm0, %v14932_v14 }
0x299b   :  { %12621 = vmatmul.mubr.msk.f32.vlgmr.msra.gmra.mxu0 %vm57_vm0, %v14921_v47  ;;  %v12612_v22 = vpop.f32.mrf.mxu1 }
0x299c   :  { %12631 = vmatpush3.msra.mxu0 %v14994_v45 }
0x299d   :  { %12632 = vmatprep.subr.mxu0 %v15005_v44  ;;  %v9535_v62 = vpop.f32.mrf.mxu1 }
0x299e   :  { %12633 = vmatpush3.msra.mxu0 %v15005_v44 }
0x299f   :  { %12634 = vmatprep.subr.mxu0 %v15012_v29  ;;  %v12615_v7 = vpop.f32.mrf.mxu1 }
0x29a0   :  { %12635 = vmatpush3.msra.mxu0 %v15012_v29 }
0x29a1   :  { %12636 = vmatprep.subr.mxu0 %v15019_v6  ;;  %v9545_v45 = vpop.f32.mrf.mxu1 }
0x29a2   :  { %12637 = vmatpush3.msra.mxu0 %v15019_v6 }
0x29a3   :  { %12658 = vmatprep.subr.mxu0 %v15026_v10 }
0x2a53   :  { %v12598_v54 = vpop.f32.mrf.mxu0 }
0x2a54   :  { %v9541_v43 = vadd.f32 %v12612_v22, %v12598_v54 }
0x2a55   :  { %v9442_v31 = vpop.f32.mrf.mxu0 }
0x2a56   :  { %v9536_v5 = vadd.f32 %v9535_v62, %v9442_v31 }
0x2a57   :  { %v12601_v21 = vpop.f32.mrf.mxu0 }
0x2a59   :  { %v12629_v59 = vpop.f32.mrf.mxu1  ;;  %v9452_v0 = vpop.f32.mrf.mxu0 }
0x2a5a   :  { %v9546_v44 = vadd.f32 %v9545_v45, %v9452_v0  ;;  %v9707_v35 = vmul.f32 2.0, %v12629_v59 }
0x2a5b   :  { %v9695_v58 = vpop.f32.mrf.mxu1  ;;  %v12622_v11 = vpop.f32.mrf.mxu0 }
0x2a5c   :  { %v9705_v49 = vmul.f32 2.0, %v12622_v11  ;;  %v9706_v52 = vmul.f32 2.0, %v9695_v58  ;;  %v9711_v12 = vsub.f32 %v9707_v35, %v15261_v56 }
0x2a5d   :  { %v9620_v29 = vpop.f32.mrf.mxu0 }
0x2a5e   :  { %v9704_v16 = vmul.f32 2.0, %v9620_v29  ;;  %v9709_v63 = vsub.f32 %v9705_v49, %v15244_v15  ;;  %v9710_v8 = vsub.f32 %v9706_v52, %v15273_v27 }
0x2a60   :  { %v9708_v6 = vsub.f32 %v9704_v16, %v15253_v33 }
0x2a62   :  { %12638 = vmatprep.mubr.msk.f32.mxu0 %vm214_vm1, %v9708_v6 }
0x2a63   :  { %12639 = vmatmul.mubr.msk.f32.vlgmr.msra.gmra.mxu0 %vm214_vm1, %v9709_v63 }
0x2a64   :  { %12641 = vmatprep.mubr.msk.f32.mxu0 %vm214_vm1, %v9710_v8  ;;  %12659 = vmatpush3.msra.mxu0 %v15026_v10  ;;  %v10899_v10 = vld [vmem:[%s15487_s1 + $0xe8] sm:$0xff] }
0x2a65   :  { %12660 = vmatprep.subr.mxu0 %v15040_v18 }
0x2a66   :  { %12661 = vmatpush3.msra.mxu0 %v15040_v18 }
0x2a67   :  { %12642 = vmatmul.mubr.msk.f32.gmra.mxu0 %vm214_vm1, %v9711_v12  ;;  %12662 = vmatprep.subr.mxu0 %v15048_v9 }
0x2a68   :  { %12663 = vmatpush3.msra.mxu0 %v15048_v9  ;;  %v9551_v9 = vadd.f32 %v12615_v7, %v12601_v21 }
0x2a69   :  { %12664 = vmatprep.subr.mxu0 %v12985_v1 }
0x2a6a   :  { %12665 = vmatpush3.msra.mxu0 %v12985_v1 }
0x2b23   :  { %v12640_v61 = vpop.f32.mrf.mxu0 }
0x2b24   :  { %v9810_v18 = vadd.f32 %v12640_v61, %v9541_v43 }
0x2b25   :  { %v9790_v48 = vpop.f32.mrf.mxu0 }
0x2b26   :  { %v9814_v36 = vadd.f32 %v10899_v10, %v9810_v18  ;;  %v9809_v50 = vadd.f32 %v9790_v48, %v9536_v5 }
0x2b27   :  { %v12643_v38 = vpop.f32.mrf.mxu0 }
0x2b28   :  { %v10923_v60 = vmul.f32 -1.442695, %v9814_v36  ;;  %v9813_v24 = vadd.f32 %v10898_v25, %v9809_v50  ;;  %v9812_v37 = vadd.f32 %v12643_v38, %v9551_v9  ;;  %v10927_v25 = vld [vmem:[%s15488_s2 + $0xe8] sm:$0xff]  ;;  %v10926_v50 = vld [vmem:[%s15488_s2 + $0xe0] sm:$0xff] }
0x2b29   :  { %v9800_v26 = vpop.f32.mrf.mxu0 }
0x2b2a   :  { %12884 = vpow2.f32 %v10923_v60  ;;  %v10922_v3 = vmul.f32 -1.442695, %v9813_v24  ;;  %v9816_v46 = vadd.f32 %v10901_v17, %v9812_v37  ;;  %v9811_v42 = vadd.f32 %v9800_v26, %v9546_v44  ;;  %v10929_v37 = vld [vmem:[%s15488_s2 + $0xf8] sm:$0xff] }
0x2b2c   :  { %12886 = vpow2.f32 %v10922_v3  ;;  %v10925_v13 = vmul.f32 -1.442695, %v9816_v46  ;;  %v9815_v30 = vadd.f32 %v10900_v28, %v9811_v42  ;;  %v10928_v46 = vld [vmem:[%s15488_s2 + $0xf0] sm:$0xff] }
0x2b2e   :  { %12888 = vpow2.f32 %v10925_v13  ;;  %v10924_v55 = vmul.f32 -1.442695, %v9815_v30 }
0x2b30   :  { %12890 = vpow2.f32 %v10924_v55 }
0x2b37   :  { %v12885_v57 = vpop.eup %12884 }
0x2b38   :  { %v9830_v22 = vadd.f32 1.0, %v12885_v57 }
0x2b39   :  { %v12887_v62 = vpop.eup %12886 }
0x2b3a   :  { %12892 = vrcp.f32 %v9830_v22  ;;  %v9829_v7 = vadd.f32 1.0, %v12887_v62 }
0x2b3b   :  { %v12889_v54 = vpop.eup %12888 }
0x2b3c   :  { %12894 = vrcp.f32 %v9829_v7  ;;  %v9832_v31 = vadd.f32 1.0, %v12889_v54 }
0x2b3d   :  { %v12891_v45 = vpop.eup %12890 }
0x2b3e   :  { %12896 = vrcp.f32 %v9832_v31  ;;  %v9831_v21 = vadd.f32 1.0, %v12891_v45 }
0x2b40   :  { %12898 = vrcp.f32 %v9831_v21 }
0x2b47   :  { %v15353_v59 = vpop.eup %12892 }
0x2b48   :  { %v15357_v0 = vmul.f32 %v15353_v59, %v15244_v15  ;;  %v10466_v54 = vsub.f32 1.0, %v15353_v59  ;;  %v10462_v45 = vmul.f32 %v15353_v59, %v15220_v23 }
0x2b49   :  { %v15359_v44 = vpop.eup %12894 }
0x2b4a   :  { %12644 = vmatprep.subr.mxu1 %v15357_v0  ;;  %v15364_v58 = vmul.f32 %v15359_v44, %v15253_v33 }
0x2b4b   :  { %v15366_v11 = vpop.eup %12896  ;;  %12645 = vmatpush3.msra.mxu1 %v15357_v0 }
0x2b4c   :  { %12646 = vmatprep.subr.mxu1 %v15364_v58  ;;  %v15372_v49 = vmul.f32 %v15366_v11, %v15261_v56 }
0x2b4d   :  { %v15374_v15 = vpop.eup %12898  ;;  %12647 = vmatpush3.msra.mxu1 %v15364_v58 }
0x2b4e   :  { %12649 = vmatmul.mubr.msk.f32.vlgmr.msra.gmra.mxu1 %vm57_vm0, %v14921_v47  ;;  %12651 = vmatprep.subr.mxu1 %v15372_v49  ;;  %v15382_v33 = vmul.f32 %v15374_v15, %v15273_v27  ;;  %v10467_v23 = vsub.f32 1.0, %v15374_v15 }
0x2b4f   :  { %12652 = vmatpush3.msra.mxu1 %v15372_v49  ;;  %12655 = vmatprep.mubr.msk.f32.mxu1 %vm57_vm0, %v14932_v14 }
0x2b50   :  { %12653 = vmatprep.subr.mxu1 %v15382_v33 }
0x2b51   :  { %12654 = vmatpush3.msra.mxu1 %v15382_v33 }
0x2b52   :  { %12656 = vmatmul.mubr.msk.f32.vlgmr.msra.gmra.mxu1 %vm57_vm0, %v14921_v47  ;;  %12672 = vmatprep.subr.mxu1 %v15107_v32 }
0x2b53   :  { %12673 = vmatpush3.msra.mxu1 %v15107_v32  ;;  %12680 = vmatprep.mubr.msk.f32.mxu1 %vm214_vm1, %v15364_v58 }
0x2b54   :  { %12674 = vmatprep.subr.mxu1 %v15116_v34 }
0x2b55   :  { %12675 = vmatpush3.msra.mxu1 %v15116_v34 }
0x2b56   :  { %12676 = vmatprep.subr.mxu1 %v15123_v20 }
0x2b57   :  { %12677 = vmatpush3.msra.mxu1 %v15123_v20 }
0x2b58   :  { %12678 = vmatprep.subr.mxu1 %v15130_v39 }
0x2b59   :  { %12679 = vmatpush3.msra.mxu1 %v15130_v39 }
0x2b5a   :  { %12681 = vmatmul.mubr.msk.f32.vlgmr.msra.gmra.mxu1 %vm214_vm1, %v15357_v0 }
0x2b5b   :  { %12683 = vmatprep.mubr.msk.f32.mxu1 %vm214_vm1, %v15382_v33 }
0x2b5e   :  { %12684 = vmatmul.mubr.msk.f32.gmra.mxu1 %vm214_vm1, %v15372_v49 }
0x2b5f   :  { %12697 = vmatprep.mubr.msk.f32.mxu1 %vm57_vm0, %v14932_v14 }
0x2c0e   :  { %v12650_v32 = vpop.f32.mrf.mxu1 }
0x2c0f   :  { %12686 = vmatprep.subr.mxu0 %v12650_v32 }
0x2c10   :  { %v9916_v34 = vpop.f32.mrf.mxu1 }
0x2c11   :  { %12666 = vmatprep.mubr.msk.f32.mxu0 %vm214_vm1, %v9916_v34 }
0x2c12   :  { %v12657_v20 = vpop.f32.mrf.mxu1  ;;  %12667 = vmatmul.mubr.msk.f32.vlgmr.msra.gmra.mxu0 %vm214_vm1, %v12650_v32 }
0x2c13   :  { %12687 = vmatpush3.msra.mxu0 %v12650_v32  ;;  %12693 = vmatprep.subr.mxu1 %v12657_v20 }
0x2c14   :  { %12688 = vmatprep.subr.mxu0 %v9916_v34  ;;  %v9991_v39 = vpop.f32.mrf.mxu1  ;;  %12694 = vmatpush3.msra.mxu1 %v12657_v20 }
0x2c15   :  { %12689 = vmatpush3.msra.mxu0 %v9916_v34  ;;  %12669 = vmatprep.mubr.msk.f32.mxu0 %vm214_vm1, %v9991_v39  ;;  %v10468_v34 = vsub.f32 1.0, %v15366_v11 }
0x2c16   :  { %12695 = vmatprep.subr.mxu1 %v9991_v39  ;;  %12670 = vmatmul.mubr.msk.f32.gmra.mxu0 %vm214_vm1, %v12657_v20 }
0x2c17   :  { %12696 = vmatpush3.msra.mxu1 %v9991_v39  ;;  %12690 = vmatprep.mubr.msk.f32.mxu0 %vm57_vm0, %v14932_v14 }
0x2c18   :  { %12698 = vmatmul.mubr.msk.f32.vlgmr.msra.gmra.mxu1 %vm57_vm0, %v14921_v47  ;;  %12700 = vmatprep.subr.mxu0 %v15153_v2 }
0x2c1a   :  { %12691 = vmatmul.mubr.msk.f32.vlgmr.msra.gmra.mxu0 %vm57_vm0, %v14921_v47  ;;  %v12682_v14 = vpop.f32.mrf.mxu1 }
0x2c1b   :  { %12701 = vmatpush3.msra.mxu0 %v15153_v2 }
0x2c1c   :  { %12702 = vmatprep.subr.mxu0 %v15164_v40  ;;  %v10175_v56 = vpop.f32.mrf.mxu1 }
0x2c1d   :  { %12703 = vmatpush3.msra.mxu0 %v15164_v40 }
0x2c1e   :  { %12704 = vmatprep.subr.mxu0 %v15171_v4  ;;  %v12685_v27 = vpop.f32.mrf.mxu1 }
0x2c1f   :  { %12705 = vmatpush3.msra.mxu0 %v15171_v4 }
0x2c20   :  { %12706 = vmatprep.subr.mxu0 %v15178_v19  ;;  %v10185_v47 = vpop.f32.mrf.mxu1 }
0x2c21   :  { %12707 = vmatpush3.msra.mxu0 %v15178_v19 }
0x2cd2   :  { %v12668_v29 = vpop.f32.mrf.mxu0 }
0x2cd3   :  { %v10181_v18 = vadd.f32 %v12682_v14, %v12668_v29  ;;  %v10464_v14 = vmul.f32 %v15366_v11, %v15232_v41  ;;  %v10463_v29 = vmul.f32 %v15374_v15, %v15238_v51 }
0x2cd4   :  { %v10078_v52 = vpop.f32.mrf.mxu0 }
0x2cd5   :  { %v10176_v9 = vadd.f32 %v10175_v56, %v10078_v52 }
0x2cd6   :  { %v12671_v16 = vpop.f32.mrf.mxu0 }
0x2cd7   :  { %v10191_v38 = vadd.f32 %v12685_v27, %v12671_v16 }
0x2cd8   :  { %v12699_v2 = vpop.f32.mrf.mxu1  ;;  %v10088_v6 = vpop.f32.mrf.mxu0 }
0x2cd9   :  { %v10186_v35 = vadd.f32 %v10185_v47, %v10088_v6  ;;  %v10347_v10 = vmul.f32 2.0, %v12699_v2 }
0x2cda   :  { %v10335_v63 = vpop.f32.mrf.mxu1  ;;  %v12692_v40 = vpop.f32.mrf.mxu0 }
0x2cdb   :  { %v10345_v8 = vmul.f32 2.0, %v12692_v40  ;;  %v10346_v1 = vmul.f32 2.0, %v10335_v63  ;;  %v10351_v5 = vsub.f32 %v10347_v10, %v15372_v49 }
0x2cdc   :  { %v10260_v12 = vpop.f32.mrf.mxu0 }
0x2cdd   :  { %v10344_v4 = vmul.f32 2.0, %v10260_v12  ;;  %v10349_v19 = vsub.f32 %v10345_v8, %v15357_v0  ;;  %v10350_v61 = vsub.f32 %v10346_v1, %v15382_v33  ;;  %v10465_v0 = vsub.f32 1.0, %v15359_v44 }
0x2cde   :  { %v10461_v33 = vmul.f32 %v15359_v44, %v15225_v53 }
0x2cdf   :  { %v10348_v43 = vsub.f32 %v10344_v4, %v15364_v58 }
0x2ce1   :  { %12708 = vmatprep.mubr.msk.f32.mxu0 %vm214_vm1, %v10348_v43 }
0x2ce2   :  { %12709 = vmatmul.mubr.msk.f32.vlgmr.msra.gmra.mxu0 %vm214_vm1, %v10349_v19 }
0x2ce3   :  { %12711 = vmatprep.mubr.msk.f32.mxu0 %vm214_vm1, %v10350_v61 }
0x2ce6   :  { %12712 = vmatmul.mubr.msk.f32.gmra.mxu0 %vm214_vm1, %v10351_v5 }
0x2da2   :  { %v12710_v48 = vpop.f32.mrf.mxu0 }
0x2da3   :  { %v10450_v36 = vadd.f32 %v12710_v48, %v10181_v18 }
0x2da4   :  { %v10430_v17 = vpop.f32.mrf.mxu0 }
0x2da5   :  { %v10454_v60 = vadd.f32 %v10927_v25, %v10450_v36  ;;  %v10449_v24 = vadd.f32 %v10430_v17, %v10176_v9 }
0x2da6   :  { %v12713_v28 = vpop.f32.mrf.mxu0 }
0x2da7   :  { %12900 = vtanh.f32 %v10454_v60  ;;  %v10453_v26 = vadd.f32 %v10926_v50, %v10449_v24  ;;  %v10452_v3 = vadd.f32 %v12713_v28, %v10191_v38 }
0x2da8   :  { %v10440_v42 = vpop.f32.mrf.mxu0 }
0x2da9   :  { %12902 = vtanh.f32 %v10453_v26  ;;  %v10456_v13 = vadd.f32 %v10929_v37, %v10452_v3  ;;  %v10451_v30 = vadd.f32 %v10440_v42, %v10186_v35 }
0x2dab   :  { %12904 = vtanh.f32 %v10456_v13  ;;  %v10455_v55 = vadd.f32 %v10928_v46, %v10451_v30 }
0x2dad   :  { %12906 = vtanh.f32 %v10455_v55 }
0x2db4   :  { %v12901_v57 = vpop.eup %12900 }
0x2db5   :  { %10475 = vrot.lane.b32.xlu1 %v12901_v57, %s12986_s8 }
0x2db6   :  { %v12903_v22 = vpop.eup %12902 }
0x2db7   :  { %10473 = vrot.lane.b32.xlu0 %v12903_v22, %s12986_s8 }
0x2db8   :  { %v12905_v62 = vpop.eup %12904 }
0x2db9   :  { %10479 = vrot.lane.b32.xlu1 %v12905_v62, %s12986_s8 }
0x2dba   :  { %v12907_v7 = vpop.eup %12906 }
0x2dbb   :  { %10477 = vrot.lane.b32.xlu0 %v12907_v7, %s12986_s8 }
0x2e27   :  { %v10476_v31 = vpop.permute.xlu1 %10475 }
0x2e28   :  { %v10486_v21 = vmul.f32 %v10476_v31, %v10466_v54 }
0x2e29   :  { %v10474_v58 = vpop.permute.xlu0 %10473 }
0x2e2a   :  { %v10490_v49 = vadd.f32 %v10486_v21, %v10462_v45  ;;  %v10485_v32 = vmul.f32 %v10474_v58, %v10465_v0 }
0x2e2b   :  { %v10480_v20 = vpop.permute.xlu1 %10479 }
0x2e2c   :  { %v10489_v39 = vadd.f32 %v10485_v32, %v10461_v33  ;;  %v10488_v56 = vmul.f32 %v10480_v20, %v10468_v34  ;;  %10499 = vrot.lane.b32.xlu1 %v10490_v49, %s12987_s24 }
0x2e2d   :  { %v10478_v59 = vpop.permute.xlu0 %10477 }
0x2e2e   :  { %v10492_v27 = vadd.f32 %v10488_v56, %v10464_v14  ;;  %v10487_v52 = vmul.f32 %v10478_v59, %v10467_v23  ;;  %10497 = vrot.lane.b32.xlu0 %v10489_v39, %s12987_s24 }
0x2e30   :  { %v10491_v53 = vadd.f32 %v10487_v52, %v10463_v29  ;;  %10503 = vrot.lane.b32.xlu1 %v10492_v27, %s12987_s24 }
0x2e32   :  { %10501 = vrot.lane.b32.xlu0 %v10491_v53, %s12987_s24 }
0x2e9e   :  { %v10500_v44 = vpop.permute.xlu1 %10499 }
0x2e9f   :  { %10951 = vst.msk [vmem:[%s15489_s6 + $0xe8] sm:$0xff] %vm214_vm1, %v10500_v44 }
0x2ea0   :  { %v10498_v41 = vpop.permute.xlu0 %10497 }
0x2ea1   :  { %10950 = vst.msk [vmem:[%s15489_s6 + $0xe0] sm:$0xff] %vm214_vm1, %v10498_v41 }
0x2ea2   :  { %v10504_v51 = vpop.permute.xlu1 %10503 }
0x2ea3   :  { %10953 = vst.msk [vmem:[%s15489_s6 + $0xf8] sm:$0xff] %vm214_vm1, %v10504_v51 }
0x2ea4   :  { %v10502_v11 = vpop.permute.xlu0 %10501 }
0x2ea5   :  { %10952 = vst.msk [vmem:[%s15489_s6 + $0xf0] sm:$0xff] %vm214_vm1, %v10502_v11 }

</bundles_post_ra>
